<compile_context>
chip_gen: v7x
topology: tpu7x:2x2x1
jax: 0.10.0
libtpu: 0.0.40
codegen_flags: <defaults>
</compile_context>

<pallas_src>
import functools

import jax
import jax.numpy as jnp
import numpy as np
from jax.experimental import pallas as pl
from jax.experimental.pallas import tpu as pltpu


# ----------------------------------------------------------------------------
# Kernel 1: 3x3 conv (stride 1, padding pre-applied, dx pre-stacked) + bias
#           + 2x2/2 max-pool (+ optional ReLU).  One image per grid step.
# ----------------------------------------------------------------------------
def conv3x3_pool_kernel(x_ref, w_ref, b_ref, o_ref, acc_ref, *, H, W, relu):
    # x_ref : (1, H+2, W, K=3*Cin)  dx-stacked, zero-padded rows, one image
    # w_ref : (3, K, Cout)          row index inside a dy slab = dx*Cin + ci
    # b_ref : (1, Cout) f32
    # o_ref : (1, H//2, W//2, Cout)
    # acc_ref: (H*W, Cout) f32 VMEM scratch accumulator
    K = x_ref.shape[-1]
    Cout = o_ref.shape[-1]
    half = (H * W) // 2

    x = x_ref[0]                                           # (H+2, W, K)
    # One matmul per dy shift, K = 3*Cin, f32 accumulation in VMEM scratch.
    acc_ref[...] = jnp.dot(x[0:H].reshape(H * W, K), w_ref[0],
                           preferred_element_type=jnp.float32)
    acc_ref[...] += jnp.dot(x[1:H + 1].reshape(H * W, K), w_ref[1],
                            preferred_element_type=jnp.float32)
    acc_ref[...] += jnp.dot(x[2:H + 2].reshape(H * W, K), w_ref[2],
                            preferred_element_type=jnp.float32)

    # 2x2/2 max-pool.  Rows of acc are (h, w) row-major and W is even, so
    # even-w / odd-w rows are the two stride-2 sublane combs of the scratch.
    wmax = jnp.maximum(acc_ref[pl.ds(0, half, 2), :],
                       acc_ref[pl.ds(1, half, 2), :])      # (H*(W//2), Cout)
    # Height pool: split leading dims only (pure relabel, no lane movement).
    wmax = wmax.reshape(H // 2, 2, W // 2, Cout)
    y = jnp.maximum(wmax[:, 0], wmax[:, 1])                # (H//2, W//2, Cout)

    y = y + b_ref[...]                 # per-channel bias commutes with max-pool
    if relu:
        y = jnp.maximum(y, 0.0)
    o_ref[0] = y.astype(o_ref.dtype)


def conv_block(xs, w3, bias, *, relu):
    B, Hp, W, K = xs.shape
    H = Hp - 2
    Cout = w3.shape[-1]
    # TODO(synk): odd H/W (MaxPool2d floor behavior) and row-strip spatial
    # tiling for very large "variable" inputs are not implemented.
    assert H % 2 == 0 and W % 2 == 0
    kern = functools.partial(conv3x3_pool_kernel, H=H, W=W, relu=relu)
    return pl.pallas_call(
        kern,
        out_shape=jax.ShapeDtypeStruct((B, H // 2, W // 2, Cout), xs.dtype),
        grid=(B,),
        in_specs=[
            pl.BlockSpec((1, Hp, W, K), lambda b: (b, 0, 0, 0)),
            pl.BlockSpec((3, K, Cout), lambda b: (0, 0, 0)),
            pl.BlockSpec((1, Cout), lambda b: (0, 0)),
        ],
        out_specs=pl.BlockSpec((1, H // 2, W // 2, Cout), lambda b: (b, 0, 0, 0)),
        scratch_shapes=[pltpu.VMEM((H * W, Cout), jnp.float32)],
        compiler_params=pltpu.CompilerParams(dimension_semantics=("parallel",)),
    )(xs, w3, bias)


# ----------------------------------------------------------------------------
# Kernel 2: AdaptiveAvgPool2d((4,4)) as a pooling-matrix matmul.
#           One image per grid step, output (16, C) per image.
# ----------------------------------------------------------------------------
def adaptive_pool_kernel(x_ref, pm_ref, o_ref):
    # x_ref: (1, Hf, Wf, C) ; pm_ref: (16, Hf*Wf) f32 ; o_ref: (1, 16, C) f32
    Hf, Wf, C = x_ref.shape[1], x_ref.shape[2], x_ref.shape[3]
    x = x_ref[0].reshape(Hf * Wf, C).astype(jnp.float32)   # leading-dim relabel
    o_ref[0] = jnp.dot(pm_ref[...], x, preferred_element_type=jnp.float32)


def adaptive_pool(x, pool_mat):
    B, Hf, Wf, C = x.shape
    nbins = pool_mat.shape[0]
    return pl.pallas_call(
        adaptive_pool_kernel,
        out_shape=jax.ShapeDtypeStruct((B, nbins, C), jnp.float32),
        grid=(B,),
        in_specs=[
            pl.BlockSpec((1, Hf, Wf, C), lambda b: (b, 0, 0, 0)),
            pl.BlockSpec(pool_mat.shape, lambda b: (0, 0)),
        ],
        out_specs=pl.BlockSpec((1, nbins, C), lambda b: (b, 0, 0)),
        compiler_params=pltpu.CompilerParams(dimension_semantics=("parallel",)),
    )(x, pool_mat)


# ----------------------------------------------------------------------------
# Kernel 3: fc — one (B, 16*C) @ (16*C, NCp) matmul + bias for the whole batch.
# ----------------------------------------------------------------------------
def fc_kernel(x_ref, w_ref, b_ref, o_ref):
    logits = jnp.dot(x_ref[...].astype(w_ref.dtype), w_ref[...],
                     preferred_element_type=jnp.float32)
    o_ref[...] = logits + b_ref[...]


def fc(x, w, b):
    B, F = x.shape
    NCp = w.shape[-1]
    return pl.pallas_call(
        fc_kernel,
        out_shape=jax.ShapeDtypeStruct((B, NCp), jnp.float32),
        grid=(1,),
        in_specs=[
            pl.BlockSpec((B, F), lambda i: (0, 0)),
            pl.BlockSpec((F, NCp), lambda i: (0, 0)),
            pl.BlockSpec((1, NCp), lambda i: (0, 0)),
        ],
        out_specs=pl.BlockSpec((B, NCp), lambda i: (0, 0)),
        compiler_params=pltpu.CompilerParams(dimension_semantics=("arbitrary",)),
    )(x, w, b)


# ----------------------------------------------------------------------------
# Glue: layout permutes, channel/class padding, dx stacking, pooling matrix.
# ----------------------------------------------------------------------------
def _stack_dx(x_pad):
    """(B, H+2, W+2, C) zero-padded -> (B, H+2, W, 3*C), channel = dx*C + c."""
    W = x_pad.shape[2] - 2
    return jnp.concatenate([x_pad[:, :, dx:dx + W, :] for dx in range(3)], axis=-1)


def _adaptive_pool_matrix(h_in, w_in, h_out=4, w_out=4):
    """(h_out*w_out, h_in*w_in) matrix implementing PyTorch AdaptiveAvgPool2d."""
    pm = np.zeros((h_out * w_out, h_in * w_in), np.float32)
    for oh in range(h_out):
        hs, he = (oh * h_in) // h_out, -((-(oh + 1) * h_in) // h_out)
        for ow in range(w_out):
            ws, we = (ow * w_in) // w_out, -((-(ow + 1) * w_in) // w_out)
            val = 1.0 / ((he - hs) * (we - ws))
            for h in range(hs, he):
                for w in range(ws, we):
                    pm[oh * w_out + ow, h * w_in + w] = val
    return jnp.asarray(pm)


def variable_input_cnn_forward(x_nchw, params, *, compute_dtype=jnp.bfloat16):
    num_classes = params["fc_w"].shape[0]
    c1_out = params["conv1_w"].shape[0]          # 64
    c2_in = params["conv2_w"].shape[1]           # 64
    c2_out = params["conv2_w"].shape[0]          # 128
    C1 = 128                                     # conv1 Cout padded -> lane-dense h1
    NCp = ((num_classes + 127) // 128) * 128     # fc classes padded -> lane-dense out

    x = jnp.transpose(x_nchw, (0, 2, 3, 1)).astype(compute_dtype)      # NCHW -> NHWC

    # conv1 weight OIHW -> (dy, dx, ci, co); pad co 64->128; -> (3, 3*ci, 128)
    w1 = jnp.transpose(params["conv1_w"], (2, 3, 1, 0))
    w1 = jnp.pad(w1, ((0, 0), (0, 0), (0, 0), (0, C1 - c1_out)))
    w1 = w1.reshape(3, 3 * w1.shape[2], C1).astype(compute_dtype)
    b1 = jnp.pad(params["conv1_b"], (0, C1 - c1_out)).reshape(1, C1).astype(jnp.float32)

    # conv2 weight OIHW -> (dy, dx, ci, co); pad ci 64->128 (matches padded h1)
    w2 = jnp.transpose(params["conv2_w"], (2, 3, 1, 0))
    w2 = jnp.pad(w2, ((0, 0), (0, 0), (0, C1 - c2_in), (0, 0)))
    w2 = w2.reshape(3, 3 * C1, c2_out).astype(compute_dtype)
    b2 = params["conv2_b"].reshape(1, c2_out).astype(jnp.float32)

    xp = jnp.pad(x, ((0, 0), (1, 1), (1, 1), (0, 0)))
    h1 = conv_block(_stack_dx(xp), w1, b1, relu=True)     # conv1+pool+relu (pad ch are 0)
    h1p = jnp.pad(h1, ((0, 0), (1, 1), (1, 1), (0, 0)))
    h2 = conv_block(_stack_dx(h1p), w2, b2, relu=False)   # conv2+pool

    B, Hf, Wf, C = h2.shape
    pool_mat = _adaptive_pool_matrix(Hf, Wf)              # PyTorch uneven-bin rule
    pooled = adaptive_pool(h2, pool_mat)                  # (B, 16, C) f32
    flat = pooled.reshape(B, 16 * C)                      # row-major index k*C + c

    # fc weight (NC, C*16) with PyTorch flatten order c*16 + (oh*4 + ow)
    #   -> (16*C, NCp) with row index k*C + c, k = oh*4 + ow
    wfc = params["fc_w"].reshape(num_classes, C, 4, 4)
    wfc = jnp.transpose(wfc, (2, 3, 1, 0)).reshape(16 * C, num_classes)
    wfc = jnp.pad(wfc, ((0, 0), (0, NCp - num_classes))).astype(compute_dtype)
    bfc = jnp.pad(params["fc_b"], (0, NCp - num_classes)).reshape(1, NCp).astype(jnp.float32)

    out = fc(flat, wfc, bfc)                              # (B, NCp) f32
    return out[:, :num_classes]


# ----------------------------------------------------------------------------
# Pure-JAX reference reproducing the PyTorch (NCHW, f32) semantics.
# ----------------------------------------------------------------------------
def torch_reference(x_nchw, params):
    def conv(x, w, b):
        y = jax.lax.conv_general_dilated(
            x, w, (1, 1), ((1, 1), (1, 1)),
            dimension_numbers=("NCHW", "OIHW", "NCHW"))
        return y + b[None, :, None, None]

    def maxpool(x):
        return jax.lax.reduce_window(x, -jnp.inf, jax.lax.max,
                                     (1, 1, 2, 2), (1, 1, 2, 2), "VALID")

    h = conv(x_nchw, params["conv1_w"], params["conv1_b"])
    h = maxpool(h)
    h = jnp.maximum(h, 0.0)
    h = conv(h, params["conv2_w"], params["conv2_b"])
    h = maxpool(h)
    B, C, H, W = h.shape
    h = h.reshape(B, C, 4, H // 4, 4, W // 4).mean(axis=(3, 5))   # adaptive (4,4)
    flat = h.reshape(B, -1)
    return flat @ params["fc_w"].T + params["fc_b"]


if __name__ == "__main__":
    num_classes = 10
    key = jax.random.PRNGKey(0)
    kx, k1, k2, k3, k4, k5, k6 = jax.random.split(key, 7)

    x = jax.random.normal(kx, (2, 3, 32, 32), jnp.float32)        # NCHW like PyTorch

    params = {
        "conv1_w": jax.random.normal(k1, (64, 3, 3, 3), jnp.float32) * 0.10,
        "conv1_b": jax.random.normal(k2, (64,), jnp.float32) * 0.10,
        "conv2_w": jax.random.normal(k3, (128, 64, 3, 3), jnp.float32) * 0.05,
        "conv2_b": jax.random.normal(k4, (128,), jnp.float32) * 0.05,
        "fc_w": jax.random.normal(k5, (num_classes, 128 * 4 * 4), jnp.float32) * 0.02,
        "fc_b": jax.random.normal(k6, (num_classes,), jnp.float32) * 0.02,
    }

    fwd = jax.jit(variable_input_cnn_forward)
    out = jax.block_until_ready(fwd(x, params))
    ref = jax.block_until_ready(torch_reference(x, params))

    assert out.shape == (2, num_classes)
    # bf16 activations/weights (f32 accumulation) -> 2e-2 tolerance.
    np.testing.assert_allclose(np.asarray(out), np.asarray(ref), rtol=2e-2, atol=2e-2)
    print("KERNEL_OK")
</pallas_src>

<mosaic_0001>
module attributes {stable_mosaic.version = 11 : i64} {
  func.func @conv3x3_pool_kernel(%arg0: i32, %arg1: memref<1x34x32x9xbf16, #tpu.memory_space<vmem>>, %arg2: memref<3x9x128xbf16, #tpu.memory_space<vmem>>, %arg3: memref<1x128xf32, #tpu.memory_space<vmem>>, %arg4: memref<1x16x16x128xbf16, #tpu.memory_space<vmem>>, %arg5: memref<1024x128xf32, #tpu.memory_space<vmem>>) attributes {dimension_semantics = [#tpu.dimension_semantics<parallel>], iteration_bounds = array<i64: 2>, scalar_prefetch = 0 : i64, scratch_operands = 1 : i64, tpu.core_type = #tpu.core_type<tc>, window_params = [{transform_indices = @transform_0, window_bounds = array<i64: 1, 34, 32, 9>}, {pipeline_mode = #tpu.pipeline_mode<synchronous>, transform_indices = @transform_1, window_bounds = array<i64: 3, 9, 128>}, {pipeline_mode = #tpu.pipeline_mode<synchronous>, transform_indices = @transform_2, window_bounds = array<i64: 1, 128>}, {transform_indices = @transform_3, window_bounds = array<i64: 1, 16, 16, 128>}]} {
    %c0 = arith.constant 0 : index
    %c0_0 = arith.constant 0 : index
    %c0_1 = arith.constant 0 : index
    %c0_2 = arith.constant 0 : index
    %0 = vector.load %arg1[%c0, %c0_0, %c0_1, %c0_2] : memref<1x34x32x9xbf16, #tpu.memory_space<vmem>>, vector<1x34x32x9xbf16>
    %1 = vector.shape_cast %0 : vector<1x34x32x9xbf16> to vector<34x32x9xbf16>
    %2 = vector.extract_strided_slice %1 {offsets = [0, 0, 0], sizes = [32, 32, 9], strides = [1, 1, 1]} : vector<34x32x9xbf16> to vector<32x32x9xbf16>
    %3 = vector.shape_cast %2 : vector<32x32x9xbf16> to vector<1024x9xbf16>
    %c0_3 = arith.constant 0 : index
    %c0_4 = arith.constant 0 : index
    %c0_5 = arith.constant 0 : index
    %4 = vector.load %arg2[%c0_3, %c0_4, %c0_5] : memref<3x9x128xbf16, #tpu.memory_space<vmem>>, vector<1x9x128xbf16>
    %5 = vector.shape_cast %4 : vector<1x9x128xbf16> to vector<9x128xbf16>
    %cst = arith.constant dense<0.000000e+00> : vector<1024x128xf32>
    %6 = tpu.matmul %3, %5, %cst {dimension_numbers = #tpu.dot_dimension_numbers<[1], [0], [0], [1], [0, 0, 1, 1], [], []>} : vector<1024x9xbf16>, vector<9x128xbf16>, vector<1024x128xf32> -> vector<1024x128xf32>
    %c0_6 = arith.constant 0 : index
    %c0_7 = arith.constant 0 : index
    %7 = vector.load %arg5[%c0_6, %c0_7] : memref<1024x128xf32, #tpu.memory_space<vmem>>, vector<1024x128xf32>
    tpu.vector_store %arg5[%c0_6, %c0_7], %6 {strides = array<i32>} : memref<1024x128xf32, #tpu.memory_space<vmem>>, vector<1024x128xf32>,
    %c0_8 = arith.constant 0 : index
    %c0_9 = arith.constant 0 : index
    %8 = vector.load %arg5[%c0_8, %c0_9] : memref<1024x128xf32, #tpu.memory_space<vmem>>, vector<1024x128xf32>
    %9 = vector.extract_strided_slice %1 {offsets = [1, 0, 0], sizes = [32, 32, 9], strides = [1, 1, 1]} : vector<34x32x9xbf16> to vector<32x32x9xbf16>
    %10 = vector.shape_cast %9 : vector<32x32x9xbf16> to vector<1024x9xbf16>
    %c1 = arith.constant 1 : index
    %c0_10 = arith.constant 0 : index
    %c0_11 = arith.constant 0 : index
    %11 = vector.load %arg2[%c1, %c0_10, %c0_11] : memref<3x9x128xbf16, #tpu.memory_space<vmem>>, vector<1x9x128xbf16>
    %12 = vector.shape_cast %11 : vector<1x9x128xbf16> to vector<9x128xbf16>
    %cst_12 = arith.constant dense<0.000000e+00> : vector<1024x128xf32>
    %13 = tpu.matmul %10, %12, %cst_12 {dimension_numbers = #tpu.dot_dimension_numbers<[1], [0], [0], [1], [0, 0, 1, 1], [], []>} : vector<1024x9xbf16>, vector<9x128xbf16>, vector<1024x128xf32> -> vector<1024x128xf32>
    %14 = arith.addf %8, %13 : vector<1024x128xf32>
    %c0_13 = arith.constant 0 : index
    %c0_14 = arith.constant 0 : index
    %15 = vector.load %arg5[%c0_13, %c0_14] : memref<1024x128xf32, #tpu.memory_space<vmem>>, vector<1024x128xf32>
    tpu.vector_store %arg5[%c0_13, %c0_14], %14 {strides = array<i32>} : memref<1024x128xf32, #tpu.memory_space<vmem>>, vector<1024x128xf32>,
    %c0_15 = arith.constant 0 : index
    %c0_16 = arith.constant 0 : index
    %16 = vector.load %arg5[%c0_15, %c0_16] : memref<1024x128xf32, #tpu.memory_space<vmem>>, vector<1024x128xf32>
    %17 = vector.extract_strided_slice %1 {offsets = [2, 0, 0], sizes = [32, 32, 9], strides = [1, 1, 1]} : vector<34x32x9xbf16> to vector<32x32x9xbf16>
    %18 = vector.shape_cast %17 : vector<32x32x9xbf16> to vector<1024x9xbf16>
    %c2 = arith.constant 2 : index
    %c0_17 = arith.constant 0 : index
    %c0_18 = arith.constant 0 : index
    %19 = vector.load %arg2[%c2, %c0_17, %c0_18] : memref<3x9x128xbf16, #tpu.memory_space<vmem>>, vector<1x9x128xbf16>
    %20 = vector.shape_cast %19 : vector<1x9x128xbf16> to vector<9x128xbf16>
    %cst_19 = arith.constant dense<0.000000e+00> : vector<1024x128xf32>
    %21 = tpu.matmul %18, %20, %cst_19 {dimension_numbers = #tpu.dot_dimension_numbers<[1], [0], [0], [1], [0, 0, 1, 1], [], []>} : vector<1024x9xbf16>, vector<9x128xbf16>, vector<1024x128xf32> -> vector<1024x128xf32>
    %22 = arith.addf %16, %21 : vector<1024x128xf32>
    %c0_20 = arith.constant 0 : index
    %c0_21 = arith.constant 0 : index
    %23 = vector.load %arg5[%c0_20, %c0_21] : memref<1024x128xf32, #tpu.memory_space<vmem>>, vector<1024x128xf32>
    tpu.vector_store %arg5[%c0_20, %c0_21], %22 {strides = array<i32>} : memref<1024x128xf32, #tpu.memory_space<vmem>>, vector<1024x128xf32>,
    %c0_22 = arith.constant 0 : index
    %c0_23 = arith.constant 0 : index
    %24 = tpu.strided_load %arg5[%c0_22, %c0_23] {strides = array<i32: 2, 1>} : memref<1024x128xf32, #tpu.memory_space<vmem>>, vector<512x128xf32>
    %c1_24 = arith.constant 1 : index
    %c0_25 = arith.constant 0 : index
    %25 = tpu.strided_load %arg5[%c1_24, %c0_25] {strides = array<i32: 2, 1>} : memref<1024x128xf32, #tpu.memory_space<vmem>>, vector<512x128xf32>
    %26 = arith.maximumf %24, %25 : vector<512x128xf32>
    %27 = vector.shape_cast %26 : vector<512x128xf32> to vector<16x2x16x128xf32>
    %28 = vector.extract_strided_slice %27 {offsets = [0, 0, 0, 0], sizes = [16, 1, 16, 128], strides = [1, 1, 1, 1]} : vector<16x2x16x128xf32> to vector<16x1x16x128xf32>
    %29 = vector.shape_cast %28 : vector<16x1x16x128xf32> to vector<16x16x128xf32>
    %30 = vector.extract_strided_slice %27 {offsets = [0, 1, 0, 0], sizes = [16, 1, 16, 128], strides = [1, 1, 1, 1]} : vector<16x2x16x128xf32> to vector<16x1x16x128xf32>
    %31 = vector.shape_cast %30 : vector<16x1x16x128xf32> to vector<16x16x128xf32>
    %32 = arith.maximumf %29, %31 : vector<16x16x128xf32>
    %c0_26 = arith.constant 0 : index
    %c0_27 = arith.constant 0 : index
    %33 = vector.load %arg3[%c0_26, %c0_27] : memref<1x128xf32, #tpu.memory_space<vmem>>, vector<1x128xf32>
    %34 = vector.shape_cast %33 : vector<1x128xf32> to vector<1x1x128xf32>
    %35 = vector.broadcast %34 : vector<1x1x128xf32> to vector<16x16x128xf32>
    %36 = arith.addf %32, %35 : vector<16x16x128xf32>
    %cst_28 = arith.constant 0.000000e+00 : f32
    %37 = vector.broadcast %cst_28 : f32 to vector<16x16x128xf32>
    %38 = arith.maximumf %36, %37 : vector<16x16x128xf32>
    %39 = arith.truncf %38 : vector<16x16x128xf32> to vector<16x16x128xbf16>
    %c0_29 = arith.constant 0 : index
    %c0_30 = arith.constant 0 : index
    %c0_31 = arith.constant 0 : index
    %c0_32 = arith.constant 0 : index
    %40 = vector.load %arg4[%c0_29, %c0_30, %c0_31, %c0_32] : memref<1x16x16x128xbf16, #tpu.memory_space<vmem>>, vector<1x16x16x128xbf16>
    %41 = vector.shape_cast %40 : vector<1x16x16x128xbf16> to vector<16x16x128xbf16>
    %42 = vector.shape_cast %39 : vector<16x16x128xbf16> to vector<1x16x16x128xbf16>
    tpu.vector_store %arg4[%c0_29, %c0_30, %c0_31, %c0_32], %42 {strides = array<i32>} : memref<1x16x16x128xbf16, #tpu.memory_space<vmem>>, vector<1x16x16x128xbf16>,
    return
  }
  func.func @transform_0(%arg0: i32) -> (i32, i32, i32, i32) {
    %c0_i32 = arith.constant 0 : i32
    %c0_i32_0 = arith.constant 0 : i32
    %c0_i32_1 = arith.constant 0 : i32
    %c0_i32_2 = arith.constant 0 : i32
    return %arg0, %c0_i32, %c0_i32_0, %c0_i32_1 : i32, i32, i32, i32
  }
  func.func @transform_1(%arg0: i32) -> (i32, i32, i32) {
    %c0_i32 = arith.constant 0 : i32
    %c0_i32_0 = arith.constant 0 : i32
    %c0_i32_1 = arith.constant 0 : i32
    %c0_i32_2 = arith.constant 0 : i32
    return %c0_i32, %c0_i32_0, %c0_i32_1 : i32, i32, i32
  }
  func.func @transform_2(%arg0: i32) -> (i32, i32) {
    %c0_i32 = arith.constant 0 : i32
    %c0_i32_0 = arith.constant 0 : i32
    %c0_i32_1 = arith.constant 0 : i32
    return %c0_i32, %c0_i32_0 : i32, i32
  }
  func.func @transform_3(%arg0: i32) -> (i32, i32, i32, i32) {
    %c0_i32 = arith.constant 0 : i32
    %c0_i32_0 = arith.constant 0 : i32
    %c0_i32_1 = arith.constant 0 : i32
    %c0_i32_2 = arith.constant 0 : i32
    return %arg0, %c0_i32, %c0_i32_0, %c0_i32_1 : i32, i32, i32, i32
  }
}

module attributes {stable_mosaic.version = 11 : i64} {
  func.func @conv3x3_pool_kernel(%arg0: i32, %arg1: memref<1x18x16x384xbf16, #tpu.memory_space<vmem>>, %arg2: memref<3x384x128xbf16, #tpu.memory_space<vmem>>, %arg3: memref<1x128xf32, #tpu.memory_space<vmem>>, %arg4: memref<1x8x8x128xbf16, #tpu.memory_space<vmem>>, %arg5: memref<256x128xf32, #tpu.memory_space<vmem>>) attributes {dimension_semantics = [#tpu.dimension_semantics<parallel>], iteration_bounds = array<i64: 2>, scalar_prefetch = 0 : i64, scratch_operands = 1 : i64, tpu.core_type = #tpu.core_type<tc>, window_params = [{transform_indices = @transform_0, window_bounds = array<i64: 1, 18, 16, 384>}, {pipeline_mode = #tpu.pipeline_mode<synchronous>, transform_indices = @transform_1, window_bounds = array<i64: 3, 384, 128>}, {pipeline_mode = #tpu.pipeline_mode<synchronous>, transform_indices = @transform_2, window_bounds = array<i64: 1, 128>}, {transform_indices = @transform_3, window_bounds = array<i64: 1, 8, 8, 128>}]} {
    %c0 = arith.constant 0 : index
    %c0_0 = arith.constant 0 : index
    %c0_1 = arith.constant 0 : index
    %c0_2 = arith.constant 0 : index
    %0 = vector.load %arg1[%c0, %c0_0, %c0_1, %c0_2] : memref<1x18x16x384xbf16, #tpu.memory_space<vmem>>, vector<1x18x16x384xbf16>
    %1 = vector.shape_cast %0 : vector<1x18x16x384xbf16> to vector<18x16x384xbf16>
    %2 = vector.extract_strided_slice %1 {offsets = [0, 0, 0], sizes = [16, 16, 384], strides = [1, 1, 1]} : vector<18x16x384xbf16> to vector<16x16x384xbf16>
    %3 = vector.shape_cast %2 : vector<16x16x384xbf16> to vector<256x384xbf16>
    %c0_3 = arith.constant 0 : index
    %c0_4 = arith.constant 0 : index
    %c0_5 = arith.constant 0 : index
    %4 = vector.load %arg2[%c0_3, %c0_4, %c0_5] : memref<3x384x128xbf16, #tpu.memory_space<vmem>>, vector<1x384x128xbf16>
    %5 = vector.shape_cast %4 : vector<1x384x128xbf16> to vector<384x128xbf16>
    %cst = arith.constant dense<0.000000e+00> : vector<256x128xf32>
    %6 = tpu.matmul %3, %5, %cst {dimension_numbers = #tpu.dot_dimension_numbers<[1], [0], [0], [1], [0, 0, 1, 1], [], []>} : vector<256x384xbf16>, vector<384x128xbf16>, vector<256x128xf32> -> vector<256x128xf32>
    %c0_6 = arith.constant 0 : index
    %c0_7 = arith.constant 0 : index
    %7 = vector.load %arg5[%c0_6, %c0_7] : memref<256x128xf32, #tpu.memory_space<vmem>>, vector<256x128xf32>
    tpu.vector_store %arg5[%c0_6, %c0_7], %6 {strides = array<i32>} : memref<256x128xf32, #tpu.memory_space<vmem>>, vector<256x128xf32>,
    %c0_8 = arith.constant 0 : index
    %c0_9 = arith.constant 0 : index
    %8 = vector.load %arg5[%c0_8, %c0_9] : memref<256x128xf32, #tpu.memory_space<vmem>>, vector<256x128xf32>
    %9 = vector.extract_strided_slice %1 {offsets = [1, 0, 0], sizes = [16, 16, 384], strides = [1, 1, 1]} : vector<18x16x384xbf16> to vector<16x16x384xbf16>
    %10 = vector.shape_cast %9 : vector<16x16x384xbf16> to vector<256x384xbf16>
    %c1 = arith.constant 1 : index
    %c0_10 = arith.constant 0 : index
    %c0_11 = arith.constant 0 : index
    %11 = vector.load %arg2[%c1, %c0_10, %c0_11] : memref<3x384x128xbf16, #tpu.memory_space<vmem>>, vector<1x384x128xbf16>
    %12 = vector.shape_cast %11 : vector<1x384x128xbf16> to vector<384x128xbf16>
    %cst_12 = arith.constant dense<0.000000e+00> : vector<256x128xf32>
    %13 = tpu.matmul %10, %12, %cst_12 {dimension_numbers = #tpu.dot_dimension_numbers<[1], [0], [0], [1], [0, 0, 1, 1], [], []>} : vector<256x384xbf16>, vector<384x128xbf16>, vector<256x128xf32> -> vector<256x128xf32>
    %14 = arith.addf %8, %13 : vector<256x128xf32>
    %c0_13 = arith.constant 0 : index
    %c0_14 = arith.constant 0 : index
    %15 = vector.load %arg5[%c0_13, %c0_14] : memref<256x128xf32, #tpu.memory_space<vmem>>, vector<256x128xf32>
    tpu.vector_store %arg5[%c0_13, %c0_14], %14 {strides = array<i32>} : memref<256x128xf32, #tpu.memory_space<vmem>>, vector<256x128xf32>,
    %c0_15 = arith.constant 0 : index
    %c0_16 = arith.constant 0 : index
    %16 = vector.load %arg5[%c0_15, %c0_16] : memref<256x128xf32, #tpu.memory_space<vmem>>, vector<256x128xf32>
    %17 = vector.extract_strided_slice %1 {offsets = [2, 0, 0], sizes = [16, 16, 384], strides = [1, 1, 1]} : vector<18x16x384xbf16> to vector<16x16x384xbf16>
    %18 = vector.shape_cast %17 : vector<16x16x384xbf16> to vector<256x384xbf16>
    %c2 = arith.constant 2 : index
    %c0_17 = arith.constant 0 : index
    %c0_18 = arith.constant 0 : index
    %19 = vector.load %arg2[%c2, %c0_17, %c0_18] : memref<3x384x128xbf16, #tpu.memory_space<vmem>>, vector<1x384x128xbf16>
    %20 = vector.shape_cast %19 : vector<1x384x128xbf16> to vector<384x128xbf16>
    %cst_19 = arith.constant dense<0.000000e+00> : vector<256x128xf32>
    %21 = tpu.matmul %18, %20, %cst_19 {dimension_numbers = #tpu.dot_dimension_numbers<[1], [0], [0], [1], [0, 0, 1, 1], [], []>} : vector<256x384xbf16>, vector<384x128xbf16>, vector<256x128xf32> -> vector<256x128xf32>
    %22 = arith.addf %16, %21 : vector<256x128xf32>
    %c0_20 = arith.constant 0 : index
    %c0_21 = arith.constant 0 : index
    %23 = vector.load %arg5[%c0_20, %c0_21] : memref<256x128xf32, #tpu.memory_space<vmem>>, vector<256x128xf32>
    tpu.vector_store %arg5[%c0_20, %c0_21], %22 {strides = array<i32>} : memref<256x128xf32, #tpu.memory_space<vmem>>, vector<256x128xf32>,
    %c0_22 = arith.constant 0 : index
    %c0_23 = arith.constant 0 : index
    %24 = tpu.strided_load %arg5[%c0_22, %c0_23] {strides = array<i32: 2, 1>} : memref<256x128xf32, #tpu.memory_space<vmem>>, vector<128x128xf32>
    %c1_24 = arith.constant 1 : index
    %c0_25 = arith.constant 0 : index
    %25 = tpu.strided_load %arg5[%c1_24, %c0_25] {strides = array<i32: 2, 1>} : memref<256x128xf32, #tpu.memory_space<vmem>>, vector<128x128xf32>
    %26 = arith.maximumf %24, %25 : vector<128x128xf32>
    %27 = vector.shape_cast %26 : vector<128x128xf32> to vector<8x2x8x128xf32>
    %28 = vector.extract_strided_slice %27 {offsets = [0, 0, 0, 0], sizes = [8, 1, 8, 128], strides = [1, 1, 1, 1]} : vector<8x2x8x128xf32> to vector<8x1x8x128xf32>
    %29 = vector.shape_cast %28 : vector<8x1x8x128xf32> to vector<8x8x128xf32>
    %30 = vector.extract_strided_slice %27 {offsets = [0, 1, 0, 0], sizes = [8, 1, 8, 128], strides = [1, 1, 1, 1]} : vector<8x2x8x128xf32> to vector<8x1x8x128xf32>
    %31 = vector.shape_cast %30 : vector<8x1x8x128xf32> to vector<8x8x128xf32>
    %32 = arith.maximumf %29, %31 : vector<8x8x128xf32>
    %c0_26 = arith.constant 0 : index
    %c0_27 = arith.constant 0 : index
    %33 = vector.load %arg3[%c0_26, %c0_27] : memref<1x128xf32, #tpu.memory_space<vmem>>, vector<1x128xf32>
    %34 = vector.shape_cast %33 : vector<1x128xf32> to vector<1x1x128xf32>
    %35 = vector.broadcast %34 : vector<1x1x128xf32> to vector<8x8x128xf32>
    %36 = arith.addf %32, %35 : vector<8x8x128xf32>
    %37 = arith.truncf %36 : vector<8x8x128xf32> to vector<8x8x128xbf16>
    %c0_28 = arith.constant 0 : index
    %c0_29 = arith.constant 0 : index
    %c0_30 = arith.constant 0 : index
    %c0_31 = arith.constant 0 : index
    %38 = vector.load %arg4[%c0_28, %c0_29, %c0_30, %c0_31] : memref<1x8x8x128xbf16, #tpu.memory_space<vmem>>, vector<1x8x8x128xbf16>
    %39 = vector.shape_cast %38 : vector<1x8x8x128xbf16> to vector<8x8x128xbf16>
    %40 = vector.shape_cast %37 : vector<8x8x128xbf16> to vector<1x8x8x128xbf16>
    tpu.vector_store %arg4[%c0_28, %c0_29, %c0_30, %c0_31], %40 {strides = array<i32>} : memref<1x8x8x128xbf16, #tpu.memory_space<vmem>>, vector<1x8x8x128xbf16>,
    return
  }
  func.func @transform_0(%arg0: i32) -> (i32, i32, i32, i32) {
    %c0_i32 = arith.constant 0 : i32
    %c0_i32_0 = arith.constant 0 : i32
    %c0_i32_1 = arith.constant 0 : i32
    %c0_i32_2 = arith.constant 0 : i32
    return %arg0, %c0_i32, %c0_i32_0, %c0_i32_1 : i32, i32, i32, i32
  }
  func.func @transform_1(%arg0: i32) -> (i32, i32, i32) {
    %c0_i32 = arith.constant 0 : i32
    %c0_i32_0 = arith.constant 0 : i32
    %c0_i32_1 = arith.constant 0 : i32
    %c0_i32_2 = arith.constant 0 : i32
    return %c0_i32, %c0_i32_0, %c0_i32_1 : i32, i32, i32
  }
  func.func @transform_2(%arg0: i32) -> (i32, i32) {
    %c0_i32 = arith.constant 0 : i32
    %c0_i32_0 = arith.constant 0 : i32
    %c0_i32_1 = arith.constant 0 : i32
    return %c0_i32, %c0_i32_0 : i32, i32
  }
  func.func @transform_3(%arg0: i32) -> (i32, i32, i32, i32) {
    %c0_i32 = arith.constant 0 : i32
    %c0_i32_0 = arith.constant 0 : i32
    %c0_i32_1 = arith.constant 0 : i32
    %c0_i32_2 = arith.constant 0 : i32
    return %arg0, %c0_i32, %c0_i32_0, %c0_i32_1 : i32, i32, i32, i32
  }
}

module attributes {stable_mosaic.version = 11 : i64} {
  func.func @adaptive_pool_kernel(%arg0: i32, %arg1: memref<1x8x8x128xbf16, #tpu.memory_space<vmem>>, %arg2: memref<16x64xf32, #tpu.memory_space<vmem>>, %arg3: memref<1x16x128xf32, #tpu.memory_space<vmem>>) attributes {dimension_semantics = [#tpu.dimension_semantics<parallel>], iteration_bounds = array<i64: 2>, scalar_prefetch = 0 : i64, scratch_operands = 0 : i64, tpu.core_type = #tpu.core_type<tc>, window_params = [{transform_indices = @transform_0, window_bounds = array<i64: 1, 8, 8, 128>}, {pipeline_mode = #tpu.pipeline_mode<synchronous>, transform_indices = @transform_1, window_bounds = array<i64: 16, 64>}, {transform_indices = @transform_2, window_bounds = array<i64: 1, 16, 128>}]} {
    %c0 = arith.constant 0 : index
    %c0_0 = arith.constant 0 : index
    %c0_1 = arith.constant 0 : index
    %c0_2 = arith.constant 0 : index
    %0 = vector.load %arg1[%c0, %c0_0, %c0_1, %c0_2] : memref<1x8x8x128xbf16, #tpu.memory_space<vmem>>, vector<1x8x8x128xbf16>
    %1 = vector.shape_cast %0 : vector<1x8x8x128xbf16> to vector<8x8x128xbf16>
    %2 = vector.shape_cast %1 : vector<8x8x128xbf16> to vector<64x128xbf16>
    %3 = arith.extf %2 : vector<64x128xbf16> to vector<64x128xf32>
    %c0_3 = arith.constant 0 : index
    %c0_4 = arith.constant 0 : index
    %4 = vector.load %arg2[%c0_3, %c0_4] : memref<16x64xf32, #tpu.memory_space<vmem>>, vector<16x64xf32>
    %cst = arith.constant dense<0.000000e+00> : vector<16x128xf32>
    %5 = tpu.matmul %4, %3, %cst {dimension_numbers = #tpu.dot_dimension_numbers<[1], [0], [0], [1], [0, 0, 1, 1], [], []>} : vector<16x64xf32>, vector<64x128xf32>, vector<16x128xf32> -> vector<16x128xf32>
    %c0_5 = arith.constant 0 : index
    %c0_6 = arith.constant 0 : index
    %c0_7 = arith.constant 0 : index
    %6 = vector.load %arg3[%c0_5, %c0_6, %c0_7] : memref<1x16x128xf32, #tpu.memory_space<vmem>>, vector<1x16x128xf32>
    %7 = vector.shape_cast %6 : vector<1x16x128xf32> to vector<16x128xf32>
    %8 = vector.shape_cast %5 : vector<16x128xf32> to vector<1x16x128xf32>
    tpu.vector_store %arg3[%c0_5, %c0_6, %c0_7], %8 {strides = array<i32>} : memref<1x16x128xf32, #tpu.memory_space<vmem>>, vector<1x16x128xf32>,
    return
  }
  func.func @transform_0(%arg0: i32) -> (i32, i32, i32, i32) {
    %c0_i32 = arith.constant 0 : i32
    %c0_i32_0 = arith.constant 0 : i32
    %c0_i32_1 = arith.constant 0 : i32
    %c0_i32_2 = arith.constant 0 : i32
    return %arg0, %c0_i32, %c0_i32_0, %c0_i32_1 : i32, i32, i32, i32
  }
  func.func @transform_1(%arg0: i32) -> (i32, i32) {
    %c0_i32 = arith.constant 0 : i32
    %c0_i32_0 = arith.constant 0 : i32
    %c0_i32_1 = arith.constant 0 : i32
    return %c0_i32, %c0_i32_0 : i32, i32
  }
  func.func @transform_2(%arg0: i32) -> (i32, i32, i32) {
    %c0_i32 = arith.constant 0 : i32
    %c0_i32_0 = arith.constant 0 : i32
    %c0_i32_1 = arith.constant 0 : i32
    return %arg0, %c0_i32, %c0_i32_0 : i32, i32, i32
  }
}

module attributes {stable_mosaic.version = 11 : i64} {
  func.func @fc_kernel(%arg0: i32, %arg1: memref<2x2048xf32, #tpu.memory_space<vmem>>, %arg2: memref<2048x128xbf16, #tpu.memory_space<vmem>>, %arg3: memref<1x128xf32, #tpu.memory_space<vmem>>, %arg4: memref<2x128xf32, #tpu.memory_space<vmem>>) attributes {dimension_semantics = [#tpu.dimension_semantics<arbitrary>], iteration_bounds = array<i64: 1>, scalar_prefetch = 0 : i64, scratch_operands = 0 : i64, tpu.core_type = #tpu.core_type<tc>, window_params = [{pipeline_mode = #tpu.pipeline_mode<synchronous>, transform_indices = @transform_0, window_bounds = array<i64: 2, 2048>}, {pipeline_mode = #tpu.pipeline_mode<synchronous>, transform_indices = @transform_1, window_bounds = array<i64: 2048, 128>}, {pipeline_mode = #tpu.pipeline_mode<synchronous>, transform_indices = @transform_2, window_bounds = array<i64: 1, 128>}, {pipeline_mode = #tpu.pipeline_mode<synchronous>, transform_indices = @transform_3, window_bounds = array<i64: 2, 128>}]} {
    %c0 = arith.constant 0 : index
    %c0_0 = arith.constant 0 : index
    %0 = vector.load %arg1[%c0, %c0_0] : memref<2x2048xf32, #tpu.memory_space<vmem>>, vector<2x2048xf32>
    %1 = arith.truncf %0 : vector<2x2048xf32> to vector<2x2048xbf16>
    %c0_1 = arith.constant 0 : index
    %c0_2 = arith.constant 0 : index
    %2 = vector.load %arg2[%c0_1, %c0_2] : memref<2048x128xbf16, #tpu.memory_space<vmem>>, vector<2048x128xbf16>
    %cst = arith.constant dense<0.000000e+00> : vector<2x128xf32>
    %3 = tpu.matmul %1, %2, %cst {dimension_numbers = #tpu.dot_dimension_numbers<[1], [0], [0], [1], [0, 0, 1, 1], [], []>} : vector<2x2048xbf16>, vector<2048x128xbf16>, vector<2x128xf32> -> vector<2x128xf32>
    %c0_3 = arith.constant 0 : index
    %c0_4 = arith.constant 0 : index
    %4 = vector.load %arg3[%c0_3, %c0_4] : memref<1x128xf32, #tpu.memory_space<vmem>>, vector<1x128xf32>
    %5 = vector.broadcast %4 : vector<1x128xf32> to vector<2x128xf32>
    %6 = arith.addf %3, %5 : vector<2x128xf32>
    %c0_5 = arith.constant 0 : index
    %c0_6 = arith.constant 0 : index
    %7 = vector.load %arg4[%c0_5, %c0_6] : memref<2x128xf32, #tpu.memory_space<vmem>>, vector<2x128xf32>
    tpu.vector_store %arg4[%c0_5, %c0_6], %6 {strides = array<i32>} : memref<2x128xf32, #tpu.memory_space<vmem>>, vector<2x128xf32>,
    return
  }
  func.func @transform_0(%arg0: i32) -> (i32, i32) {
    %c0_i32 = arith.constant 0 : i32
    %c0_i32_0 = arith.constant 0 : i32
    %c0_i32_1 = arith.constant 0 : i32
    return %c0_i32, %c0_i32_0 : i32, i32
  }
  func.func @transform_1(%arg0: i32) -> (i32, i32) {
    %c0_i32 = arith.constant 0 : i32
    %c0_i32_0 = arith.constant 0 : i32
    %c0_i32_1 = arith.constant 0 : i32
    return %c0_i32, %c0_i32_0 : i32, i32
  }
  func.func @transform_2(%arg0: i32) -> (i32, i32) {
    %c0_i32 = arith.constant 0 : i32
    %c0_i32_0 = arith.constant 0 : i32
    %c0_i32_1 = arith.constant 0 : i32
    return %c0_i32, %c0_i32_0 : i32, i32
  }
  func.func @transform_3(%arg0: i32) -> (i32, i32) {
    %c0_i32 = arith.constant 0 : i32
    %c0_i32_0 = arith.constant 0 : i32
    %c0_i32_1 = arith.constant 0 : i32
    return %c0_i32, %c0_i32_0 : i32, i32
  }
}

</mosaic_0001>

<bundles_post_ra>
// kernel: variable_input_cnn_forward.6
= control target key start
LH: loop header
LB: loop body
LE: loop exit
PB: predicated region body
PF: predicated region fallthrough
CT: control target
= control target key end

     0   :  { %s411_s9 = smov 0   ;;  %s436_s0 = inlined_call_operand.vmem [shape: bf16[2,8,8,128], index: 0, kind: input, shape index: {}]   ;;  %s437_s1 = inlined_call_operand.vmem [shape: f32[16,64], index: 1, kind: input, shape index: {}]   ;;  %s438_s2 = inlined_call_operand.vmem [shape: f32[2,16,128], index: 2, kind: output, shape index: {}]  }
   0x1 LB: > { %s301_s10 = sadd.s32 4294967295, %s394_s9   ;;  %p305_p0 = scmp.ge.s32.totalorder %s394_s9, 1  ;;  %s394_s9 = sphi %s411_s9, %s12_s9  }
   0x2   : > { %p112_p1 = scmp.lt.s32.totalorder %s394_s9, 3 }
   0x4   : > { %p113_p2 = pnand %p305_p0, %p112_p1 }
   0x5   : > { %p134_p3 = scmp.lt.s32.totalorder (!%p113_p2), %s301_s10, 1  ;;  %v160_v0 = vld [vmem:[%s437_s1] sm:$0xff] (!%p113_p2)  ;;  %vm162_vm0 = vcmask (!%p113_p2), 523264   ;;  %v161_v5 = vld [vmem:[%s437_s1 + $0x8] sm:$0xff] (!%p113_p2) }
   0x6   : > { %116 = sbr.rel (%p113_p2) target bundleno = 247 (0xf7), region = 28  ;;  %361 = vmatprep.mubr.msk.f32.mxu0 (!%p113_p2), %vm162_vm0, %v160_v0 }
   0xd   : > { %s440_s10 = smov (!%p134_p3, %s301_s10), 1 }
   0xe   : > { %s314_s13 = sshll.u32 %s440_s10, 5  ;;  %s315_s19 = sshll.u32 %s440_s10, 4 }
   0xf   : > { %s138_s16 = scalar_lea.vmem %s436_s0, %s314_s13  ;;  %s143_s22 = scalar_lea.vmem %s438_s2, %s315_s19 }
  0x10   : > { %v317_v1 = vld [vmem:[%s138_s16] sm:$0xff]   ;;  %v332_v2 = vld [vmem:[%s138_s16 + $0x8] sm:$0xff]   ;;  %v333_v3 = vld [vmem:[%s138_s16 + $0x10] sm:$0xff]  }
  0x11   : > { %365 = vmatprep.subr.bf16.mxu0 %v317_v1  ;;  %v334_v4 = vld [vmem:[%s138_s16 + $0x18] sm:$0xff]  }
  0x12   : > { %367 = vmatpush3.bf16.msra.mxu0 %v317_v1 }
  0x13   : > { %369 = vmatprep.subr.bf16.mxu0 %v332_v2 }
  0x16   : > { %371 = vmatpush3.bf16.msra.mxu0 %v332_v2 }
  0x17   : > { %373 = vmatprep.subr.bf16.mxu0 %v333_v3 }
  0x1a   : > { %375 = vmatpush3.bf16.msra.mxu0 %v333_v3 }
  0x1b   : > { %377 = vmatprep.subr.bf16.mxu0 %v334_v4 }
  0x1e   : > { %379 = vmatpush3.bf16.msra.mxu0 %v334_v4 }
  0x21   : > { %362 = vmatmul.mubr.msk.f32.vlgmr.msra.gmra.mrb[0].mxu0 %vm162_vm0, %v161_v5 }
  0xf4   : > { %v363_v6 = vpop.f32.mrb[0].mxu0 }
  0xf5   : > { %245 = vst [vmem:[%s143_s22 + $0x8] sm:$0xff] %v363_v6  ;;  %v235_v7 = vpop.f32.mrb[1].mxu0 }
  0xf6   : > { %244 = vst [vmem:[%s143_s22] sm:$0xff] %v235_v7 }
  0xf7 PF: > { %s12_s9 = sadd.s32 1, %s394_s9  }
  0xf8   : > { %p9_p4 = scmp.ge.s32.totalorder %s12_s9, 4  }
  0xfa   :  { %11 = sbr.rel (!%p9_p4) target bundleno = 1 (0x1), region = 58 }

// kernel: variable_input_cnn_forward.5
= control target key start
LH: loop header
LB: loop body
LE: loop exit
PB: predicated region body
PF: predicated region fallthrough
CT: control target
= control target key end

     0   :  { %s3831_s12 = smov 0   ;;  %s4693_s0 = inlined_call_operand.vmem [shape: bf16[2,18,16,384], index: 0, kind: input, shape index: {}]   ;;  %s4694_s1 = inlined_call_operand.vmem [shape: bf16[3,384,128], index: 1, kind: input, shape index: {}]   ;;  %s4695_s2 = inlined_call_operand.vmem [shape: f32[1,128], index: 2, kind: input, shape index: {}]   ;;  %s4696_s3 = inlined_call_operand.vmem [shape: bf16[2,8,8,128], index: 3, kind: output, shape index: {}]  }
   0x1 LB: > { %s2473_s13 = sadd.s32 4294967295, %s3809_s12   ;;  %p2477_p0 = scmp.ge.s32.totalorder %s3809_s12, 1  ;;  %s3809_s12 = sphi %s3831_s12, %s13_s12  }
   0x2   : > { %p137_p1 = scmp.lt.s32.totalorder %s3809_s12, 3 }
   0x4   : > { %p138_p2 = pnand %p2477_p0, %p137_p1 }
   0x6   : > { %141 = sbr.rel (%p138_p2) target bundleno = 565 (0x235), region = 32 }
   0xd   : > { %v3659_v0 = vld [vmem:[%s4694_s1 + $0x40] sm:$0xff]   ;;  %v3662_v3 = vld [vmem:[%s4694_s1 + $0x48] sm:$0xff]   ;;  %v3665_v6 = vld [vmem:[%s4694_s1 + $0x50] sm:$0xff]   ;;  %p161_p3 = scmp.lt.s32.totalorder %s2473_s13, 1 }
   0xe   : > { %v3845_v1 = vld [vmem:[%s4694_s1 + $0x80] sm:$0xff]   ;;  %2730 = vmatprep.subr.bf16.mxu0 %v3659_v0  ;;  %v3858_v4 = vld [vmem:[%s4694_s1 + $0x88] sm:$0xff]   ;;  %v3870_v7 = vld [vmem:[%s4694_s1 + $0x90] sm:$0xff]  }
   0xf   : > { %v3661_v2 = vld [vmem:[%s4694_s1] sm:$0xff]   ;;  %3282 = vmatprep.subr.bf16.mxu1 %v3845_v1  ;;  %v3664_v5 = vld [vmem:[%s4694_s1 + $0x8] sm:$0xff]   ;;  %v3667_v8 = vld [vmem:[%s4694_s1 + $0x10] sm:$0xff]   ;;  %s4702_s13 = smov (!%p161_p3, %s2473_s13), 1 }
  0x10   : > { %2731 = vmatpush3.bf16.msra.mxu0 %v3661_v2  ;;  %3290 = vmatpush3.bf16.msra.mxu1 %v3845_v1  ;;  %v3668_v9 = vld [vmem:[%s4694_s1 + $0x58] sm:$0xff]   ;;  %v3671_v12 = vld [vmem:[%s4694_s1 + $0x60] sm:$0xff]   ;;  %v3674_v15 = vld [vmem:[%s4694_s1 + $0x68] sm:$0xff]   ;;  %s3650_s23 = smul.u32 432, %s4702_s13  ;;  %s2706_s17 = sshll.u32 %s4702_s13, 5 }
  0x11   : > { %2732 = vmatprep.subr.bf16.mxu0 %v3662_v3  ;;  %3283 = vmatprep.subr.bf16.mxu1 %v3858_v4  ;;  %v3883_v10 = vld [vmem:[%s4694_s1 + $0x98] sm:$0xff]   ;;  %v3898_v13 = vld [vmem:[%s4694_s1 + $0xa0] sm:$0xff]   ;;  %v3915_v16 = vld [vmem:[%s4694_s1 + $0xa8] sm:$0xff]   ;;  %s4660_s13 = scalar_lea.vmem %s4696_s3, %s2706_s17 }
  0x12   : > { %v3670_v11 = vld [vmem:[%s4694_s1 + $0x18] sm:$0xff]   ;;  %v3673_v14 = vld [vmem:[%s4694_s1 + $0x20] sm:$0xff]   ;;  %v3676_v17 = vld [vmem:[%s4694_s1 + $0x28] sm:$0xff]   ;;  %s3937_s7 = scalar_lea.vmem %s4693_s0, %s3650_s23 }
  0x13   : > { %v3677_v18 = vld [vmem:[%s4694_s1 + $0x70] sm:$0xff]   ;;  %v3680_v21 = vld [vmem:[%s4694_s1 + $0x78] sm:$0xff]   ;;  %v3688_v26 = vld [vmem:[%s4694_s1 + $0x100] sm:$0xff]  }
  0x14   : > { %2733 = vmatpush3.bf16.msra.mxu0 %v3664_v5  ;;  %3291 = vmatpush3.bf16.msra.mxu1 %v3858_v4  ;;  %v3929_v19 = vld [vmem:[%s4694_s1 + $0xb0] sm:$0xff]   ;;  %v3946_v22 = vld [vmem:[%s4694_s1 + $0xb8] sm:$0xff]   ;;  %v3683_v27 = vld [vmem:[%s3937_s7] ss:$12 sps:$4 sm:$0xff]  }
  0x15   : > { %2734 = vmatprep.subr.bf16.mxu0 %v3665_v6  ;;  %3284 = vmatprep.subr.bf16.mxu1 %v3870_v7  ;;  %v3679_v20 = vld [vmem:[%s4694_s1 + $0x30] sm:$0xff]   ;;  %v3682_v25 = vld [vmem:[%s4694_s1 + $0x38] sm:$0xff]   ;;  %v3964_v28 = vld [vmem:[%s3937_s7 + $0xe0] ss:$12 sps:$4 sm:$0xff]  }
  0x16   : > { %v3685_v23 = vld [vmem:[%s3937_s7 + $0x4] ss:$12 sps:$4 sm:$0xff]   ;;  %v3951_v24 = vld [vmem:[%s3937_s7 + $0xc8] ss:$12 sps:$4 sm:$0xff]   ;;  %v3699_v38 = vld [vmem:[%s4694_s1 + $0x118] sm:$0xff]  }
  0x17   : > { %724 = vmatprep.mubr.bf16.mxu0 %v3685_v23  ;;  %3170 = vmatprep.mubr.bf16.mxu1 %v3951_v24  ;;  %v3689_v29 = vld [vmem:[%s4694_s1 + $0xc0] sm:$0xff]   ;;  %v3690_v30 = vld [vmem:[%s4694_s1 + $0x108] sm:$0xff]   ;;  %v3697_v35 = vld [vmem:[%s4694_s1 + $0x110] sm:$0xff]  }
  0x18   : > { %2735 = vmatpush3.bf16.msra.mxu0 %v3667_v8  ;;  %3292 = vmatpush3.bf16.msra.mxu1 %v3870_v7  ;;  %v3975_v31 = vld [vmem:[%s3937_s7 + $0x1c] ss:$12 sps:$4 sm:$0xff]   ;;  %v3978_v32 = vld [vmem:[%s3937_s7 + $0xf8] ss:$12 sps:$4 sm:$0xff]   ;;  %v3698_v37 = vld [vmem:[%s4694_s1 + $0xd0] sm:$0xff]  }
  0x19   : > { %2736 = vmatprep.subr.bf16.mxu0 %v3668_v9  ;;  %3285 = vmatprep.subr.bf16.mxu1 %v3883_v10  ;;  %v3691_v33 = vld [vmem:[%s4694_s1 + $0xc8] sm:$0xff]   ;;  %v3987_v34 = vld [vmem:[%s3937_s7 + $0x18] ss:$12 sps:$4 sm:$0xff]   ;;  %v3994_v36 = vld [vmem:[%s3937_s7 + $0x110] ss:$12 sps:$4 sm:$0xff]  }
  0x1a   : > { %v4004_v39 = vld [vmem:[%s3937_s7 + $0x34] ss:$12 sps:$4 sm:$0xff]   ;;  %v3700_v41 = vld [vmem:[%s4694_s1 + $0xd8] sm:$0xff]   ;;  %v3708_v46 = vld [vmem:[%s4694_s1 + $0x128] sm:$0xff]  }
  0x1b   : > { %v4008_v40 = vld [vmem:[%s3937_s7 + $0x128] ss:$12 sps:$4 sm:$0xff]   ;;  %v4019_v42 = vld [vmem:[%s3937_s7 + $0x30] ss:$12 sps:$4 sm:$0xff]   ;;  %v4022_v43 = vld [vmem:[%s3937_s7 + $0x140] ss:$12 sps:$4 sm:$0xff]  }
  0x1c   : > { %2737 = vmatpush3.bf16.msra.mxu0 %v3670_v11  ;;  %3293 = vmatpush3.bf16.msra.mxu1 %v3883_v10  ;;  %v3706_v44 = vld [vmem:[%s4694_s1 + $0x120] sm:$0xff]   ;;  %v4036_v47 = vld [vmem:[%s3937_s7 + $0x4c] ss:$12 sps:$4 sm:$0xff]   ;;  %v3715_v50 = vld [vmem:[%s4694_s1 + $0x130] sm:$0xff]  }
  0x1d   : > { %2738 = vmatprep.subr.bf16.mxu0 %v3671_v12  ;;  %3286 = vmatprep.subr.bf16.mxu1 %v3898_v13  ;;  %v3707_v45 = vld [vmem:[%s4694_s1 + $0xe0] sm:$0xff]   ;;  %v3709_v49 = vld [vmem:[%s4694_s1 + $0xe8] sm:$0xff]   ;;  %v4057_v52 = vld [vmem:[%s3937_s7 + $0x170] ss:$12 sps:$4 sm:$0xff]  }
  0x1e   : > { %v4039_v48 = vld [vmem:[%s3937_s7 + $0x158] ss:$12 sps:$4 sm:$0xff]   ;;  %v4053_v51 = vld [vmem:[%s3937_s7 + $0x48] ss:$12 sps:$4 sm:$0xff]   ;;  %v4082_v58 = vld [vmem:[%s3937_s7 + $0x60] ss:$12 sps:$4 sm:$0xff]  }
  0x1f   : > { %v3716_v53 = vld [vmem:[%s4694_s1 + $0xf0] sm:$0xff]   ;;  %v3717_v55 = vld [vmem:[%s4694_s1 + $0x138] sm:$0xff]   ;;  %v3725_v57 = vld [vmem:[%s4694_s1 + $0x140] sm:$0xff]  }
  0x20   : > { %2739 = vmatpush3.bf16.msra.mxu0 %v3673_v14  ;;  %3294 = vmatpush3.bf16.msra.mxu1 %v3898_v13  ;;  %v4064_v54 = vld [vmem:[%s3937_s7 + $0x64] ss:$12 sps:$4 sm:$0xff]   ;;  %v3718_v56 = vld [vmem:[%s4694_s1 + $0xf8] sm:$0xff]   ;;  %v3732_v60 = vld [vmem:[%s4694_s1 + $0x148] sm:$0xff]  }
  0x21   : > { %2740 = vmatprep.subr.bf16.mxu0 %v3674_v15  ;;  %3287 = vmatprep.subr.bf16.mxu1 %v3915_v16  ;;  %v4086_v59 = vld [vmem:[%s3937_s7 + $0x7c] ss:$12 sps:$4 sm:$0xff]   ;;  %v3739_v61 = vld [vmem:[%s4694_s1 + $0x150] sm:$0xff]   ;;  %v4102_v62 = vld [vmem:[%s3937_s7 + $0x78] ss:$12 sps:$4 sm:$0xff]  }
  0x22   : > { %v4105_v63 = vld [vmem:[%s3937_s7 + $0x94] ss:$12 sps:$4 sm:$0xff]   ;;  %v3746_v0 = vld [vmem:[%s4694_s1 + $0x158] sm:$0xff]   ;;  %v3760_v5 = vld [vmem:[%s4694_s1 + $0x168] sm:$0xff]  }
  0x23   : > { %v3763_v2 = vld [vmem:[%s4694_s1 + $0x1c0] sm:$0xff]   ;;  %v4121_v3 = vld [vmem:[%s3937_s7 + $0x90] ss:$12 sps:$4 sm:$0xff]  }
  0x24   : > { %2741 = vmatpush3.bf16.msra.mxu0 %v3676_v17  ;;  %3295 = vmatpush3.bf16.msra.mxu1 %v3915_v16  ;;  %v3771_v6 = vld [vmem:[%s4694_s1 + $0x170] sm:$0xff]   ;;  %v4147_v9 = vld [vmem:[%s3937_s7 + $0xc0] ss:$12 sps:$4 sm:$0xff]   ;;  %v3787_v11 = vld [vmem:[%s4694_s1 + $0x178] sm:$0xff]  }
  0x25   : > { %2742 = vmatprep.subr.bf16.mxu0 %v3677_v18  ;;  %3288 = vmatprep.subr.bf16.mxu1 %v3929_v19  ;;  %v4140_v8 = vld [vmem:[%s3937_s7 + $0xc4] ss:$12 sps:$4 sm:$0xff]   ;;  %v4168_v14 = vld [vmem:[%s3937_s7 + $0xf4] ss:$12 sps:$4 sm:$0xff]  }
  0x26   : > { %v4160_v12 = vld [vmem:[%s3937_s7 + $0xd8] ss:$12 sps:$4 sm:$0xff]   ;;  %v4176_v15 = vld [vmem:[%s3937_s7 + $0xf0] ss:$12 sps:$4 sm:$0xff]   ;;  %v4186_v17 = vld [vmem:[%s3937_s7 + $0x108] ss:$12 sps:$4 sm:$0xff]  }
  0x27   : > { %v4189_v18 = vld [vmem:[%s3937_s7 + $0x124] ss:$12 sps:$4 sm:$0xff]  }
  0x28   : > { %2743 = vmatpush3.bf16.msra.mxu0 %v3679_v20  ;;  %3296 = vmatpush3.bf16.msra.mxu1 %v3929_v19  ;;  %v4199_v20 = vld [vmem:[%s3937_s7 + $0x13c] ss:$12 sps:$4 sm:$0xff]  }
  0x29   : > { %2744 = vmatprep.subr.bf16.mxu0 %v3680_v21  ;;  %3289 = vmatprep.subr.bf16.mxu1 %v3946_v22  ;;  %v4206_v21 = vld [vmem:[%s3937_s7 + $0x138] ss:$12 sps:$4 sm:$0xff]   ;;  %v4216_v23 = vld [vmem:[%s3937_s7 + $0x150] ss:$12 sps:$4 sm:$0xff]  }
  0x2c   : > { %2745 = vmatpush3.bf16.msra.mxu0 %v3682_v25  ;;  %3297 = vmatpush3.bf16.msra.mxu1 %v3946_v22  ;;  %v4219_v25 = vld [vmem:[%s3937_s7 + $0x16c] ss:$12 sps:$4 sm:$0xff]  }
  0x2d   : > { %3138 = vmatprep.subr.bf16.mxu0 %v3845_v1  ;;  %2866 = vmatprep.subr.bf16.mxu1 %v3688_v26  ;;  %v4226_v26 = vld [vmem:[%s3937_s7 + $0x168] ss:$12 sps:$4 sm:$0xff]  }
  0x2f   : > { %725 = vmatmul.mubr.bf16.vlgmr.msra.gmra.mrb[0].mxu0 %v3683_v27  ;;  %3171 = vmatmul.mubr.bf16.vlgmr.msra.gmra.mrb[0].mxu1 %v3964_v28  ;;  %v3761_v27 = vld [vmem:[%s3937_s7 + $0x8] ss:$12 sps:$4 sm:$0xff]  }
  0x30   : > { %3139 = vmatpush3.bf16.msra.mxu0 %v3845_v1  ;;  %2867 = vmatpush3.bf16.msra.mxu1 %v3689_v29  ;;  %v3753_v1 = vld [vmem:[%s4694_s1 + $0x160] sm:$0xff]  }
  0x31   : > { %2868 = vmatprep.subr.bf16.mxu1 %v3690_v30  ;;  %732 = vmatprep.mubr.bf16.mxu0 %v3975_v31  ;;  %v3762_v29 = vld [vmem:[%s3937_s7 + $0x20] ss:$12 sps:$4 sm:$0xff]  }
  0x32   : > { %3174 = vmatprep.mubr.bf16.mxu1 %v3978_v32  ;;  %3140 = vmatprep.subr.bf16.mxu0 %v3858_v4  ;;  %v3764_v30 = vld [vmem:[%s4694_s1 + $0x180] sm:$0xff]  }
  0x34   : > { %2869 = vmatpush3.bf16.msra.mxu1 %v3691_v33  ;;  %3141 = vmatpush3.bf16.msra.mxu0 %v3858_v4  ;;  %v4124_v4 = vld [vmem:[%s3937_s7 + $0xac] ss:$12 sps:$4 sm:$0xff]  }
  0x35   : > { %2870 = vmatprep.subr.bf16.mxu1 %v3697_v35  ;;  %3142 = vmatprep.subr.bf16.mxu0 %v3870_v7  ;;  %v3765_v33 = vld [vmem:[%s4694_s1 + $0x1c8] sm:$0xff]   ;;  %v3769_v35 = vld [vmem:[%s4694_s1 + $0x1d0] sm:$0xff]  }
  0x37   : > { %733 = vmatmul.mubr.bf16.gmra.mrb[4].mxu0 %v3987_v34  ;;  %3175 = vmatmul.mubr.bf16.gmra.mrb[4].mxu1 %v3994_v36 }
  0x38   : > { %2871 = vmatpush3.bf16.msra.mxu1 %v3698_v37  ;;  %740 = vmatprep.mubr.bf16.mxu0 %v4004_v39  ;;  %v4252_v37 = vld [vmem:[%s3937_s7 + $0x50] ss:$12 sps:$4 sm:$0xff]  }
  0x39   : > { %2872 = vmatprep.subr.bf16.mxu1 %v3699_v38  ;;  %3178 = vmatprep.mubr.bf16.mxu1 %v4008_v40  ;;  %v3770_v38 = vld [vmem:[%s4694_s1 + $0x190] sm:$0xff]  }
  0x3a   : > { %3143 = vmatpush3.bf16.msra.mxu0 %v3870_v7  ;;  %v4137_v7 = vld [vmem:[%s3937_s7 + $0xa8] ss:$12 sps:$4 sm:$0xff]  }
  0x3b   : > { %3144 = vmatprep.subr.bf16.mxu0 %v3883_v10 }
  0x3c   : > { %2873 = vmatpush3.bf16.msra.mxu1 %v3700_v41  ;;  %v4258_v41 = vld [vmem:[%s3937_s7 + $0x68] ss:$12 sps:$4 sm:$0xff]  }
  0x3d   : > { %2874 = vmatprep.subr.bf16.mxu1 %v3706_v44  ;;  %v3772_v44 = vld [vmem:[%s4694_s1 + $0x1d8] sm:$0xff]  }
  0x3e   : > { %3145 = vmatpush3.bf16.msra.mxu0 %v3883_v10  ;;  %v4150_v10 = vld [vmem:[%s3937_s7 + $0xdc] ss:$12 sps:$4 sm:$0xff]  }
  0x3f   : > { %741 = vmatmul.mubr.bf16.gmra.mrb[8].mxu0 %v4019_v42  ;;  %3179 = vmatmul.mubr.bf16.gmra.mrb[8].mxu1 %v4022_v43 }
  0x40   : > { %2875 = vmatpush3.bf16.msra.mxu1 %v3707_v45  ;;  %748 = vmatprep.mubr.bf16.mxu0 %v4036_v47  ;;  %v3773_v45 = vld [vmem:[%s4694_s1 + $0x198] sm:$0xff]  }
  0x41   : > { %2876 = vmatprep.subr.bf16.mxu1 %v3708_v46  ;;  %3182 = vmatprep.mubr.bf16.mxu1 %v4039_v48  ;;  %v3776_v46 = vld [vmem:[%s4694_s1 + $0x1e0] sm:$0xff]  }
  0x42   : > { %3146 = vmatprep.subr.bf16.mxu0 %v3898_v13 }
  0x43   : > { %3147 = vmatpush3.bf16.msra.mxu0 %v3898_v13  ;;  %v4165_v13 = vld [vmem:[%s4694_s1 + $0x200] sm:$0xff]  }
  0x44   : > { %2877 = vmatpush3.bf16.msra.mxu1 %v3709_v49  ;;  %3148 = vmatprep.subr.bf16.mxu0 %v3915_v16  ;;  %v4274_v49 = vld [vmem:[%s3937_s7 + $0x80] ss:$12 sps:$4 sm:$0xff]  }
  0x45   : > { %2878 = vmatprep.subr.bf16.mxu1 %v3715_v50  ;;  %v3777_v50 = vld [vmem:[%s4694_s1 + $0x1a0] sm:$0xff]  }
  0x47   : > { %749 = vmatmul.mubr.bf16.gmra.mrb[12].mxu0 %v4053_v51  ;;  %3183 = vmatmul.mubr.bf16.gmra.mrb[12].mxu1 %v4057_v52 }
  0x48   : > { %2879 = vmatpush3.bf16.msra.mxu1 %v3716_v53  ;;  %756 = vmatprep.mubr.bf16.mxu0 %v4064_v54  ;;  %v4280_v53 = vld [vmem:[%s3937_s7 + $0x98] ss:$12 sps:$4 sm:$0xff]  }
  0x49   : > { %2880 = vmatprep.subr.bf16.mxu1 %v3717_v55  ;;  %1319 = vmatprep.mubr.bf16.mxu1 %v3975_v31  ;;  %v4237_v31 = vld [vmem:[%s3937_s7 + $0x38] ss:$12 sps:$4 sm:$0xff]   ;;  %v3778_v55 = vld [vmem:[%s4694_s1 + $0x1e8] sm:$0xff]  }
  0x4a   : > { %3149 = vmatpush3.bf16.msra.mxu0 %v3915_v16  ;;  %v4179_v16 = vld [vmem:[%s3937_s7 + $0x10c] ss:$12 sps:$4 sm:$0xff]  }
  0x4b   : > { %3150 = vmatprep.subr.bf16.mxu0 %v3929_v19 }
  0x4c   : > { %2881 = vmatpush3.bf16.msra.mxu1 %v3718_v56  ;;  %v4286_v56 = vld [vmem:[%s3937_s7 + $0x184] ss:$12 sps:$4 sm:$0xff]  }
  0x4d   : > { %3186 = vmatprep.subr.bf16.mxu1 %v3725_v57 }
  0x4e   : > { %3151 = vmatpush3.bf16.msra.mxu0 %v3929_v19  ;;  %v4196_v19 = vld [vmem:[%s3937_s7 + $0x120] ss:$12 sps:$4 sm:$0xff]  }
  0x4f   : > { %757 = vmatmul.mubr.bf16.gmra.mrb[16].mxu0 %v4082_v58  ;;  %1320 = vmatmul.mubr.bf16.vlgmr.msra.gmra.mrb[16].mxu1 %v3987_v34  ;;  %v3766_v34 = vld [vmem:[%s4694_s1 + $0x188] sm:$0xff]  }
  0x50   : > { %764 = vmatprep.mubr.bf16.mxu0 %v4086_v59  ;;  %1327 = vmatprep.mubr.bf16.mxu1 %v4004_v39 }
  0x51   : > { %3187 = vmatpush3.bf16.msra.mxu1 %v3725_v57  ;;  %3152 = vmatprep.subr.bf16.mxu0 %v3946_v22  ;;  %v3779_v57 = vld [vmem:[%s4694_s1 + $0x1a8] sm:$0xff]  }
  0x52   : > { %3188 = vmatprep.subr.bf16.mxu1 %v3732_v60  ;;  %3153 = vmatpush3.bf16.msra.mxu0 %v3946_v22  ;;  %v4209_v22 = vld [vmem:[%s3937_s7 + $0x154] ss:$12 sps:$4 sm:$0xff]  }
  0x53   : > { %3002 = vmatprep.subr.bf16.mxu0 %v3763_v2  ;;  %v3788_v2 = vld [vmem:[%s4694_s1 + $0x1f8] sm:$0xff]  }
  0x55   : > { %3189 = vmatpush3.bf16.msra.mxu1 %v3732_v60  ;;  %v3785_v60 = vld [vmem:[%s4694_s1 + $0x1f0] sm:$0xff]  }
  0x56   : > { %3190 = vmatprep.subr.bf16.mxu1 %v3739_v61 }
  0x57   : > { %765 = vmatmul.mubr.bf16.gmra.mrb[20].mxu0 %v4102_v62  ;;  %1328 = vmatmul.mubr.bf16.gmra.mrb[20].mxu1 %v4019_v42 }
  0x58   : > { %772 = vmatprep.mubr.bf16.mxu0 %v4105_v63  ;;  %1335 = vmatprep.mubr.bf16.mxu1 %v4036_v47 }
  0x59   : > { %3191 = vmatpush3.bf16.msra.mxu1 %v3739_v61  ;;  %v4299_v61 = vld [vmem:[%s3937_s7 + $0xb0] ss:$12 sps:$4 sm:$0xff]  }
  0x5a   : > { %3192 = vmatprep.subr.bf16.mxu1 %v3746_v0 }
  0x5d   : > { %3193 = vmatpush3.bf16.msra.mxu1 %v3746_v0  ;;  %v4302_v0 = vld [vmem:[%s3937_s7 + $0x180] ss:$12 sps:$4 sm:$0xff]  }
  0x5e   : > { %3194 = vmatprep.subr.bf16.mxu1 %v3753_v1 }
  0x5f   : > { %773 = vmatmul.mubr.bf16.gmra.mrb[24].mxu0 %v4121_v3  ;;  %1336 = vmatmul.mubr.bf16.gmra.mrb[24].mxu1 %v4053_v51 }
  0x60   : > { %780 = vmatprep.mubr.bf16.mxu0 %v4124_v4  ;;  %1343 = vmatprep.mubr.bf16.mxu1 %v4064_v54 }
  0x61   : > { %3195 = vmatpush3.bf16.msra.mxu1 %v3753_v1  ;;  %v3786_v1 = vld [vmem:[%s4694_s1 + $0x1b0] sm:$0xff]  }
  0x62   : > { %3196 = vmatprep.subr.bf16.mxu1 %v3760_v5 }
  0x65   : > { %3197 = vmatpush3.bf16.msra.mxu1 %v3760_v5  ;;  %v3789_v5 = vld [vmem:[%s4694_s1 + $0x1b8] sm:$0xff]  }
  0x66   : > { %3198 = vmatprep.subr.bf16.mxu1 %v3771_v6 }
  0x67   : > { %781 = vmatmul.mubr.bf16.gmra.mrb[28].mxu0 %v4137_v7  ;;  %1344 = vmatmul.mubr.bf16.gmra.mrb[28].mxu1 %v4082_v58 }
  0x68   : > { %788 = vmatprep.mubr.bf16.mxu0 %v4140_v8  ;;  %1351 = vmatprep.mubr.bf16.mxu1 %v4086_v59 }
  0x69   : > { %3199 = vmatpush3.bf16.msra.mxu1 %v3771_v6  ;;  %v3791_v6 = vld [vmem:[%s4694_s1 + $0x208] sm:$0xff]  }
  0x6a   : > { %3200 = vmatprep.subr.bf16.mxu1 %v3787_v11 }
  0x6d   : > { %3201 = vmatpush3.bf16.msra.mxu1 %v3787_v11  ;;  %v3793_v11 = vld [vmem:[%s4694_s1 + $0x218] sm:$0xff]  }
  0x6e   : > { %3234 = vmatprep.subr.bf16.mxu1 %v4165_v13 }
  0x6f   : > { %789 = vmatmul.mubr.bf16.gmra.mrb[32].mxu0 %v4147_v9  ;;  %1352 = vmatmul.mubr.bf16.gmra.mrb[32].mxu1 %v4102_v62 }
  0x70   : > { %796 = vmatprep.mubr.bf16.mxu0 %v4150_v10  ;;  %1359 = vmatprep.mubr.bf16.mxu1 %v4105_v63 }
  0x77   : > { %797 = vmatmul.mubr.bf16.gmra.mrb[36].mxu0 %v4160_v12  ;;  %1360 = vmatmul.mubr.bf16.gmra.mrb[36].mxu1 %v4121_v3 }
  0x78   : > { %804 = vmatprep.mubr.bf16.mxu0 %v4168_v14  ;;  %1367 = vmatprep.mubr.bf16.mxu1 %v4124_v4 }
  0x7f   : > { %805 = vmatmul.mubr.bf16.gmra.mrb[40].mxu0 %v4176_v15  ;;  %1368 = vmatmul.mubr.bf16.gmra.mrb[40].mxu1 %v4137_v7 }
  0x80   : > { %812 = vmatprep.mubr.bf16.mxu0 %v4179_v16  ;;  %1375 = vmatprep.mubr.bf16.mxu1 %v4140_v8 }
  0x87   : > { %813 = vmatmul.mubr.bf16.gmra.mrb[44].mxu0 %v4186_v17  ;;  %1376 = vmatmul.mubr.bf16.gmra.mrb[44].mxu1 %v4147_v9 }
  0x88   : > { %820 = vmatprep.mubr.bf16.mxu0 %v4189_v18  ;;  %1383 = vmatprep.mubr.bf16.mxu1 %v4150_v10 }
  0x8f   : > { %821 = vmatmul.mubr.bf16.gmra.mrb[48].mxu0 %v4196_v19  ;;  %1384 = vmatmul.mubr.bf16.gmra.mrb[48].mxu1 %v4160_v12 }
  0x90   : > { %828 = vmatprep.mubr.bf16.mxu0 %v4199_v20  ;;  %1391 = vmatprep.mubr.bf16.mxu1 %v4168_v14 }
  0x97   : > { %829 = vmatmul.mubr.bf16.gmra.mrb[52].mxu0 %v4206_v21  ;;  %1392 = vmatmul.mubr.bf16.gmra.mrb[52].mxu1 %v4176_v15 }
  0x98   : > { %836 = vmatprep.mubr.bf16.mxu0 %v4209_v22  ;;  %1399 = vmatprep.mubr.bf16.mxu1 %v4179_v16 }
  0x9f   : > { %837 = vmatmul.mubr.bf16.gmra.mrb[56].mxu0 %v4216_v23  ;;  %1400 = vmatmul.mubr.bf16.gmra.mrb[56].mxu1 %v4186_v17 }
  0xa0   : > { %844 = vmatprep.mubr.bf16.mxu0 %v4219_v25  ;;  %1407 = vmatprep.mubr.bf16.mxu1 %v4189_v18 }
  0xa7   : > { %845 = vmatmul.mubr.bf16.gmra.mrb[60].mxu0 %v4226_v26  ;;  %1408 = vmatmul.mubr.bf16.gmra.mrb[60].mxu1 %v4196_v19 }
  0xa8   : > { %3154 = vmatprep.mubr.bf16.mxu0 %v3761_v27  ;;  %1415 = vmatprep.mubr.bf16.mxu1 %v4199_v20 }
  0xaf   : > { %3155 = vmatmul.mubr.bf16.vlgmr.msra.gmra.mrb[64].mxu0 %v3762_v29  ;;  %1416 = vmatmul.mubr.bf16.gmra.mrb[64].mxu1 %v4206_v21 }
  0xb0   : > { %3003 = vmatpush3.bf16.msra.mxu0 %v3764_v30  ;;  %3158 = vmatprep.mubr.bf16.mxu0 %v4237_v31 }
  0xb1   : > { %3004 = vmatprep.subr.bf16.mxu0 %v3765_v33  ;;  %1423 = vmatprep.mubr.bf16.mxu1 %v4209_v22 }
  0xb4   : > { %3005 = vmatpush3.bf16.msra.mxu0 %v3766_v34 }
  0xb5   : > { %3006 = vmatprep.subr.bf16.mxu0 %v3769_v35 }
  0xb7   : > { %3159 = vmatmul.mubr.bf16.gmra.mrb[68].mxu0 %v4252_v37  ;;  %1424 = vmatmul.mubr.bf16.gmra.mrb[68].mxu1 %v4216_v23 }
  0xb8   : > { %3007 = vmatpush3.bf16.msra.mxu0 %v3770_v38  ;;  %3162 = vmatprep.mubr.bf16.mxu0 %v4258_v41 }
  0xb9   : > { %3008 = vmatprep.subr.bf16.mxu0 %v3772_v44  ;;  %1431 = vmatprep.mubr.bf16.mxu1 %v4219_v25 }
  0xbc   : > { %3009 = vmatpush3.bf16.msra.mxu0 %v3773_v45 }
  0xbd   : > { %3010 = vmatprep.subr.bf16.mxu0 %v3776_v46 }
  0xbf   : > { %3163 = vmatmul.mubr.bf16.gmra.mrb[72].mxu0 %v4274_v49  ;;  %1432 = vmatmul.mubr.bf16.gmra.mrb[72].mxu1 %v4226_v26 }
  0xc0   : > { %3011 = vmatpush3.bf16.msra.mxu0 %v3777_v50  ;;  %3166 = vmatprep.mubr.bf16.mxu0 %v4280_v53 }
  0xc1   : > { %3012 = vmatprep.subr.bf16.mxu0 %v3778_v55  ;;  %1439 = vmatprep.mubr.bf16.mxu1 %v4286_v56 }
  0xc4   : > { %3013 = vmatpush3.bf16.msra.mxu0 %v3779_v57 }
  0xc5   : > { %3014 = vmatprep.subr.bf16.mxu0 %v3785_v60 }
  0xc7   : > { %3167 = vmatmul.mubr.bf16.gmra.mrb[76].mxu0 %v4299_v61  ;;  %1440 = vmatmul.mubr.bf16.gmra.mrb[76].mxu1 %v4302_v0 }
  0xc8   : > { %3015 = vmatpush3.bf16.msra.mxu0 %v3786_v1  ;;  %3202 = vmatprep.mubr.bf16.mxu1 %v3762_v29 }
  0xc9   : > { %3016 = vmatprep.subr.bf16.mxu0 %v3788_v2  ;;  %1946 = vmatprep.mubr.bf16.mxu0 %v4004_v39  ;;  %v3792_v39 = vld [vmem:[%s4694_s1 + $0x210] sm:$0xff]  }
  0xcc   : > { %3017 = vmatpush3.bf16.msra.mxu0 %v3789_v5 }
  0xcf   : > { %3203 = vmatmul.mubr.bf16.vlgmr.msra.gmra.mrb[80].mxu1 %v4237_v31  ;;  %1947 = vmatmul.mubr.bf16.vlgmr.msra.gmra.mrb[80].mxu0 %v4019_v42  ;;  %v3794_v42 = vld [vmem:[%s4694_s1 + $0x220] sm:$0xff]  }
  0xd0   : > { %3206 = vmatprep.mubr.bf16.mxu1 %v4252_v37  ;;  %1954 = vmatprep.mubr.bf16.mxu0 %v4036_v47  ;;  %v3795_v47 = vld [vmem:[%s4694_s1 + $0x228] sm:$0xff]  }
  0xd1   : > { %3235 = vmatpush3.bf16.msra.mxu1 %v4165_v13 }
  0xd2   : > { %3236 = vmatprep.subr.bf16.mxu1 %v3791_v6 }
  0xd5   : > { %3237 = vmatpush3.bf16.msra.mxu1 %v3791_v6 }
  0xd6   : > { %3238 = vmatprep.subr.bf16.mxu1 %v3792_v39 }
  0xd7   : > { %3207 = vmatmul.mubr.bf16.gmra.mrb[84].mxu1 %v4258_v41  ;;  %1955 = vmatmul.mubr.bf16.gmra.mrb[84].mxu0 %v4053_v51  ;;  %v3797_v51 = vld [vmem:[%s4694_s1 + $0x230] sm:$0xff]  }
  0xd8   : > { %3210 = vmatprep.mubr.bf16.mxu1 %v4274_v49  ;;  %1962 = vmatprep.mubr.bf16.mxu0 %v4064_v54  ;;  %v3798_v54 = vld [vmem:[%s4694_s1 + $0x238] sm:$0xff]  }
  0xd9   : > { %3239 = vmatpush3.bf16.msra.mxu1 %v3792_v39 }
  0xda   : > { %3240 = vmatprep.subr.bf16.mxu1 %v3793_v11 }
  0xdd   : > { %3241 = vmatpush3.bf16.msra.mxu1 %v3793_v11 }
  0xde   : > { %3242 = vmatprep.subr.bf16.mxu1 %v3794_v42 }
  0xdf   : > { %3211 = vmatmul.mubr.bf16.gmra.mrb[88].mxu1 %v4280_v53  ;;  %1963 = vmatmul.mubr.bf16.gmra.mrb[88].mxu0 %v4082_v58 }
  0xe0   : > { %3214 = vmatprep.mubr.bf16.mxu1 %v4299_v61  ;;  %1970 = vmatprep.mubr.bf16.mxu0 %v4086_v59 }
  0xe1   : > { %3243 = vmatpush3.bf16.msra.mxu1 %v3794_v42 }
  0xe2   : > { %3244 = vmatprep.subr.bf16.mxu1 %v3795_v47 }
  0xe5   : > { %3245 = vmatpush3.bf16.msra.mxu1 %v3795_v47 }
  0xe6   : > { %3246 = vmatprep.subr.bf16.mxu1 %v3797_v51 }
  0xe7   : > { %3215 = vmatmul.mubr.bf16.gmra.mrb[92].mxu1 %v3951_v24  ;;  %1971 = vmatmul.mubr.bf16.gmra.mrb[92].mxu0 %v4102_v62  ;;  %v4367_v62 = vld [vmem:[%s3937_s7 + $0x188] ss:$12 sps:$4 sm:$0xff]  }
  0xe8   : > { %3218 = vmatprep.mubr.bf16.mxu1 %v3964_v28  ;;  %1978 = vmatprep.mubr.bf16.mxu0 %v4105_v63 }
  0xe9   : > { %3247 = vmatpush3.bf16.msra.mxu1 %v3797_v51 }
  0xea   : > { %3248 = vmatprep.subr.bf16.mxu1 %v3798_v54 }
  0xed   : > { %3249 = vmatpush3.bf16.msra.mxu1 %v3798_v54 }
  0xef   : > { %3219 = vmatmul.mubr.bf16.gmra.mrb[0].mxu1 %v3978_v32  ;;  %1979 = vmatmul.mubr.bf16.gmra.mrb[96].mxu0 %v4121_v3 }
  0xf0   : > { %3222 = vmatprep.mubr.bf16.mxu1 %v3994_v36  ;;  %1986 = vmatprep.mubr.bf16.mxu0 %v4124_v4 }
  0xf7   : > { %3223 = vmatmul.mubr.bf16.gmra.mrb[4].mxu1 %v4008_v40  ;;  %1987 = vmatmul.mubr.bf16.gmra.mrb[100].mxu0 %v4137_v7 }
  0xf8   : > { %3226 = vmatprep.mubr.bf16.mxu1 %v4022_v43  ;;  %1994 = vmatprep.mubr.bf16.mxu0 %v4140_v8 }
  0xff   : > { %3227 = vmatmul.mubr.bf16.gmra.mrb[8].mxu1 %v4039_v48  ;;  %1995 = vmatmul.mubr.bf16.gmra.mrb[104].mxu0 %v4147_v9 }
 0x100   : > { %3230 = vmatprep.mubr.bf16.mxu1 %v4057_v52  ;;  %2002 = vmatprep.mubr.bf16.mxu0 %v4150_v10 }
 0x102   : > { %v2746_v58 = vpop.f32.mrb[0].mxu0 }
 0x103   : > { %v2747_v59 = vpop.f32.mrb[1].mxu0 }
 0x104   : > { %v4369_v63 = vadd.f32 %v2747_v59, %v2746_v58  ;;  %v2749_v3 = vpop.f32.mrb[2].mxu0 }
 0x105   : > { %v2750_v4 = vpop.f32.mrb[3].mxu0 }
 0x106   : > { %v4371_v7 = vadd.f32 %v2750_v4, %v2749_v3 }
 0x107   : > { %3231 = vmatmul.mubr.bf16.gmra.mrb[12].mxu1 %v4367_v62  ;;  %2003 = vmatmul.mubr.bf16.gmra.mrb[108].mxu0 %v4160_v12 }
 0x108   : > { %2010 = vmatprep.mubr.bf16.mxu0 %v4168_v14  ;;  %3250 = vmatprep.mubr.bf16.mxu1 %v4237_v31 }
 0x10a   : > { %v2752_v8 = vpop.f32.mrb[4].mxu0 }
 0x10b   : > { %v2753_v9 = vpop.f32.mrb[5].mxu0 }
 0x10c   : > { %v4377_v10 = vadd.f32 %v2753_v9, %v2752_v8  ;;  %v2755_v13 = vpop.f32.mrb[6].mxu0 }
 0x10d   : > { %v2756_v27 = vpop.f32.mrb[7].mxu0 }
 0x10e   : > { %v4379_v29 = vadd.f32 %v2756_v27, %v2755_v13 }
 0x10f   : > { %2011 = vmatmul.mubr.bf16.gmra.mrb[112].mxu0 %v4176_v15  ;;  %3251 = vmatmul.mubr.bf16.vlgmr.msra.gmra.mrb[80].mxu1 %v4252_v37 }
 0x110   : > { %2018 = vmatprep.mubr.bf16.mxu0 %v4179_v16  ;;  %3254 = vmatprep.mubr.bf16.mxu1 %v4258_v41 }
 0x112   : > { %v2758_v12 = vpop.f32.mrb[8].mxu0 }
 0x113   : > { %v2759_v14 = vpop.f32.mrb[9].mxu0 }
 0x114   : > { %v4385_v30 = vadd.f32 %v2759_v14, %v2758_v12  ;;  %v2761_v31 = vpop.f32.mrb[10].mxu0 }
 0x115   : > { %v2762_v33 = vpop.f32.mrb[11].mxu0 }
 0x116   : > { %v4387_v34 = vadd.f32 %v2762_v33, %v2761_v31  ;;  %v3799_v33 = vld [vmem:[%s3937_s7 + $0x19c] ss:$12 sps:$4 sm:$0xff]  }
 0x117   : > { %2019 = vmatmul.mubr.bf16.gmra.mrb[116].mxu0 %v4186_v17  ;;  %3255 = vmatmul.mubr.bf16.gmra.mrb[84].mxu1 %v4274_v49 }
 0x118   : > { %2026 = vmatprep.mubr.bf16.mxu0 %v4189_v18  ;;  %3258 = vmatprep.mubr.bf16.mxu1 %v4280_v53 }
 0x11a   : > { %v2764_v15 = vpop.f32.mrb[12].mxu0 }
 0x11b   : > { %v2765_v16 = vpop.f32.mrb[13].mxu0 }
 0x11c   : > { %v4393_v35 = vadd.f32 %v2765_v16, %v2764_v15  ;;  %v2767_v37 = vpop.f32.mrb[14].mxu0 }
 0x11d   : > { %v2768_v38 = vpop.f32.mrb[15].mxu0 }
 0x11e   : > { %v4395_v41 = vadd.f32 %v2768_v38, %v2767_v37  ;;  %v3801_v38 = vld [vmem:[%s3937_s7 + $0x198] ss:$12 sps:$4 sm:$0xff]  }
 0x11f   : > { %2027 = vmatmul.mubr.bf16.gmra.mrb[120].mxu0 %v4196_v19  ;;  %3259 = vmatmul.mubr.bf16.gmra.mrb[88].mxu1 %v4299_v61 }
 0x120   : > { %2034 = vmatprep.mubr.bf16.mxu0 %v4199_v20  ;;  %3262 = vmatprep.mubr.bf16.mxu1 %v3951_v24 }
 0x122   : > { %v2770_v17 = vpop.f32.mrb[16].mxu0  ;;  %v2882_v18 = vpop.f32.mrb[16].mxu1 }
 0x123   : > { %v2771_v44 = vpop.f32.mrb[17].mxu0  ;;  %v2883_v45 = vpop.f32.mrb[17].mxu1 }
 0x124   : > { %v4401_v46 = vadd.f32 %v2771_v44, %v2770_v17  ;;  %v2773_v49 = vpop.f32.mrb[18].mxu0  ;;  %v4403_v50 = vadd.f32 %v2883_v45, %v2882_v18  ;;  %v2885_v53 = vpop.f32.mrb[18].mxu1  ;;  %v3802_v17 = vld [vmem:[%s3937_s7 + $0x1a0] ss:$12 sps:$4 sm:$0xff]  }
 0x125   : > { %v2774_v55 = vpop.f32.mrb[19].mxu0  ;;  %v2886_v57 = vpop.f32.mrb[19].mxu1 }
 0x126   : > { %v4405_v60 = vadd.f32 %v2774_v55, %v2773_v49  ;;  %v4407_v19 = vadd.f32 %v2886_v57, %v2885_v53 }
 0x127   : > { %2035 = vmatmul.mubr.bf16.gmra.mrb[124].mxu0 %v4206_v21  ;;  %3263 = vmatmul.mubr.bf16.gmra.mrb[92].mxu1 %v3964_v28 }
 0x128   : > { %2042 = vmatprep.mubr.bf16.mxu0 %v4209_v22  ;;  %3266 = vmatprep.mubr.bf16.mxu1 %v3978_v32 }
 0x12a   : > { %v2776_v24 = vpop.f32.mrb[20].mxu0  ;;  %v2888_v20 = vpop.f32.mrb[20].mxu1 }
 0x12b   : > { %v2777_v61 = vpop.f32.mrb[21].mxu0  ;;  %v2889_v1 = vpop.f32.mrb[21].mxu1 }
 0x12c   : > { %v4413_v2 = vadd.f32 %v2777_v61, %v2776_v24  ;;  %v2779_v5 = vpop.f32.mrb[22].mxu0  ;;  %v4415_v6 = vadd.f32 %v2889_v1, %v2888_v20  ;;  %v2891_v39 = vpop.f32.mrb[22].mxu1 }
 0x12d   : > { %v2780_v11 = vpop.f32.mrb[23].mxu0  ;;  %v2892_v42 = vpop.f32.mrb[23].mxu1 }
 0x12e   : > { %v4417_v47 = vadd.f32 %v2780_v11, %v2779_v5  ;;  %v4419_v21 = vadd.f32 %v2892_v42, %v2891_v39 }
 0x12f   : > { %2043 = vmatmul.mubr.bf16.gmra.mrb[128].mxu0 %v4216_v23  ;;  %3267 = vmatmul.mubr.bf16.gmra.mrb[0].mxu1 %v3994_v36 }
 0x130   : > { %2050 = vmatprep.mubr.bf16.mxu0 %v4219_v25  ;;  %3270 = vmatprep.mubr.bf16.mxu1 %v4008_v40 }
 0x132   : > { %v2782_v28 = vpop.f32.mrb[24].mxu0  ;;  %v2894_v32 = vpop.f32.mrb[24].mxu1 }
 0x133   : > { %v2783_v22 = vpop.f32.mrb[25].mxu0  ;;  %v2895_v51 = vpop.f32.mrb[25].mxu1 }
 0x134   : > { %v4425_v54 = vadd.f32 %v2783_v22, %v2782_v28  ;;  %v2785_v58 = vpop.f32.mrb[26].mxu0  ;;  %v4427_v59 = vadd.f32 %v2895_v51, %v2894_v32  ;;  %v2897_v3 = vpop.f32.mrb[26].mxu1 }
 0x135   : > { %v2786_v4 = vpop.f32.mrb[27].mxu0  ;;  %v2898_v8 = vpop.f32.mrb[27].mxu1 }
 0x136   : > { %v4429_v23 = vadd.f32 %v2786_v4, %v2785_v58  ;;  %v4431_v36 = vadd.f32 %v2898_v8, %v2897_v3 }
 0x137   : > { %2051 = vmatmul.mubr.bf16.gmra.mrb[132].mxu0 %v4226_v26  ;;  %3271 = vmatmul.mubr.bf16.gmra.mrb[4].mxu1 %v4022_v43 }
 0x138   : > { %2058 = vmatprep.mubr.bf16.mxu0 %v4286_v56  ;;  %3274 = vmatprep.mubr.bf16.mxu1 %v4039_v48 }
 0x13a   : > { %v2788_v40 = vpop.f32.mrb[28].mxu0  ;;  %v2900_v25 = vpop.f32.mrb[28].mxu1 }
 0x13b   : > { %v2789_v9 = vpop.f32.mrb[29].mxu0  ;;  %v2901_v13 = vpop.f32.mrb[29].mxu1 }
 0x13c   : > { %v4437_v27 = vadd.f32 %v2789_v9, %v2788_v40  ;;  %v2791_v12 = vpop.f32.mrb[30].mxu0  ;;  %v4439_v14 = vadd.f32 %v2901_v13, %v2900_v25  ;;  %v2903_v31 = vpop.f32.mrb[30].mxu1 }
 0x13d   : > { %v2792_v26 = vpop.f32.mrb[31].mxu0  ;;  %v2904_v15 = vpop.f32.mrb[31].mxu1 }
 0x13e   : > { %v4442_v43 = vadd.f32 %v2792_v26, %v2791_v12  ;;  %v4444_v56 = vadd.f32 %v2904_v15, %v2903_v31 }
 0x13f   : > { %2059 = vmatmul.mubr.bf16.gmra.mrb[136].mxu0 %v4302_v0  ;;  %3275 = vmatmul.mubr.bf16.gmra.mrb[8].mxu1 %v4057_v52 }
 0x140   : > { %2066 = vmatprep.mubr.bf16.mxu0 %v3799_v33  ;;  %3278 = vmatprep.mubr.bf16.mxu1 %v4367_v62 }
 0x142   : > { %v2794_v48 = vpop.f32.mrb[32].mxu0  ;;  %v2906_v16 = vpop.f32.mrb[32].mxu1 }
 0x143   : > { %v2795_v37 = vpop.f32.mrb[33].mxu0  ;;  %v2907_v18 = vpop.f32.mrb[33].mxu1 }
 0x144   : > { %v2796_v44 = vadd.f32 %v2795_v37, %v2794_v48  ;;  %v2797_v45 = vpop.f32.mrb[34].mxu0  ;;  %v4451_v49 = vadd.f32 %v2907_v18, %v2906_v16  ;;  %v2909_v53 = vpop.f32.mrb[34].mxu1 }
 0x145   : > { %v2798_v55 = vpop.f32.mrb[35].mxu0  ;;  %v2910_v57 = vpop.f32.mrb[35].mxu1 }
 0x146   : > { %v2799_v24 = vadd.f32 %v2798_v55, %v2797_v45  ;;  %v4453_v0 = vadd.f32 %v2910_v57, %v2909_v53 }
 0x147   : > { %2067 = vmatmul.mubr.bf16.gmra.mrb[140].mxu0 %v3801_v38  ;;  %3279 = vmatmul.mubr.bf16.gmra.mrb[12].mxu1 %v3802_v17 }
 0x14a   : > { %v2800_v52 = vpop.f32.mrb[36].mxu0  ;;  %v2912_v62 = vpop.f32.mrb[36].mxu1 }
 0x14b   : > { %v2801_v20 = vpop.f32.mrb[37].mxu0  ;;  %v2913_v61 = vpop.f32.mrb[37].mxu1 }
 0x14c   : > { %v2802_v1 = vadd.f32 %v2801_v20, %v2800_v52  ;;  %v2803_v5 = vpop.f32.mrb[38].mxu0  ;;  %v4455_v39 = vadd.f32 %v2913_v61, %v2912_v62  ;;  %v2915_v11 = vpop.f32.mrb[38].mxu1 }
 0x14d   : > { %v2804_v42 = vpop.f32.mrb[39].mxu0  ;;  %v2916_v28 = vpop.f32.mrb[39].mxu1 }
 0x14e   : > { %v2805_v32 = vadd.f32 %v2804_v42, %v2803_v5  ;;  %v4457_v22 = vadd.f32 %v2916_v28, %v2915_v11 }
 0x152   : > { %v2806_v51 = vpop.f32.mrb[40].mxu0  ;;  %v2918_v58 = vpop.f32.mrb[40].mxu1 }
 0x153   : > { %v2807_v3 = vpop.f32.mrb[41].mxu0  ;;  %v2919_v4 = vpop.f32.mrb[41].mxu1 }
 0x154   : > { %v2808_v8 = vadd.f32 %v2807_v3, %v2806_v51  ;;  %v2809_v40 = vpop.f32.mrb[42].mxu0  ;;  %v4459_v25 = vadd.f32 %v2919_v4, %v2918_v58  ;;  %v2921_v9 = vpop.f32.mrb[42].mxu1 }
 0x155   : > { %v2810_v13 = vpop.f32.mrb[43].mxu0  ;;  %v2922_v12 = vpop.f32.mrb[43].mxu1 }
 0x156   : > { %v2811_v31 = vadd.f32 %v2810_v13, %v2809_v40  ;;  %v4461_v33 = vadd.f32 %v2922_v12, %v2921_v9 }
 0x15a   : > { %v2812_v26 = vpop.f32.mrb[44].mxu0  ;;  %v2924_v15 = vpop.f32.mrb[44].mxu1 }
 0x15b   : > { %v2813_v48 = vpop.f32.mrb[45].mxu0  ;;  %v2925_v16 = vpop.f32.mrb[45].mxu1 }
 0x15c   : > { %v2814_v37 = vadd.f32 %v2813_v48, %v2812_v26  ;;  %v2815_v38 = vpop.f32.mrb[46].mxu0  ;;  %v4463_v17 = vadd.f32 %v2925_v16, %v2924_v15  ;;  %v2927_v18 = vpop.f32.mrb[46].mxu1 }
 0x15d   : > { %v2816_v45 = vpop.f32.mrb[47].mxu0  ;;  %v2928_v53 = vpop.f32.mrb[47].mxu1 }
 0x15e   : > { %v2817_v55 = vadd.f32 %v2816_v45, %v2815_v38  ;;  %v4465_v57 = vadd.f32 %v2928_v53, %v2927_v18 }
 0x162   : > { %v2818_v52 = vpop.f32.mrb[48].mxu0  ;;  %v2930_v62 = vpop.f32.mrb[48].mxu1 }
 0x163   : > { %v2819_v20 = vpop.f32.mrb[49].mxu0  ;;  %v2931_v61 = vpop.f32.mrb[49].mxu1 }
 0x164   : > { %v4467_v5 = vadd.f32 %v2819_v20, %v2818_v52  ;;  %v2932_v11 = vadd.f32 %v2931_v61, %v2930_v62  ;;  %v2821_v42 = vpop.f32.mrb[50].mxu0  ;;  %v2933_v28 = vpop.f32.mrb[50].mxu1 }
 0x165   : > { %v2822_v51 = vpop.f32.mrb[51].mxu0  ;;  %v2934_v58 = vpop.f32.mrb[51].mxu1 }
 0x166   : > { %v4469_v3 = vadd.f32 %v2932_v11, %v2796_v44  ;;  %v4471_v4 = vadd.f32 %v2822_v51, %v2821_v42  ;;  %v2935_v40 = vadd.f32 %v2934_v58, %v2933_v28 }
 0x168   : > { %v4473_v9 = vadd.f32 %v2935_v40, %v2799_v24 }
 0x16a   : > { %v2824_v13 = vpop.f32.mrb[52].mxu0  ;;  %v2936_v12 = vpop.f32.mrb[52].mxu1 }
 0x16b   : > { %v2825_v26 = vpop.f32.mrb[53].mxu0  ;;  %v2937_v15 = vpop.f32.mrb[53].mxu1 }
 0x16c   : > { %v4475_v48 = vadd.f32 %v2825_v26, %v2824_v13  ;;  %v2938_v16 = vadd.f32 %v2937_v15, %v2936_v12  ;;  %v2827_v38 = vpop.f32.mrb[54].mxu0  ;;  %v2939_v18 = vpop.f32.mrb[54].mxu1 }
 0x16d   : > { %v2828_v45 = vpop.f32.mrb[55].mxu0  ;;  %v2940_v53 = vpop.f32.mrb[55].mxu1 }
 0x16e   : > { %v4477_v52 = vadd.f32 %v2938_v16, %v2802_v1  ;;  %v4479_v44 = vadd.f32 %v2828_v45, %v2827_v38  ;;  %v2941_v62 = vadd.f32 %v2940_v53, %v2939_v18 }
 0x170   : > { %v4481_v20 = vadd.f32 %v2941_v62, %v2805_v32 }
 0x172   : > { %4697 = vst [vmem:[#allocation3_spill] sm:$0xff] %v4481_v20  ;;  %v2830_v24 = vpop.f32.mrb[56].mxu0  ;;  %v2942_v61 = vpop.f32.mrb[56].mxu1 }
 0x173   : > { %v2831_v11 = vpop.f32.mrb[57].mxu0  ;;  %v2943_v42 = vpop.f32.mrb[57].mxu1 }
 0x174   : > { %v4483_v28 = vadd.f32 %v2831_v11, %v2830_v24  ;;  %v2944_v51 = vadd.f32 %v2943_v42, %v2942_v61  ;;  %v2833_v58 = vpop.f32.mrb[58].mxu0  ;;  %v2945_v40 = vpop.f32.mrb[58].mxu1 }
 0x175   : > { %v2834_v13 = vpop.f32.mrb[59].mxu0  ;;  %v2946_v12 = vpop.f32.mrb[59].mxu1 }
 0x176   : > { %v4485_v26 = vadd.f32 %v2944_v51, %v2808_v8  ;;  %v4487_v1 = vadd.f32 %v2834_v13, %v2833_v58  ;;  %v2947_v15 = vadd.f32 %v2946_v12, %v2945_v40 }
 0x178   : > { %v4489_v16 = vadd.f32 %v2947_v15, %v2811_v31 }
 0x17a   : > { %4698 = vst [vmem:[#allocation4_spill] sm:$0xff] %v4489_v16  ;;  %v2836_v32 = vpop.f32.mrb[60].mxu0  ;;  %v2948_v38 = vpop.f32.mrb[60].mxu1 }
 0x17b   : > { %v2837_v18 = vpop.f32.mrb[61].mxu0  ;;  %v2949_v45 = vpop.f32.mrb[61].mxu1 }
 0x17c   : > { %v4491_v53 = vadd.f32 %v2837_v18, %v2836_v32  ;;  %v2950_v62 = vadd.f32 %v2949_v45, %v2948_v38  ;;  %v2839_v24 = vpop.f32.mrb[62].mxu0  ;;  %v2951_v61 = vpop.f32.mrb[62].mxu1 }
 0x17d   : > { %v2840_v11 = vpop.f32.mrb[63].mxu0  ;;  %v2952_v42 = vpop.f32.mrb[63].mxu1 }
 0x17e   : > { %v4493_v20 = vadd.f32 %v2950_v62, %v2814_v37  ;;  %v4495_v8 = vadd.f32 %v2840_v11, %v2839_v24  ;;  %v2953_v51 = vadd.f32 %v2952_v42, %v2951_v61 }
 0x180   : > { %v4497_v58 = vadd.f32 %v2953_v51, %v2817_v55 }
 0x182   : > { %v3156_v31 = vpop.f32.mrb[64].mxu0  ;;  %v2954_v40 = vpop.f32.mrb[64].mxu1 }
 0x183   : > { %v896_v13 = vadd.f32 %v3156_v31, %v4377_v10  ;;  %v887_v12 = vpop.f32.mrb[65].mxu0  ;;  %v2955_v15 = vpop.f32.mrb[65].mxu1 }
 0x184   : > { %v888_v32 = vadd.f32 %v4369_v63, %v887_v12  ;;  %v2956_v38 = vadd.f32 %v2955_v15, %v2954_v40  ;;  %v3157_v18 = vpop.f32.mrb[66].mxu0  ;;  %v2957_v45 = vpop.f32.mrb[66].mxu1 }
 0x185   : > { %v4502_v16 = vadd.f32 %v4415_v6, %v896_v13  ;;  %v899_v37 = vadd.f32 %v3157_v18, %v4379_v29  ;;  %v890_v62 = vpop.f32.mrb[67].mxu0  ;;  %v2958_v24 = vpop.f32.mrb[67].mxu1 }
 0x186   : > { %v4506_v55 = vadd.f32 %v4403_v50, %v888_v32  ;;  %v4509_v61 = vadd.f32 %v2956_v38, %v4467_v5  ;;  %v891_v10 = vadd.f32 %v4371_v7, %v890_v62  ;;  %v2959_v11 = vadd.f32 %v2958_v24, %v2957_v45 }
 0x187   : > { %v4513_v63 = vadd.f32 %v4419_v21, %v899_v37 }
 0x188   : > { %v4516_v42 = vadd.f32 %v4407_v19, %v891_v10  ;;  %v4519_v6 = vadd.f32 %v2959_v11, %v4471_v4 }
 0x18a   : > { %v3160_v29 = vpop.f32.mrb[68].mxu0  ;;  %v2960_v51 = vpop.f32.mrb[68].mxu1 }
 0x18b   : > { %v912_v50 = vadd.f32 %v3160_v29, %v4393_v35  ;;  %v903_v31 = vpop.f32.mrb[69].mxu0  ;;  %v2961_v40 = vpop.f32.mrb[69].mxu1 }
 0x18c   : > { %v904_v5 = vadd.f32 %v4385_v30, %v903_v31  ;;  %v2962_v13 = vadd.f32 %v2961_v40, %v2960_v51  ;;  %v3161_v7 = vpop.f32.mrb[70].mxu0  ;;  %v2963_v12 = vpop.f32.mrb[70].mxu1 }
 0x18d   : > { %v4524_v21 = vadd.f32 %v4439_v14, %v912_v50  ;;  %v915_v19 = vadd.f32 %v3161_v7, %v4395_v41  ;;  %v906_v15 = vpop.f32.mrb[71].mxu0  ;;  %v2964_v32 = vpop.f32.mrb[71].mxu1 }
 0x18e   : > { %v4528_v4 = vadd.f32 %v4427_v59, %v904_v5  ;;  %v4531_v38 = vadd.f32 %v2962_v13, %v4475_v48  ;;  %v907_v35 = vadd.f32 %v4387_v34, %v906_v15  ;;  %v2965_v18 = vadd.f32 %v2964_v32, %v2963_v12 }
 0x18f   : > { %v4535_v30 = vadd.f32 %v4444_v56, %v915_v19 }
 0x190   : > { %v4538_v45 = vadd.f32 %v4431_v36, %v907_v35  ;;  %v4541_v14 = vadd.f32 %v2965_v18, %v4479_v44 }
 0x192   : > { %v3164_v41 = vpop.f32.mrb[72].mxu0  ;;  %v2966_v37 = vpop.f32.mrb[72].mxu1 }
 0x193   : > { %v928_v59 = vadd.f32 %v3164_v41, %v4413_v2  ;;  %v919_v62 = vpop.f32.mrb[73].mxu0  ;;  %v2967_v24 = vpop.f32.mrb[73].mxu1 }
 0x194   : > { %v920_v48 = vadd.f32 %v4401_v46, %v919_v62  ;;  %v2968_v10 = vadd.f32 %v2967_v24, %v2966_v37  ;;  %v3165_v34 = vpop.f32.mrb[74].mxu0  ;;  %v2969_v11 = vpop.f32.mrb[74].mxu1 }
 0x195   : > { %v4546_v56 = vadd.f32 %v4455_v39, %v928_v59  ;;  %v931_v36 = vadd.f32 %v3165_v34, %v4417_v47  ;;  %v922_v29 = vpop.f32.mrb[75].mxu0  ;;  %v2970_v51 = vpop.f32.mrb[75].mxu1 }
 0x196   : > { %v4550_v44 = vadd.f32 %v4451_v49, %v920_v48  ;;  %v4553_v50 = vadd.f32 %v2968_v10, %v4483_v28  ;;  %v923_v2 = vadd.f32 %v4405_v60, %v922_v29  ;;  %v2971_v31 = vadd.f32 %v2970_v51, %v2969_v11 }
 0x197   : > { %v4557_v46 = vadd.f32 %v4457_v22, %v931_v36 }
 0x198   : > { %v3411_v40 = vadd.f32 %v4453_v0, %v923_v2  ;;  %v4561_v39 = vadd.f32 %v2971_v31, %v4487_v1 }
 0x19a   : > { %v3168_v47 = vpop.f32.mrb[76].mxu0  ;;  %v2972_v5 = vpop.f32.mrb[76].mxu1 }
 0x19b   : > { %v944_v13 = vadd.f32 %v3168_v47, %v4437_v27  ;;  %v935_v49 = vpop.f32.mrb[77].mxu0  ;;  %v2973_v7 = vpop.f32.mrb[77].mxu1 }
 0x19c   : > { %v936_v28 = vadd.f32 %v4425_v54, %v935_v49  ;;  %v2974_v12 = vadd.f32 %v2973_v7, %v2972_v5  ;;  %v3169_v19 = vpop.f32.mrb[78].mxu0  ;;  %v2975_v60 = vpop.f32.mrb[78].mxu1 }
 0x19d   : > { %v4566_v15 = vadd.f32 %v4463_v17, %v944_v13  ;;  %v947_v22 = vadd.f32 %v3169_v19, %v4442_v43  ;;  %v938_v0 = vpop.f32.mrb[79].mxu0  ;;  %v2976_v32 = vpop.f32.mrb[79].mxu1 }
 0x19e   : > { %v3431_v1 = vadd.f32 %v4459_v25, %v936_v28  ;;  %v4571_v35 = vadd.f32 %v2974_v12, %v4491_v53  ;;  %v939_v27 = vadd.f32 %v4429_v23, %v938_v0  ;;  %v2977_v18 = vadd.f32 %v2976_v32, %v2975_v60 }
 0x19f   : > { %v4575_v54 = vadd.f32 %v4465_v57, %v947_v22 }
 0x1a0   : > { %v3451_v41 = vadd.f32 %v4461_v33, %v939_v27  ;;  %v4579_v17 = vadd.f32 %v2977_v18, %v4495_v8 }
 0x1a2   : > { %v3018_v37 = vpop.f32.mrb[80].mxu0 }
 0x1a3   : > { %v3019_v43 = vpop.f32.mrb[81].mxu0 }
 0x1a4   : > { %v3020_v59 = vadd.f32 %v3019_v43, %v3018_v37  ;;  %v3021_v62 = vpop.f32.mrb[82].mxu0 }
 0x1a5   : > { %v3022_v24 = vpop.f32.mrb[83].mxu0 }
 0x1a6   : > { %v4582_v25 = vadd.f32 %v4506_v55, %v3020_v59  ;;  %v3023_v53 = vadd.f32 %v3022_v24, %v3021_v62 }
 0x1a8   : > { %v4585_v23 = vadd.f32 %v4516_v42, %v3023_v53 }
 0x1aa   : > { %v3024_v48 = vpop.f32.mrb[84].mxu0 }
 0x1ab   : > { %v3025_v57 = vpop.f32.mrb[85].mxu0 }
 0x1ac   : > { %v3026_v10 = vadd.f32 %v3025_v57, %v3024_v48  ;;  %v3027_v34 = vpop.f32.mrb[86].mxu0 }
 0x1ad   : > { %v3028_v33 = vpop.f32.mrb[87].mxu0 }
 0x1ae   : > { %v3304_v8 = vadd.f32 %v4502_v16, %v3026_v10  ;;  %v3029_v11 = vadd.f32 %v3028_v33, %v3027_v34 }
 0x1b0   : > { %v3324_v36 = vadd.f32 %v4513_v63, %v3029_v11 }
 0x1b2   : > { %v3030_v29 = vpop.f32.mrb[88].mxu0 }
 0x1b3   : > { %v3031_v51 = vpop.f32.mrb[89].mxu0 }
 0x1b4   : > { %v3032_v2 = vadd.f32 %v3031_v51, %v3030_v29  ;;  %v3033_v31 = vpop.f32.mrb[90].mxu0 }
 0x1b5   : > { %v3034_v55 = vpop.f32.mrb[91].mxu0 }
 0x1b6   : > { %v4590_v47 = vadd.f32 %v4528_v4, %v3032_v2  ;;  %v3035_v42 = vadd.f32 %v3034_v55, %v3033_v31 }
 0x1b8   : > { %v4593_v5 = vadd.f32 %v4538_v45, %v3035_v42 }
 0x1ba   : > { %v3036_v13 = vpop.f32.mrb[92].mxu0 }
 0x1bb   : > { %v3037_v49 = vpop.f32.mrb[93].mxu0 }
 0x1bc   : > { %v3038_v7 = vadd.f32 %v3037_v49, %v3036_v13  ;;  %v3039_v28 = vpop.f32.mrb[94].mxu0 }
 0x1bd   : > { %v3040_v16 = vpop.f32.mrb[95].mxu0 }
 0x1be   : > { %v3344_v12 = vadd.f32 %v4524_v21, %v3038_v7  ;;  %v3041_v63 = vadd.f32 %v3040_v16, %v3039_v28 }
 0x1c0   : > { %v4597_v19 = vadd.f32 %v4535_v30, %v3041_v63 }
 0x1c2   : > { %v3042_v60 = vpop.f32.mrb[96].mxu0 }
 0x1c3   : > { %v3043_v22 = vpop.f32.mrb[97].mxu0 }
 0x1c4   : > { %v3044_v0 = vadd.f32 %v3043_v22, %v3042_v60  ;;  %v3045_v4 = vpop.f32.mrb[98].mxu0 }
 0x1c5   : > { %v3046_v32 = vpop.f32.mrb[99].mxu0 }
 0x1c6   : > { %v4600_v27 = vadd.f32 %v4550_v44, %v3044_v0  ;;  %v3047_v45 = vadd.f32 %v3046_v32, %v3045_v4 }
 0x1c8   : > { %v4602_v18 = vadd.f32 %v3411_v40, %v3047_v45 }
 0x1ca   : > { %v3048_v37 = vpop.f32.mrb[100].mxu0 }
 0x1cb   : > { %v3049_v43 = vpop.f32.mrb[101].mxu0 }
 0x1cc   : > { %v3050_v59 = vadd.f32 %v3049_v43, %v3048_v37  ;;  %v3051_v62 = vpop.f32.mrb[102].mxu0 }
 0x1cd   : > { %v3052_v21 = vpop.f32.mrb[103].mxu0 }
 0x1ce   : > { %v4605_v24 = vadd.f32 %v4546_v56, %v3050_v59  ;;  %v3053_v30 = vadd.f32 %v3052_v21, %v3051_v62 }
 0x1d0   : > { %v4608_v53 = vadd.f32 %v4557_v46, %v3053_v30 }
 0x1d2   : > { %v3054_v48 = vpop.f32.mrb[104].mxu0 }
 0x1d3   : > { %v3055_v57 = vpop.f32.mrb[105].mxu0 }
 0x1d4   : > { %v3056_v10 = vadd.f32 %v3055_v57, %v3054_v48  ;;  %v3057_v44 = vpop.f32.mrb[106].mxu0 }
 0x1d5   : > { %v3058_v34 = vpop.f32.mrb[107].mxu0 }
 0x1d6   : > { %v4610_v33 = vadd.f32 %v3431_v1, %v3056_v10  ;;  %v3059_v40 = vadd.f32 %v3058_v34, %v3057_v44  ;;  %v4699_v44 = vld [vmem:[#allocation3_spill] sm:$0xff] }
 0x1d8   : > { %v4612_v11 = vadd.f32 %v3451_v41, %v3059_v40 }
 0x1da   : > { %v3060_v29 = vpop.f32.mrb[108].mxu0 }
 0x1db   : > { %v3061_v51 = vpop.f32.mrb[109].mxu0 }
 0x1dc   : > { %v3062_v2 = vadd.f32 %v3061_v51, %v3060_v29  ;;  %v3063_v31 = vpop.f32.mrb[110].mxu0 }
 0x1dd   : > { %v3064_v56 = vpop.f32.mrb[111].mxu0 }
 0x1de   : > { %v4615_v55 = vadd.f32 %v4566_v15, %v3062_v2  ;;  %v3065_v46 = vadd.f32 %v3064_v56, %v3063_v31 }
 0x1e0   : > { %v4618_v42 = vadd.f32 %v4575_v54, %v3065_v46 }
 0x1e2   : > { %v3066_v13 = vpop.f32.mrb[112].mxu0  ;;  %v3252_v49 = vpop.f32.mrb[80].mxu1 }
 0x1e3   : > { %v3307_v7 = vadd.f32 %v3304_v8, %v3252_v49  ;;  %v3067_v1 = vpop.f32.mrb[113].mxu0  ;;  %v2109_v28 = vpop.f32.mrb[81].mxu1 }
 0x1e4   : > { %v3068_v16 = vadd.f32 %v3067_v1, %v3066_v13  ;;  %v3317_v41 = vadd.f32 %v4582_v25, %v2109_v28  ;;  %v3069_v63 = vpop.f32.mrb[114].mxu0  ;;  %v3253_v60 = vpop.f32.mrb[82].mxu1 }
 0x1e5   : > { %2270 = vst [vmem:[#allocation2 + $0x10] sm:$0xff] %v3307_v7  ;;  %v3327_v22 = vadd.f32 %v3324_v36, %v3253_v60  ;;  %v3070_v0 = vpop.f32.mrb[115].mxu0  ;;  %v2112_v4 = vpop.f32.mrb[83].mxu1 }
 0x1e6   : > { %v4622_v15 = vadd.f32 %v4469_v3, %v3068_v16  ;;  %2268 = vst [vmem:[#allocation2] sm:$0xff] %v3317_v41  ;;  %v3071_v54 = vadd.f32 %v3070_v0, %v3069_v63  ;;  %v3337_v32 = vadd.f32 %v4585_v23, %v2112_v4 }
 0x1e7   : > { %2271 = vst [vmem:[#allocation2 + $0x18] sm:$0xff] %v3327_v22 }
 0x1e8   : > { %v4626_v8 = vadd.f32 %v4473_v9, %v3071_v54  ;;  %2269 = vst [vmem:[#allocation2 + $0x8] sm:$0xff] %v3337_v32 }
 0x1ea   : > { %v3072_v45 = vpop.f32.mrb[116].mxu0  ;;  %v3256_v25 = vpop.f32.mrb[84].mxu1 }
 0x1eb   : > { %v3347_v37 = vadd.f32 %v3344_v12, %v3256_v25  ;;  %v3073_v43 = vpop.f32.mrb[117].mxu0  ;;  %v2125_v59 = vpop.f32.mrb[85].mxu1  ;;  %v4650_v25 = vld [vmem:[%s4695_s2] ss:$0 sm:$0xff] }
 0x1ec   : > { %v3074_v36 = vadd.f32 %v3073_v43, %v3072_v45  ;;  %v3357_v62 = vadd.f32 %v4590_v47, %v2125_v59  ;;  %v3075_v21 = vpop.f32.mrb[118].mxu0  ;;  %v3257_v3 = vpop.f32.mrb[86].mxu1  ;;  %v4700_v45 = vld [vmem:[#allocation4_spill] sm:$0xff] }
 0x1ed   : > { %2274 = vst [vmem:[#allocation2 + $0x30] sm:$0xff] %v3347_v37  ;;  %v3367_v30 = vadd.f32 %v4597_v19, %v3257_v3  ;;  %v3076_v48 = vpop.f32.mrb[119].mxu0  ;;  %v2128_v23 = vpop.f32.mrb[87].mxu1 }
 0x1ee   : > { %v4631_v57 = vadd.f32 %v4477_v52, %v3074_v36  ;;  %2272 = vst [vmem:[#allocation2 + $0x20] sm:$0xff] %v3357_v62  ;;  %v3077_v9 = vadd.f32 %v3076_v48, %v3075_v21  ;;  %v3377_v10 = vadd.f32 %v4593_v5, %v2128_v23  ;;  %v2302_v12 = vld [vmem:[#allocation2 + $0x10] ss:$2 sm:$0xff]  ;;  %v2334_v47 = vld [vmem:[#allocation2 + $0x11] ss:$2 sm:$0xff] }
 0x1ef   : > { %2275 = vst [vmem:[#allocation2 + $0x38] sm:$0xff] %v3367_v30  ;;  %v2300_v40 = vld [vmem:[#allocation2] ss:$2 sm:$0xff]  ;;  %v2332_v29 = vld [vmem:[#allocation2 + $0x1] ss:$2 sm:$0xff]  ;;  %v2364_v56 = vmax.f32 %v2302_v12, %v2334_v47 }
 0x1f0   : > { %v4635_v34 = vadd.f32 %v4699_v44, %v3077_v9  ;;  %2273 = vst [vmem:[#allocation2 + $0x28] sm:$0xff] %v3377_v10  ;;  %v2363_v46 = vmax.f32 %v2300_v40, %v2332_v29 }
 0x1f2   : > { %v3078_v51 = vpop.f32.mrb[120].mxu0  ;;  %v3260_v19 = vpop.f32.mrb[88].mxu1  ;;  %v2379_v54 = vmax.f32 %v2363_v46, %v2364_v56 }
 0x1f3   : > { %v3387_v2 = vadd.f32 %v4605_v24, %v3260_v19  ;;  %v3079_v31 = vpop.f32.mrb[121].mxu0  ;;  %v2141_v52 = vpop.f32.mrb[89].mxu1 }
 0x1f4   : > { %v3080_v13 = vadd.f32 %v3079_v31, %v3078_v51  ;;  %v3397_v5 = vadd.f32 %v4600_v27, %v2141_v52  ;;  %v3081_v49 = vpop.f32.mrb[122].mxu0  ;;  %v3261_v7 = vpop.f32.mrb[90].mxu1  ;;  %v2394_v62 = vadd.f32 %v4650_v25, %v2379_v54 }
 0x1f5   : > { %2278 = vst [vmem:[#allocation2 + $0x50] sm:$0xff] %v3387_v2  ;;  %v3407_v1 = vadd.f32 %v4608_v53, %v3261_v7  ;;  %v3082_v28 = vpop.f32.mrb[123].mxu0  ;;  %v2144_v16 = vpop.f32.mrb[91].mxu1 }
 0x1f6   : > { %v2306_v41 = vld [vmem:[#allocation2 + $0x30] ss:$2 sm:$0xff]  ;;  %v2338_v63 = vld [vmem:[#allocation2 + $0x31] ss:$2 sm:$0xff]  ;;  %v4641_v60 = vadd.f32 %v4485_v26, %v3080_v13  ;;  %2276 = vst [vmem:[#allocation2 + $0x40] sm:$0xff] %v3397_v5  ;;  %v3083_v24 = vadd.f32 %v3082_v28, %v3081_v49  ;;  %v3417_v22 = vadd.f32 %v4602_v18, %v2144_v16 }
 0x1f7   : > { %v2366_v0 = vmax.f32 %v2306_v41, %v2338_v63  ;;  %v2304_v4 = vld [vmem:[#allocation2 + $0x20] ss:$2 sm:$0xff]  ;;  %v2336_v27 = vld [vmem:[#allocation2 + $0x21] ss:$2 sm:$0xff]  ;;  %2279 = vst [vmem:[#allocation2 + $0x58] sm:$0xff] %v3407_v1 }
 0x1f8   : > { %v2365_v32 = vmax.f32 %v2304_v4, %v2336_v27  ;;  %v4645_v53 = vadd.f32 %v4700_v45, %v3083_v24  ;;  %2277 = vst [vmem:[#allocation2 + $0x48] sm:$0xff] %v3417_v22 }
 0x1fa   : > { %v2380_v26 = vmax.f32 %v2365_v32, %v2366_v0  ;;  %v3084_v37 = vpop.f32.mrb[124].mxu0  ;;  %v3264_v43 = vpop.f32.mrb[92].mxu1 }
 0x1fb   : > { %v3427_v18 = vadd.f32 %v4615_v55, %v3264_v43  ;;  %v3085_v59 = vpop.f32.mrb[125].mxu0  ;;  %v2157_v36 = vpop.f32.mrb[93].mxu1 }
 0x1fc   : > { %v2395_v21 = vadd.f32 %v4650_v25, %v2380_v26  ;;  %v3086_v3 = vadd.f32 %v3085_v59, %v3084_v37  ;;  %v3437_v30 = vadd.f32 %v4610_v33, %v2157_v36  ;;  %v3087_v48 = vpop.f32.mrb[126].mxu0  ;;  %v3265_v23 = vpop.f32.mrb[94].mxu1 }
 0x1fd   : > { %2282 = vst [vmem:[#allocation2 + $0x70] sm:$0xff] %v3427_v18  ;;  %v3447_v55 = vadd.f32 %v4618_v42, %v3265_v23  ;;  %v3088_v9 = vpop.f32.mrb[127].mxu0  ;;  %v2160_v10 = vpop.f32.mrb[95].mxu1 }
 0x1fe   : > { %v2710_v12 = vpack.c.bf16 %v2395_v21, %v2394_v62  ;;  %v3499_v44 = vadd.f32 %v4493_v20, %v3086_v3  ;;  %2280 = vst [vmem:[#allocation2 + $0x60] sm:$0xff] %v3437_v30  ;;  %v3089_v47 = vadd.f32 %v3088_v9, %v3087_v48  ;;  %v3457_v33 = vadd.f32 %v4612_v11, %v2160_v10  ;;  %v2310_v40 = vld [vmem:[#allocation2 + $0x50] ss:$2 sm:$0xff]  ;;  %v2342_v51 = vld [vmem:[#allocation2 + $0x51] ss:$2 sm:$0xff] }
 0x1ff   : > { %2283 = vst [vmem:[#allocation2 + $0x78] sm:$0xff] %v3447_v55  ;;  %v2308_v19 = vld [vmem:[#allocation2 + $0x40] ss:$2 sm:$0xff]  ;;  %v2340_v2 = vld [vmem:[#allocation2 + $0x41] ss:$2 sm:$0xff]  ;;  %v2368_v20 = vmax.f32 %v2310_v40, %v2342_v51 }
 0x200   : > { %2711 = vst [vmem:[%s4660_s13] sm:$0xff] %v2710_v12   ;;  %v3517_v29 = vadd.f32 %v4497_v58, %v3089_v47  ;;  %2281 = vst [vmem:[#allocation2 + $0x68] sm:$0xff] %v3457_v33  ;;  %v2367_v13 = vmax.f32 %v2308_v19, %v2340_v2 }
 0x202   : > { %v3090_v31 = vpop.f32.mrb[128].mxu0  ;;  %v3268_v42 = vpop.f32.mrb[0].mxu1 }
 0x203   : > { %v3466_v52 = vadd.f32 %v4631_v57, %v3268_v42  ;;  %v3091_v56 = vpop.f32.mrb[129].mxu0  ;;  %v2173_v46 = vpop.f32.mrb[1].mxu1 }
 0x204   : > { %v3092_v5 = vadd.f32 %v3091_v56, %v3090_v31  ;;  %v3475_v11 = vadd.f32 %v4622_v15, %v2173_v46  ;;  %v3093_v49 = vpop.f32.mrb[130].mxu0  ;;  %v3269_v7 = vpop.f32.mrb[2].mxu1  ;;  %v2381_v15 = vmax.f32 %v2367_v13, %v2368_v20 }
 0x205   : > { %2286 = vst [vmem:[#allocation2 + $0x90] sm:$0xff] %v3466_v52  ;;  %v3484_v58 = vadd.f32 %v4635_v34, %v3269_v7  ;;  %v3094_v1 = vpop.f32.mrb[131].mxu0  ;;  %v2176_v28 = vpop.f32.mrb[3].mxu1 }
 0x206   : > { %v2314_v16 = vld [vmem:[#allocation2 + $0x70] ss:$2 sm:$0xff]  ;;  %v2346_v41 = vld [vmem:[#allocation2 + $0x71] ss:$2 sm:$0xff]  ;;  %v3544_v63 = vadd.f32 %v4509_v61, %v3092_v5  ;;  %2284 = vst [vmem:[#allocation2 + $0x80] sm:$0xff] %v3475_v11  ;;  %v3095_v57 = vadd.f32 %v3094_v1, %v3093_v49  ;;  %v3493_v24 = vadd.f32 %v4626_v8, %v2176_v28  ;;  %v2396_v61 = vadd.f32 %v4650_v25, %v2381_v15 }
 0x207   : > { %v2370_v22 = vmax.f32 %v2314_v16, %v2346_v41  ;;  %v2312_v0 = vld [vmem:[#allocation2 + $0x60] ss:$2 sm:$0xff]  ;;  %v2344_v4 = vld [vmem:[#allocation2 + $0x61] ss:$2 sm:$0xff]  ;;  %2287 = vst [vmem:[#allocation2 + $0x98] sm:$0xff] %v3484_v58 }
 0x208   : > { %v2369_v27 = vmax.f32 %v2312_v0, %v2344_v4  ;;  %v3562_v54 = vadd.f32 %v4519_v6, %v3095_v57  ;;  %2285 = vst [vmem:[#allocation2 + $0x88] sm:$0xff] %v3493_v24 }
 0x20a   : > { %v2382_v34 = vmax.f32 %v2369_v27, %v2370_v22  ;;  %v3096_v32 = vpop.f32.mrb[132].mxu0  ;;  %v3272_v45 = vpop.f32.mrb[4].mxu1 }
 0x20b   : > { %v3502_v26 = vadd.f32 %v3499_v44, %v3272_v45  ;;  %v3097_v37 = vpop.f32.mrb[133].mxu0  ;;  %v2189_v43 = vpop.f32.mrb[5].mxu1 }
 0x20c   : > { %v2397_v8 = vadd.f32 %v4650_v25, %v2382_v34  ;;  %v3098_v18 = vadd.f32 %v3097_v37, %v3096_v32  ;;  %v3511_v59 = vadd.f32 %v4641_v60, %v2189_v43  ;;  %v3099_v36 = vpop.f32.mrb[134].mxu0  ;;  %v3273_v62 = vpop.f32.mrb[6].mxu1 }
 0x20d   : > { %2290 = vst [vmem:[#allocation2 + $0xb0] sm:$0xff] %v3502_v26  ;;  %v3520_v21 = vadd.f32 %v3517_v29, %v3273_v62  ;;  %v3100_v6 = vpop.f32.mrb[135].mxu0  ;;  %v2192_v3 = vpop.f32.mrb[7].mxu1 }
 0x20e   : > { %v2715_v30 = vpack.c.bf16 %v2397_v8, %v2396_v61  ;;  %v3535_v48 = vadd.f32 %v4531_v38, %v3098_v18  ;;  %2288 = vst [vmem:[#allocation2 + $0xa0] sm:$0xff] %v3511_v59  ;;  %v3101_v23 = vadd.f32 %v3100_v6, %v3099_v36  ;;  %v3529_v55 = vadd.f32 %v4645_v53, %v2192_v3  ;;  %v2318_v9 = vld [vmem:[#allocation2 + $0x90] ss:$2 sm:$0xff]  ;;  %v2350_v60 = vld [vmem:[#allocation2 + $0x91] ss:$2 sm:$0xff] }
 0x20f   : > { %2291 = vst [vmem:[#allocation2 + $0xb8] sm:$0xff] %v3520_v21  ;;  %v2316_v12 = vld [vmem:[#allocation2 + $0x80] ss:$2 sm:$0xff]  ;;  %v2348_v44 = vld [vmem:[#allocation2 + $0x81] ss:$2 sm:$0xff]  ;;  %v2372_v19 = vmax.f32 %v2318_v9, %v2350_v60 }
 0x210   : > { %2727 = vst [vmem:[%s4660_s13 + $0x8] sm:$0xff] %v2715_v30   ;;  %v3553_v10 = vadd.f32 %v4541_v14, %v3101_v23  ;;  %2289 = vst [vmem:[#allocation2 + $0xa8] sm:$0xff] %v3529_v55  ;;  %v2371_v38 = vmax.f32 %v2316_v12, %v2348_v44 }
 0x212   : > { %v3102_v47 = vpop.f32.mrb[136].mxu0  ;;  %v3276_v33 = vpop.f32.mrb[8].mxu1  ;;  %v2383_v1 = vmax.f32 %v2371_v38, %v2372_v19 }
 0x213   : > { %v3538_v40 = vadd.f32 %v3535_v48, %v3276_v33  ;;  %v3103_v29 = vpop.f32.mrb[137].mxu0  ;;  %v2205_v51 = vpop.f32.mrb[9].mxu1 }
 0x214   : > { %v3104_v2 = vadd.f32 %v3103_v29, %v3102_v47  ;;  %v3547_v31 = vadd.f32 %v3544_v63, %v2205_v51  ;;  %v3105_v42 = vpop.f32.mrb[138].mxu0  ;;  %v3277_v53 = vpop.f32.mrb[10].mxu1 }
 0x215   : > { %2294 = vst [vmem:[#allocation2 + $0xd0] sm:$0xff] %v3538_v40  ;;  %v3556_v52 = vadd.f32 %v3553_v10, %v3277_v53  ;;  %v3106_v56 = vpop.f32.mrb[139].mxu0  ;;  %v2208_v46 = vpop.f32.mrb[11].mxu1 }
 0x216   : > { %v2322_v14 = vld [vmem:[#allocation2 + $0xb0] ss:$2 sm:$0xff]  ;;  %v2354_v20 = vld [vmem:[#allocation2 + $0xb1] ss:$2 sm:$0xff]  ;;  %v3580_v13 = vadd.f32 %v4553_v50, %v3104_v2  ;;  %2292 = vst [vmem:[#allocation2 + $0xc0] sm:$0xff] %v3547_v31  ;;  %v3107_v5 = vadd.f32 %v3106_v56, %v3105_v42  ;;  %v3565_v11 = vadd.f32 %v3562_v54, %v2208_v46  ;;  %v2398_v50 = vadd.f32 %v4650_v25, %v2383_v1 }
 0x217   : > { %v2374_v49 = vmax.f32 %v2322_v14, %v2354_v20  ;;  %v2320_v7 = vld [vmem:[#allocation2 + $0xa0] ss:$2 sm:$0xff]  ;;  %v2352_v58 = vld [vmem:[#allocation2 + $0xa1] ss:$2 sm:$0xff]  ;;  %2295 = vst [vmem:[#allocation2 + $0xd8] sm:$0xff] %v3556_v52 }
 0x218   : > { %v2373_v28 = vmax.f32 %v2320_v7, %v2352_v58  ;;  %v3598_v16 = vadd.f32 %v4561_v39, %v3107_v5  ;;  %2293 = vst [vmem:[#allocation2 + $0xc8] sm:$0xff] %v3565_v11 }
 0x21a   : > { %v2384_v41 = vmax.f32 %v2373_v28, %v2374_v49  ;;  %v3108_v63 = vpop.f32.mrb[140].mxu0  ;;  %v3280_v57 = vpop.f32.mrb[12].mxu1 }
 0x21b   : > { %v3109_v24 = vpop.f32.mrb[141].mxu0  ;;  %v2221_v22 = vpop.f32.mrb[13].mxu1 }
 0x21c   : > { %v2399_v0 = vadd.f32 %v4650_v25, %v2384_v41  ;;  %v3110_v4 = vadd.f32 %v3109_v24, %v3108_v63  ;;  %v3583_v15 = vadd.f32 %v3580_v13, %v2221_v22  ;;  %v3111_v27 = vpop.f32.mrb[142].mxu0  ;;  %v3281_v54 = vpop.f32.mrb[14].mxu1 }
 0x21d   : > { %v3112_v34 = vpop.f32.mrb[143].mxu0  ;;  %v2224_v32 = vpop.f32.mrb[15].mxu1 }
 0x21e   : > { %v2720_v45 = vpack.c.bf16 %v2399_v0, %v2398_v50  ;;  %v3571_v39 = vadd.f32 %v4571_v35, %v3110_v4  ;;  %2296 = vst [vmem:[#allocation2 + $0xe0] sm:$0xff] %v3583_v15  ;;  %v3113_v26 = vadd.f32 %v3112_v34, %v3111_v27  ;;  %v3601_v37 = vadd.f32 %v3598_v16, %v2224_v32  ;;  %v2326_v18 = vld [vmem:[#allocation2 + $0xd0] ss:$2 sm:$0xff]  ;;  %v2358_v59 = vld [vmem:[#allocation2 + $0xd1] ss:$2 sm:$0xff] }
 0x21f   : > { %v2324_v36 = vld [vmem:[#allocation2 + $0xc0] ss:$2 sm:$0xff]  ;;  %v2356_v62 = vld [vmem:[#allocation2 + $0xc1] ss:$2 sm:$0xff]  ;;  %v2376_v21 = vmax.f32 %v2326_v18, %v2358_v59 }
 0x220   : > { %2728 = vst [vmem:[%s4660_s13 + $0x10] sm:$0xff] %v2720_v45   ;;  %v3574_v43 = vadd.f32 %v3571_v39, %v3280_v57  ;;  %v3589_v61 = vadd.f32 %v4579_v17, %v3113_v26  ;;  %2297 = vst [vmem:[#allocation2 + $0xe8] sm:$0xff] %v3601_v37  ;;  %v2375_v6 = vmax.f32 %v2324_v36, %v2356_v62 }
 0x222   : > { %2298 = vst [vmem:[#allocation2 + $0xf0] sm:$0xff] %v3574_v43  ;;  %v3592_v8 = vadd.f32 %v3589_v61, %v3281_v54  ;;  %v2385_v23 = vmax.f32 %v2375_v6, %v2376_v21 }
 0x224   : > { %2299 = vst [vmem:[#allocation2 + $0xf8] sm:$0xff] %v3592_v8  ;;  %v2400_v17 = vadd.f32 %v4650_v25, %v2385_v23 }
 0x227   : > { %v2328_v3 = vld [vmem:[#allocation2 + $0xe0] ss:$2 sm:$0xff]  ;;  %v2360_v35 = vld [vmem:[#allocation2 + $0xe1] ss:$2 sm:$0xff] }
 0x228   : > { %v2377_v55 = vmax.f32 %v2328_v3, %v2360_v35 }
 0x22b   : > { %v2330_v30 = vld [vmem:[#allocation2 + $0xf0] ss:$2 sm:$0xff]  ;;  %v2362_v48 = vld [vmem:[#allocation2 + $0xf1] ss:$2 sm:$0xff] }
 0x22c   : > { %v2378_v9 = vmax.f32 %v2330_v30, %v2362_v48 }
 0x22e   : > { %v2386_v10 = vmax.f32 %v2377_v55, %v2378_v9 }
 0x230   : > { %v2401_v60 = vadd.f32 %v4650_v25, %v2386_v10 }
 0x232   : > { %v2725_v12 = vpack.c.bf16 %v2401_v60, %v2400_v17 }
 0x234   : > { %2729 = vst [vmem:[%s4660_s13 + $0x18] sm:$0xff] %v2725_v12  }
 0x235 PF: > { %s13_s12 = sadd.s32 1, %s3809_s12  }
 0x236   : > { %p10_p4 = scmp.ge.s32.totalorder %s13_s12, 4  }
 0x238   :  { %12 = sbr.rel (!%p10_p4) target bundleno = 1 (0x1), region = 95 }

// kernel: variable_input_cnn_forward.4
= control target key start
LH: loop header
LB: loop body
LE: loop exit
PB: predicated region body
PF: predicated region fallthrough
CT: control target
= control target key end

     0   :  { %s5705_s12 = smov 0   ;;  %s6549_s0 = inlined_call_operand.vmem [shape: bf16[2,34,32,9], index: 0, kind: input, shape index: {}]   ;;  %s6550_s1 = inlined_call_operand.vmem [shape: bf16[3,9,128], index: 1, kind: input, shape index: {}]   ;;  %s6551_s2 = inlined_call_operand.vmem [shape: f32[1,128], index: 2, kind: input, shape index: {}]   ;;  %s6552_s3 = inlined_call_operand.vmem [shape: bf16[2,16,16,128], index: 3, kind: output, shape index: {}]  }
   0x1 LB: > { %s4057_s13 = sadd.s32 4294967295, %s5682_s12   ;;  %p4061_p0 = scmp.ge.s32.totalorder %s5682_s12, 1  ;;  %s5682_s12 = sphi %s5705_s12, %s13_s12  }
   0x2   : > { %p137_p1 = scmp.lt.s32.totalorder %s5682_s12, 3 }
   0x4   : > { %p138_p2 = pnand %p4061_p0, %p137_p1 }
   0x6   : > { %141 = sbr.rel (%p138_p2) target bundleno = 634 (0x27a), region = 32 }
   0xd   : > { %v5604_v0 = vld [vmem:[%s6550_s1] sm:$0x1f]   ;;  %vm828_vm0 = vcmask 1043456   ;;  %vm829_vm1 = vcmask 1044480   ;;  %p161_p3 = scmp.lt.s32.totalorder %s4057_s13, 1  ;;  %v5684_v1 = vmov 65535  }
   0xe   : > { %v830_v2 = vsel %vm828_vm0, 4294967295, %v5684_v1  ;;  %v5605_v3 = vld [vmem:[%s6550_s1 + $0x8] sm:$0x1f]   ;;  %v5611_v7 = vld [vmem:[%s6550_s1 + $0x10] sm:$0x1f]   ;;  %vm635_vm2 = vcmask 72704  }
   0xf   : > { %v831_v4 = vsel %vm829_vm1, %v830_v2, 0  ;;  %s6586_s13 = smov (!%p161_p3, %s4057_s13), 1 }
  0x10   : > { %v833_v5 = vand.u32 %v5604_v0, %v831_v4  ;;  %v1661_v6 = vand.u32 %v5605_v3, %v831_v4  ;;  %s5594_s20 = smul.u32 544, %s6586_s13  ;;  %v2617_v8 = vand.u32 %v5611_v7, %v831_v4  ;;  %s4367_s26 = sshll.u32 %s6586_s13, 7 }
  0x11   : > { %s6439_s29 = scalar_lea.vmem %s6552_s3, %s4367_s26 }
  0x12   : > { %4690 = vmatprep.subr.bf16.mxu1 %v833_v5  ;;  %4820 = vmatprep.subr.bf16.mxu0 %v1661_v6  ;;  %s5728_s23 = scalar_lea.vmem %s6549_s0, %s5594_s20 }
  0x13   : > { %4691 = vmatpush3.bf16.msra.mxu1 %v833_v5  ;;  %4821 = vmatpush3.bf16.msra.mxu0 %v1661_v6  ;;  %v5606_v9 = vld [vmem:[%s5728_s23] sm:$0xff]   ;;  %v5607_v10 = vld [vmem:[%s5728_s23 + $0x10] sm:$0xff]   ;;  %v5608_v11 = vld [vmem:[%s5728_s23 + $0x8] sm:$0xff]  }
  0x14   : > { %5080 = vmatprep.subr.bf16.mxu1 %v1661_v6  ;;  %4950 = vmatprep.subr.bf16.mxu0 %v2617_v8  ;;  %v5609_v12 = vld [vmem:[%s5728_s23 + $0x18] sm:$0xff]   ;;  %v5738_v13 = vld [vmem:[%s5728_s23 + $0x20] sm:$0xff]   ;;  %v5745_v14 = vld [vmem:[%s5728_s23 + $0x28] sm:$0xff]  }
  0x15   : > { %4692 = vmatprep.mubr.msk.bf16.mxu1 %vm635_vm2, %v5606_v9  ;;  %4822 = vmatprep.mubr.msk.bf16.mxu0 %vm635_vm2, %v5607_v10  ;;  %v5748_v15 = vld [vmem:[%s5728_s23 + $0x30] sm:$0xff]   ;;  %v5758_v16 = vld [vmem:[%s5728_s23 + $0x38] sm:$0xff]   ;;  %v5761_v17 = vld [vmem:[%s5728_s23 + $0x40] sm:$0xff]  }
  0x16   : > { %4693 = vmatmul.mubr.msk.bf16.vlgmr.msra.gmra.mrb[0].mxu1 %vm635_vm2, %v5608_v11  ;;  %4823 = vmatmul.mubr.msk.bf16.vlgmr.msra.gmra.mrb[0].mxu0 %vm635_vm2, %v5609_v12  ;;  %v5772_v18 = vld [vmem:[%s5728_s23 + $0x48] sm:$0xff]   ;;  %v5775_v19 = vld [vmem:[%s5728_s23 + $0x50] sm:$0xff]   ;;  %v5786_v20 = vld [vmem:[%s5728_s23 + $0x58] sm:$0xff]  }
  0x17   : > { %5081 = vmatpush3.bf16.msra.mxu1 %v1661_v6  ;;  %4696 = vmatprep.mubr.msk.bf16.mxu1 %vm635_vm2, %v5607_v10  ;;  %v5789_v21 = vld [vmem:[%s5728_s23 + $0x60] sm:$0xff]   ;;  %v5800_v22 = vld [vmem:[%s5728_s23 + $0x68] sm:$0xff]   ;;  %v5803_v23 = vld [vmem:[%s5728_s23 + $0x70] sm:$0xff]  }
  0x18   : > { %4826 = vmatprep.mubr.msk.bf16.mxu0 %vm635_vm2, %v5738_v13  ;;  %4951 = vmatpush3.bf16.msra.mxu0 %v2617_v8  ;;  %v5814_v24 = vld [vmem:[%s5728_s23 + $0x78] sm:$0xff]   ;;  %v5817_v25 = vld [vmem:[%s5728_s23 + $0x80] sm:$0xff]   ;;  %v5828_v26 = vld [vmem:[%s5728_s23 + $0x88] sm:$0xff]  }
  0x19   : > { %v5831_v27 = vld [vmem:[%s5728_s23 + $0x90] sm:$0xff]   ;;  %v5842_v28 = vld [vmem:[%s5728_s23 + $0x98] sm:$0xff]   ;;  %v5845_v29 = vld [vmem:[%s5728_s23 + $0xa0] sm:$0xff]  }
  0x1a   : > { %v5856_v30 = vld [vmem:[%s5728_s23 + $0xa8] sm:$0xff]   ;;  %v5859_v31 = vld [vmem:[%s5728_s23 + $0xb0] sm:$0xff]   ;;  %v5870_v32 = vld [vmem:[%s5728_s23 + $0xb8] sm:$0xff]  }
  0x1b   : > { %v5873_v33 = vld [vmem:[%s5728_s23 + $0xc0] sm:$0xff]   ;;  %v5884_v34 = vld [vmem:[%s5728_s23 + $0xc8] sm:$0xff]   ;;  %v5887_v35 = vld [vmem:[%s5728_s23 + $0xd0] sm:$0xff]  }
  0x1c   : > { %v5898_v36 = vld [vmem:[%s5728_s23 + $0xd8] sm:$0xff]   ;;  %v5901_v37 = vld [vmem:[%s5728_s23 + $0xe0] sm:$0xff]   ;;  %v5912_v38 = vld [vmem:[%s5728_s23 + $0xe8] sm:$0xff]  }
  0x1d   : > { %v5915_v39 = vld [vmem:[%s5728_s23 + $0xf0] sm:$0xff]   ;;  %v5926_v40 = vld [vmem:[%s5728_s23 + $0xf8] sm:$0xff]   ;;  %v5929_v41 = vld [vmem:[%s5728_s23 + $0x100] sm:$0xff]  }
  0x1e   : > { %4697 = vmatmul.mubr.msk.bf16.gmra.mrb[4].mxu1 %vm635_vm2, %v5609_v12  ;;  %4827 = vmatmul.mubr.msk.bf16.gmra.mrb[4].mxu0 %vm635_vm2, %v5745_v14  ;;  %v5940_v42 = vld [vmem:[%s5728_s23 + $0x108] sm:$0xff]   ;;  %v5951_v43 = vld [vmem:[%s5728_s23 + $0x110] sm:$0xff]   ;;  %v5962_v44 = vld [vmem:[%s5728_s23 + $0x118] sm:$0xff]  }
  0x1f   : > { %4700 = vmatprep.mubr.msk.bf16.mxu1 %vm635_vm2, %v5738_v13  ;;  %4830 = vmatprep.mubr.msk.bf16.mxu0 %vm635_vm2, %v5748_v15  ;;  %v5965_v45 = vld [vmem:[%s5728_s23 + $0x120] sm:$0xff]   ;;  %v5976_v46 = vld [vmem:[%s5728_s23 + $0x128] sm:$0xff]   ;;  %v5979_v47 = vld [vmem:[%s5728_s23 + $0x130] sm:$0xff]  }
  0x20   : > { %v5990_v48 = vld [vmem:[%s5728_s23 + $0x138] sm:$0xff]   ;;  %v5993_v49 = vld [vmem:[%s5728_s23 + $0x140] sm:$0xff]   ;;  %v6004_v50 = vld [vmem:[%s5728_s23 + $0x148] sm:$0xff]  }
  0x21   : > { %v6007_v51 = vld [vmem:[%s5728_s23 + $0x150] sm:$0xff]   ;;  %v6018_v52 = vld [vmem:[%s5728_s23 + $0x158] sm:$0xff]   ;;  %v6021_v53 = vld [vmem:[%s5728_s23 + $0x160] sm:$0xff]  }
  0x22   : > { %v6032_v54 = vld [vmem:[%s5728_s23 + $0x168] sm:$0xff]   ;;  %v6035_v55 = vld [vmem:[%s5728_s23 + $0x170] sm:$0xff]   ;;  %v6046_v56 = vld [vmem:[%s5728_s23 + $0x178] sm:$0xff]  }
  0x23   : > { %v6049_v57 = vld [vmem:[%s5728_s23 + $0x180] sm:$0xff]   ;;  %v6060_v58 = vld [vmem:[%s5728_s23 + $0x188] sm:$0xff]   ;;  %v6063_v59 = vld [vmem:[%s5728_s23 + $0x190] sm:$0xff]  }
  0x24   : > { %v6074_v60 = vld [vmem:[%s5728_s23 + $0x198] sm:$0xff]   ;;  %v6077_v61 = vld [vmem:[%s5728_s23 + $0x1a0] sm:$0xff]   ;;  %v6088_v62 = vld [vmem:[%s5728_s23 + $0x1a8] sm:$0xff]  }
  0x25   : > { %v6091_v63 = vld [vmem:[%s5728_s23 + $0x1b0] sm:$0xff]   ;;  %v6106_v2 = vld [vmem:[%s5728_s23 + $0x1b8] sm:$0xff]   ;;  %v6111_v4 = vld [vmem:[%s5728_s23 + $0x1c0] sm:$0xff]  }
  0x26   : > { %4701 = vmatmul.mubr.msk.bf16.gmra.mrb[8].mxu1 %vm635_vm2, %v5745_v14  ;;  %4831 = vmatmul.mubr.msk.bf16.gmra.mrb[8].mxu0 %vm635_vm2, %v5758_v16  ;;  %v6128_v8 = vld [vmem:[%s5728_s23 + $0x1c8] sm:$0xff]   ;;  %v6133_v10 = vld [vmem:[%s5728_s23 + $0x1d0] sm:$0xff]  }
  0x27   : > { %4704 = vmatprep.mubr.msk.bf16.mxu1 %vm635_vm2, %v5748_v15  ;;  %4834 = vmatprep.mubr.msk.bf16.mxu0 %vm635_vm2, %v5761_v17 }
  0x2e   : > { %4705 = vmatmul.mubr.msk.bf16.gmra.mrb[12].mxu1 %vm635_vm2, %v5758_v16  ;;  %4835 = vmatmul.mubr.msk.bf16.gmra.mrb[12].mxu0 %vm635_vm2, %v5772_v18 }
  0x2f   : > { %4708 = vmatprep.mubr.msk.bf16.mxu1 %vm635_vm2, %v5761_v17  ;;  %4838 = vmatprep.mubr.msk.bf16.mxu0 %vm635_vm2, %v5775_v19 }
  0x36   : > { %4709 = vmatmul.mubr.msk.bf16.gmra.mrb[16].mxu1 %vm635_vm2, %v5772_v18  ;;  %4839 = vmatmul.mubr.msk.bf16.gmra.mrb[16].mxu0 %vm635_vm2, %v5786_v20 }
  0x37   : > { %4712 = vmatprep.mubr.msk.bf16.mxu1 %vm635_vm2, %v5775_v19  ;;  %4842 = vmatprep.mubr.msk.bf16.mxu0 %vm635_vm2, %v5789_v21 }
  0x3e   : > { %4713 = vmatmul.mubr.msk.bf16.gmra.mrb[20].mxu1 %vm635_vm2, %v5786_v20  ;;  %4843 = vmatmul.mubr.msk.bf16.gmra.mrb[20].mxu0 %vm635_vm2, %v5800_v22 }
  0x3f   : > { %4716 = vmatprep.mubr.msk.bf16.mxu1 %vm635_vm2, %v5789_v21  ;;  %4846 = vmatprep.mubr.msk.bf16.mxu0 %vm635_vm2, %v5803_v23 }
  0x46   : > { %4717 = vmatmul.mubr.msk.bf16.gmra.mrb[24].mxu1 %vm635_vm2, %v5800_v22  ;;  %4847 = vmatmul.mubr.msk.bf16.gmra.mrb[24].mxu0 %vm635_vm2, %v5814_v24 }
  0x47   : > { %4720 = vmatprep.mubr.msk.bf16.mxu1 %vm635_vm2, %v5803_v23  ;;  %4850 = vmatprep.mubr.msk.bf16.mxu0 %vm635_vm2, %v5817_v25 }
  0x4e   : > { %4721 = vmatmul.mubr.msk.bf16.gmra.mrb[28].mxu1 %vm635_vm2, %v5814_v24  ;;  %4851 = vmatmul.mubr.msk.bf16.gmra.mrb[28].mxu0 %vm635_vm2, %v5828_v26 }
  0x4f   : > { %4724 = vmatprep.mubr.msk.bf16.mxu1 %vm635_vm2, %v5817_v25  ;;  %4854 = vmatprep.mubr.msk.bf16.mxu0 %vm635_vm2, %v5831_v27 }
  0x56   : > { %4725 = vmatmul.mubr.msk.bf16.gmra.mrb[32].mxu1 %vm635_vm2, %v5828_v26  ;;  %4855 = vmatmul.mubr.msk.bf16.gmra.mrb[32].mxu0 %vm635_vm2, %v5842_v28 }
  0x57   : > { %4728 = vmatprep.mubr.msk.bf16.mxu1 %vm635_vm2, %v5831_v27  ;;  %4858 = vmatprep.mubr.msk.bf16.mxu0 %vm635_vm2, %v5845_v29 }
  0x5e   : > { %4729 = vmatmul.mubr.msk.bf16.gmra.mrb[36].mxu1 %vm635_vm2, %v5842_v28  ;;  %4859 = vmatmul.mubr.msk.bf16.gmra.mrb[36].mxu0 %vm635_vm2, %v5856_v30 }
  0x5f   : > { %4732 = vmatprep.mubr.msk.bf16.mxu1 %vm635_vm2, %v5845_v29  ;;  %4862 = vmatprep.mubr.msk.bf16.mxu0 %vm635_vm2, %v5859_v31 }
  0x66   : > { %4733 = vmatmul.mubr.msk.bf16.gmra.mrb[40].mxu1 %vm635_vm2, %v5856_v30  ;;  %4863 = vmatmul.mubr.msk.bf16.gmra.mrb[40].mxu0 %vm635_vm2, %v5870_v32 }
  0x67   : > { %4736 = vmatprep.mubr.msk.bf16.mxu1 %vm635_vm2, %v5859_v31  ;;  %4866 = vmatprep.mubr.msk.bf16.mxu0 %vm635_vm2, %v5873_v33 }
  0x6e   : > { %4737 = vmatmul.mubr.msk.bf16.gmra.mrb[44].mxu1 %vm635_vm2, %v5870_v32  ;;  %4867 = vmatmul.mubr.msk.bf16.gmra.mrb[44].mxu0 %vm635_vm2, %v5884_v34 }
  0x6f   : > { %4740 = vmatprep.mubr.msk.bf16.mxu1 %vm635_vm2, %v5873_v33  ;;  %4870 = vmatprep.mubr.msk.bf16.mxu0 %vm635_vm2, %v5887_v35 }
  0x76   : > { %4741 = vmatmul.mubr.msk.bf16.gmra.mrb[48].mxu1 %vm635_vm2, %v5884_v34  ;;  %4871 = vmatmul.mubr.msk.bf16.gmra.mrb[48].mxu0 %vm635_vm2, %v5898_v36 }
  0x77   : > { %4744 = vmatprep.mubr.msk.bf16.mxu1 %vm635_vm2, %v5887_v35  ;;  %4874 = vmatprep.mubr.msk.bf16.mxu0 %vm635_vm2, %v5901_v37 }
  0x7e   : > { %4745 = vmatmul.mubr.msk.bf16.gmra.mrb[52].mxu1 %vm635_vm2, %v5898_v36  ;;  %4875 = vmatmul.mubr.msk.bf16.gmra.mrb[52].mxu0 %vm635_vm2, %v5912_v38 }
  0x7f   : > { %4748 = vmatprep.mubr.msk.bf16.mxu1 %vm635_vm2, %v5901_v37  ;;  %4878 = vmatprep.mubr.msk.bf16.mxu0 %vm635_vm2, %v5915_v39 }
  0x86   : > { %4749 = vmatmul.mubr.msk.bf16.gmra.mrb[56].mxu1 %vm635_vm2, %v5912_v38  ;;  %4879 = vmatmul.mubr.msk.bf16.gmra.mrb[56].mxu0 %vm635_vm2, %v5926_v40 }
  0x87   : > { %4752 = vmatprep.mubr.msk.bf16.mxu1 %vm635_vm2, %v5915_v39  ;;  %4882 = vmatprep.mubr.msk.bf16.mxu0 %vm635_vm2, %v5929_v41 }
  0x8e   : > { %4753 = vmatmul.mubr.msk.bf16.gmra.mrb[60].mxu1 %vm635_vm2, %v5926_v40  ;;  %4883 = vmatmul.mubr.msk.bf16.gmra.mrb[60].mxu0 %vm635_vm2, %v5940_v42 }
  0x8f   : > { %4756 = vmatprep.mubr.msk.bf16.mxu1 %vm635_vm2, %v5929_v41  ;;  %4952 = vmatprep.mubr.msk.bf16.mxu0 %vm635_vm2, %v5738_v13 }
  0x96   : > { %4757 = vmatmul.mubr.msk.bf16.gmra.mrb[64].mxu1 %vm635_vm2, %v5940_v42  ;;  %4953 = vmatmul.mubr.msk.bf16.vlgmr.msra.gmra.mrb[0].mxu0 %vm635_vm2, %v5745_v14  ;;  %v6150_v14 = vld [vmem:[%s5728_s23 + $0x1d8] sm:$0xff]  }
  0x97   : > { %4760 = vmatprep.mubr.msk.bf16.mxu1 %vm635_vm2, %v5951_v43  ;;  %4956 = vmatprep.mubr.msk.bf16.mxu0 %vm635_vm2, %v5748_v15 }
  0x9e   : > { %4761 = vmatmul.mubr.msk.bf16.gmra.mrb[68].mxu1 %vm635_vm2, %v5962_v44  ;;  %4957 = vmatmul.mubr.msk.bf16.gmra.mrb[4].mxu0 %vm635_vm2, %v5758_v16  ;;  %v6155_v16 = vld [vmem:[%s5728_s23 + $0x1e0] sm:$0xff]  }
  0x9f   : > { %4764 = vmatprep.mubr.msk.bf16.mxu1 %vm635_vm2, %v5965_v45  ;;  %4960 = vmatprep.mubr.msk.bf16.mxu0 %vm635_vm2, %v5761_v17 }
  0xa6   : > { %4765 = vmatmul.mubr.msk.bf16.gmra.mrb[72].mxu1 %vm635_vm2, %v5976_v46  ;;  %4961 = vmatmul.mubr.msk.bf16.gmra.mrb[8].mxu0 %vm635_vm2, %v5772_v18 }
  0xa7   : > { %4768 = vmatprep.mubr.msk.bf16.mxu1 %vm635_vm2, %v5979_v47  ;;  %4964 = vmatprep.mubr.msk.bf16.mxu0 %vm635_vm2, %v5775_v19 }
  0xae   : > { %4769 = vmatmul.mubr.msk.bf16.gmra.mrb[76].mxu1 %vm635_vm2, %v5990_v48  ;;  %4965 = vmatmul.mubr.msk.bf16.gmra.mrb[12].mxu0 %vm635_vm2, %v5786_v20  ;;  %v6172_v20 = vld [vmem:[%s5728_s23 + $0x1e8] sm:$0xff]  }
  0xaf   : > { %4772 = vmatprep.mubr.msk.bf16.mxu1 %vm635_vm2, %v5993_v49  ;;  %4968 = vmatprep.mubr.msk.bf16.mxu0 %vm635_vm2, %v5789_v21 }
  0xb6   : > { %4773 = vmatmul.mubr.msk.bf16.gmra.mrb[80].mxu1 %vm635_vm2, %v6004_v50  ;;  %4969 = vmatmul.mubr.msk.bf16.gmra.mrb[16].mxu0 %vm635_vm2, %v5800_v22  ;;  %v6177_v22 = vld [vmem:[%s5728_s23 + $0x1f0] sm:$0xff]  }
  0xb7   : > { %4776 = vmatprep.mubr.msk.bf16.mxu1 %vm635_vm2, %v6007_v51  ;;  %4972 = vmatprep.mubr.msk.bf16.mxu0 %vm635_vm2, %v5803_v23 }
  0xbe   : > { %4777 = vmatmul.mubr.msk.bf16.gmra.mrb[84].mxu1 %vm635_vm2, %v6018_v52  ;;  %4973 = vmatmul.mubr.msk.bf16.gmra.mrb[20].mxu0 %vm635_vm2, %v5814_v24 }
  0xbf   : > { %4780 = vmatprep.mubr.msk.bf16.mxu1 %vm635_vm2, %v6021_v53  ;;  %4976 = vmatprep.mubr.msk.bf16.mxu0 %vm635_vm2, %v5817_v25 }
  0xc6   : > { %4781 = vmatmul.mubr.msk.bf16.gmra.mrb[88].mxu1 %vm635_vm2, %v6032_v54  ;;  %4977 = vmatmul.mubr.msk.bf16.gmra.mrb[24].mxu0 %vm635_vm2, %v5828_v26  ;;  %v6194_v26 = vld [vmem:[%s5728_s23 + $0x1f8] sm:$0xff]  }
  0xc7   : > { %4784 = vmatprep.mubr.msk.bf16.mxu1 %vm635_vm2, %v6035_v55  ;;  %4980 = vmatprep.mubr.msk.bf16.mxu0 %vm635_vm2, %v5831_v27 }
  0xce   : > { %4785 = vmatmul.mubr.msk.bf16.gmra.mrb[92].mxu1 %vm635_vm2, %v6046_v56  ;;  %4981 = vmatmul.mubr.msk.bf16.gmra.mrb[28].mxu0 %vm635_vm2, %v5842_v28 }
  0xcf   : > { %4788 = vmatprep.mubr.msk.bf16.mxu1 %vm635_vm2, %v6049_v57  ;;  %4984 = vmatprep.mubr.msk.bf16.mxu0 %vm635_vm2, %v5845_v29 }
  0xd6   : > { %4789 = vmatmul.mubr.msk.bf16.gmra.mrb[96].mxu1 %vm635_vm2, %v6060_v58  ;;  %4985 = vmatmul.mubr.msk.bf16.gmra.mrb[32].mxu0 %vm635_vm2, %v5856_v30 }
  0xd7   : > { %4792 = vmatprep.mubr.msk.bf16.mxu1 %vm635_vm2, %v6063_v59  ;;  %4988 = vmatprep.mubr.msk.bf16.mxu0 %vm635_vm2, %v5859_v31 }
  0xde   : > { %4793 = vmatmul.mubr.msk.bf16.gmra.mrb[100].mxu1 %vm635_vm2, %v6074_v60  ;;  %4989 = vmatmul.mubr.msk.bf16.gmra.mrb[36].mxu0 %vm635_vm2, %v5870_v32 }
  0xdf   : > { %4796 = vmatprep.mubr.msk.bf16.mxu1 %vm635_vm2, %v6077_v61  ;;  %4992 = vmatprep.mubr.msk.bf16.mxu0 %vm635_vm2, %v5873_v33 }
  0xe6   : > { %4797 = vmatmul.mubr.msk.bf16.gmra.mrb[104].mxu1 %vm635_vm2, %v6088_v62  ;;  %4993 = vmatmul.mubr.msk.bf16.gmra.mrb[40].mxu0 %vm635_vm2, %v5884_v34 }
  0xe7   : > { %4800 = vmatprep.mubr.msk.bf16.mxu1 %vm635_vm2, %v6091_v63  ;;  %4996 = vmatprep.mubr.msk.bf16.mxu0 %vm635_vm2, %v5887_v35 }
  0xe9   : > { %v6101_v0 = vpop.f32.mrb[0].mxu1 }
  0xea   : > { %v6103_v1 = vpop.f32.mrb[1].mxu1 }
  0xeb   : > { %v6108_v3 = vpop.f32.mrb[2].mxu1 }
  0xec   : > { %v6113_v5 = vpop.f32.mrb[3].mxu1 }
  0xee   : > { %4801 = vmatmul.mubr.msk.bf16.gmra.mrb[108].mxu1 %vm635_vm2, %v6106_v2  ;;  %4997 = vmatmul.mubr.msk.bf16.gmra.mrb[44].mxu0 %vm635_vm2, %v5898_v36 }
  0xef   : > { %4804 = vmatprep.mubr.msk.bf16.mxu1 %vm635_vm2, %v6111_v4  ;;  %5000 = vmatprep.mubr.msk.bf16.mxu0 %vm635_vm2, %v5901_v37 }
  0xf1   : > { %v6123_v6 = vpop.f32.mrb[4].mxu1 }
  0xf2   : > { %v6125_v7 = vpop.f32.mrb[5].mxu1 }
  0xf3   : > { %v6130_v9 = vpop.f32.mrb[6].mxu1 }
  0xf4   : > { %v6135_v11 = vpop.f32.mrb[7].mxu1 }
  0xf6   : > { %4805 = vmatmul.mubr.msk.bf16.gmra.mrb[112].mxu1 %vm635_vm2, %v6128_v8  ;;  %5001 = vmatmul.mubr.msk.bf16.gmra.mrb[48].mxu0 %vm635_vm2, %v5912_v38 }
  0xf7   : > { %4808 = vmatprep.mubr.msk.bf16.mxu1 %vm635_vm2, %v6133_v10  ;;  %5004 = vmatprep.mubr.msk.bf16.mxu0 %vm635_vm2, %v5915_v39 }
  0xf9   : > { %v6145_v12 = vpop.f32.mrb[8].mxu1 }
  0xfa   : > { %v6147_v13 = vpop.f32.mrb[9].mxu1 }
  0xfb   : > { %v6152_v15 = vpop.f32.mrb[10].mxu1 }
  0xfc   : > { %v6157_v17 = vpop.f32.mrb[11].mxu1 }
  0xfe   : > { %4809 = vmatmul.mubr.msk.bf16.gmra.mrb[116].mxu1 %vm635_vm2, %v6150_v14  ;;  %5005 = vmatmul.mubr.msk.bf16.gmra.mrb[52].mxu0 %vm635_vm2, %v5926_v40 }
  0xff   : > { %4812 = vmatprep.mubr.msk.bf16.mxu1 %vm635_vm2, %v6155_v16  ;;  %5008 = vmatprep.mubr.msk.bf16.mxu0 %vm635_vm2, %v5929_v41 }
 0x101   : > { %v6167_v18 = vpop.f32.mrb[12].mxu1 }
 0x102   : > { %v6169_v19 = vpop.f32.mrb[13].mxu1 }
 0x103   : > { %v6174_v21 = vpop.f32.mrb[14].mxu1 }
 0x104   : > { %v6179_v23 = vpop.f32.mrb[15].mxu1 }
 0x106   : > { %4813 = vmatmul.mubr.msk.bf16.gmra.mrb[120].mxu1 %vm635_vm2, %v6172_v20  ;;  %5009 = vmatmul.mubr.msk.bf16.gmra.mrb[56].mxu0 %vm635_vm2, %v5940_v42 }
 0x107   : > { %4816 = vmatprep.mubr.msk.bf16.mxu1 %vm635_vm2, %v6177_v22  ;;  %5012 = vmatprep.mubr.msk.bf16.mxu0 %vm635_vm2, %v5951_v43 }
 0x109   : > { %v6189_v24 = vpop.f32.mrb[16].mxu1 }
 0x10a   : > { %v6191_v25 = vpop.f32.mrb[17].mxu1 }
 0x10b   : > { %v6196_v27 = vpop.f32.mrb[18].mxu1 }
 0x10c   : > { %v6198_v28 = vpop.f32.mrb[19].mxu1 }
 0x10e   : > { %4817 = vmatmul.mubr.msk.bf16.gmra.mrb[124].mxu1 %vm635_vm2, %v6194_v26  ;;  %5013 = vmatmul.mubr.msk.bf16.gmra.mrb[60].mxu0 %vm635_vm2, %v5962_v44 }
 0x10f   : > { %4886 = vmatprep.mubr.msk.bf16.mxu1 %vm635_vm2, %v5951_v43  ;;  %5016 = vmatprep.mubr.msk.bf16.mxu0 %vm635_vm2, %v5965_v45 }
 0x111   : > { %v6208_v29 = vpop.f32.mrb[20].mxu1 }
 0x112   : > { %v6210_v30 = vpop.f32.mrb[21].mxu1 }
 0x113   : > { %v6212_v31 = vpop.f32.mrb[22].mxu1 }
 0x114   : > { %v6214_v32 = vpop.f32.mrb[23].mxu1 }
 0x116   : > { %4887 = vmatmul.mubr.msk.bf16.vlgmr.msra.gmra.mrb[64].mxu1 %vm635_vm2, %v5962_v44  ;;  %5017 = vmatmul.mubr.msk.bf16.gmra.mrb[64].mxu0 %vm635_vm2, %v5976_v46 }
 0x117   : > { %4890 = vmatprep.mubr.msk.bf16.mxu1 %vm635_vm2, %v5965_v45  ;;  %5020 = vmatprep.mubr.msk.bf16.mxu0 %vm635_vm2, %v5979_v47 }
 0x119   : > { %v6224_v33 = vpop.f32.mrb[24].mxu1 }
 0x11a   : > { %v6226_v34 = vpop.f32.mrb[25].mxu1 }
 0x11b   : > { %v6228_v35 = vpop.f32.mrb[26].mxu1 }
 0x11c   : > { %v6230_v36 = vpop.f32.mrb[27].mxu1 }
 0x11e   : > { %4891 = vmatmul.mubr.msk.bf16.gmra.mrb[68].mxu1 %vm635_vm2, %v5976_v46  ;;  %5021 = vmatmul.mubr.msk.bf16.gmra.mrb[68].mxu0 %vm635_vm2, %v5990_v48 }
 0x11f   : > { %4894 = vmatprep.mubr.msk.bf16.mxu1 %vm635_vm2, %v5979_v47  ;;  %5024 = vmatprep.mubr.msk.bf16.mxu0 %vm635_vm2, %v5993_v49 }
 0x121   : > { %v6240_v37 = vpop.f32.mrb[28].mxu1 }
 0x122   : > { %v6242_v38 = vpop.f32.mrb[29].mxu1 }
 0x123   : > { %v6244_v39 = vpop.f32.mrb[30].mxu1 }
 0x124   : > { %v6246_v40 = vpop.f32.mrb[31].mxu1 }
 0x126   : > { %4895 = vmatmul.mubr.msk.bf16.gmra.mrb[72].mxu1 %vm635_vm2, %v5990_v48  ;;  %5025 = vmatmul.mubr.msk.bf16.gmra.mrb[72].mxu0 %vm635_vm2, %v6004_v50 }
 0x127   : > { %4898 = vmatprep.mubr.msk.bf16.mxu1 %vm635_vm2, %v5993_v49  ;;  %5028 = vmatprep.mubr.msk.bf16.mxu0 %vm635_vm2, %v6007_v51 }
 0x129   : > { %v6256_v41 = vpop.f32.mrb[32].mxu1 }
 0x12a   : > { %v6258_v42 = vpop.f32.mrb[33].mxu1 }
 0x12b   : > { %v6260_v43 = vpop.f32.mrb[34].mxu1 }
 0x12c   : > { %v6262_v44 = vpop.f32.mrb[35].mxu1 }
 0x12e   : > { %4899 = vmatmul.mubr.msk.bf16.gmra.mrb[76].mxu1 %vm635_vm2, %v6004_v50  ;;  %5029 = vmatmul.mubr.msk.bf16.gmra.mrb[76].mxu0 %vm635_vm2, %v6018_v52 }
 0x12f   : > { %4902 = vmatprep.mubr.msk.bf16.mxu1 %vm635_vm2, %v6007_v51  ;;  %5032 = vmatprep.mubr.msk.bf16.mxu0 %vm635_vm2, %v6021_v53 }
 0x131   : > { %v6272_v45 = vpop.f32.mrb[36].mxu1 }
 0x132   : > { %v6274_v46 = vpop.f32.mrb[37].mxu1 }
 0x133   : > { %v6276_v47 = vpop.f32.mrb[38].mxu1 }
 0x134   : > { %6553 = vst [vmem:[#allocation3_spill] sm:$0xff] %v6276_v47  ;;  %v6278_v48 = vpop.f32.mrb[39].mxu1 }
 0x136   : > { %4903 = vmatmul.mubr.msk.bf16.gmra.mrb[80].mxu1 %vm635_vm2, %v6018_v52  ;;  %5033 = vmatmul.mubr.msk.bf16.gmra.mrb[80].mxu0 %vm635_vm2, %v6032_v54 }
 0x137   : > { %4906 = vmatprep.mubr.msk.bf16.mxu1 %vm635_vm2, %v6021_v53  ;;  %5036 = vmatprep.mubr.msk.bf16.mxu0 %vm635_vm2, %v6035_v55 }
 0x139   : > { %v6288_v49 = vpop.f32.mrb[40].mxu1 }
 0x13a   : > { %v6290_v50 = vpop.f32.mrb[41].mxu1 }
 0x13b   : > { %6554 = vst [vmem:[#allocation4_spill] sm:$0xff] %v6290_v50  ;;  %v6292_v51 = vpop.f32.mrb[42].mxu1 }
 0x13c   : > { %6555 = vst [vmem:[#allocation5_spill] sm:$0xff] %v6292_v51  ;;  %v6294_v47 = vpop.f32.mrb[43].mxu1 }
 0x13e   : > { %4907 = vmatmul.mubr.msk.bf16.gmra.mrb[84].mxu1 %vm635_vm2, %v6032_v54  ;;  %5037 = vmatmul.mubr.msk.bf16.gmra.mrb[84].mxu0 %vm635_vm2, %v6046_v56 }
 0x13f   : > { %4910 = vmatprep.mubr.msk.bf16.mxu1 %vm635_vm2, %v6035_v55  ;;  %5040 = vmatprep.mubr.msk.bf16.mxu0 %vm635_vm2, %v6049_v57 }
 0x141   : > { %v6304_v52 = vpop.f32.mrb[44].mxu1 }
 0x142   : > { %v6306_v53 = vpop.f32.mrb[45].mxu1 }
 0x143   : > { %6556 = vst [vmem:[#allocation6_spill] sm:$0xff] %v6306_v53  ;;  %v6308_v50 = vpop.f32.mrb[46].mxu1 }
 0x144   : > { %6557 = vst [vmem:[#allocation7_spill] sm:$0xff] %v6308_v50  ;;  %v6310_v51 = vpop.f32.mrb[47].mxu1 }
 0x146   : > { %4911 = vmatmul.mubr.msk.bf16.gmra.mrb[88].mxu1 %vm635_vm2, %v6046_v56  ;;  %5041 = vmatmul.mubr.msk.bf16.gmra.mrb[88].mxu0 %vm635_vm2, %v6060_v58 }
 0x147   : > { %4914 = vmatprep.mubr.msk.bf16.mxu1 %vm635_vm2, %v6049_v57  ;;  %5044 = vmatprep.mubr.msk.bf16.mxu0 %vm635_vm2, %v6063_v59 }
 0x149   : > { %v6320_v54 = vpop.f32.mrb[48].mxu1 }
 0x14a   : > { %v6322_v55 = vpop.f32.mrb[49].mxu1 }
 0x14b   : > { %6558 = vst [vmem:[#allocation8_spill] sm:$0xff] %v6322_v55  ;;  %v6324_v53 = vpop.f32.mrb[50].mxu1 }
 0x14c   : > { %6559 = vst [vmem:[#allocation9_spill] sm:$0xff] %v6324_v53  ;;  %v6326_v50 = vpop.f32.mrb[51].mxu1 }
 0x14e   : > { %4915 = vmatmul.mubr.msk.bf16.gmra.mrb[92].mxu1 %vm635_vm2, %v6060_v58  ;;  %5045 = vmatmul.mubr.msk.bf16.gmra.mrb[92].mxu0 %vm635_vm2, %v6074_v60 }
 0x14f   : > { %4918 = vmatprep.mubr.msk.bf16.mxu1 %vm635_vm2, %v6063_v59  ;;  %5048 = vmatprep.mubr.msk.bf16.mxu0 %vm635_vm2, %v6077_v61 }
 0x151   : > { %v6336_v56 = vpop.f32.mrb[52].mxu1 }
 0x152   : > { %v6338_v57 = vpop.f32.mrb[53].mxu1 }
 0x153   : > { %6560 = vst [vmem:[#allocation10_spill] sm:$0xff] %v6338_v57  ;;  %v6340_v55 = vpop.f32.mrb[54].mxu1 }
 0x154   : > { %6561 = vst [vmem:[#allocation11_spill] sm:$0xff] %v6340_v55  ;;  %v6342_v53 = vpop.f32.mrb[55].mxu1 }
 0x156   : > { %4919 = vmatmul.mubr.msk.bf16.gmra.mrb[96].mxu1 %vm635_vm2, %v6074_v60  ;;  %5049 = vmatmul.mubr.msk.bf16.gmra.mrb[96].mxu0 %vm635_vm2, %v6088_v62 }
 0x157   : > { %4922 = vmatprep.mubr.msk.bf16.mxu1 %vm635_vm2, %v6077_v61  ;;  %5052 = vmatprep.mubr.msk.bf16.mxu0 %vm635_vm2, %v6091_v63 }
 0x159   : > { %v6352_v58 = vpop.f32.mrb[56].mxu1 }
 0x15a   : > { %v6354_v59 = vpop.f32.mrb[57].mxu1 }
 0x15b   : > { %6562 = vst [vmem:[#allocation12_spill] sm:$0xff] %v6354_v59  ;;  %v6356_v57 = vpop.f32.mrb[58].mxu1 }
 0x15c   : > { %6563 = vst [vmem:[#allocation13_spill] sm:$0xff] %v6356_v57  ;;  %v6358_v55 = vpop.f32.mrb[59].mxu1 }
 0x15d   : > { %6564 = vst [vmem:[#allocation14_spill] sm:$0xff] %v6358_v55 }
 0x15e   : > { %4923 = vmatmul.mubr.msk.bf16.gmra.mrb[100].mxu1 %vm635_vm2, %v6088_v62  ;;  %5053 = vmatmul.mubr.msk.bf16.gmra.mrb[100].mxu0 %vm635_vm2, %v6106_v2 }
 0x15f   : > { %4926 = vmatprep.mubr.msk.bf16.mxu1 %vm635_vm2, %v6091_v63  ;;  %5056 = vmatprep.mubr.msk.bf16.mxu0 %vm635_vm2, %v6111_v4 }
 0x161   : > { %v6368_v60 = vpop.f32.mrb[60].mxu1 }
 0x162   : > { %6565 = vst [vmem:[#allocation15_spill] sm:$0xff] %v6368_v60  ;;  %v6370_v61 = vpop.f32.mrb[61].mxu1 }
 0x163   : > { %6566 = vst [vmem:[#allocation16_spill] sm:$0xff] %v6370_v61  ;;  %v6372_v59 = vpop.f32.mrb[62].mxu1 }
 0x164   : > { %6567 = vst [vmem:[#allocation17_spill] sm:$0xff] %v6372_v59  ;;  %v6374_v57 = vpop.f32.mrb[63].mxu1 }
 0x165   : > { %6568 = vst [vmem:[#allocation18_spill] sm:$0xff] %v6374_v57 }
 0x166   : > { %4927 = vmatmul.mubr.msk.bf16.gmra.mrb[104].mxu1 %vm635_vm2, %v6106_v2  ;;  %5057 = vmatmul.mubr.msk.bf16.gmra.mrb[104].mxu0 %vm635_vm2, %v6128_v8 }
 0x167   : > { %4930 = vmatprep.mubr.msk.bf16.mxu1 %vm635_vm2, %v6111_v4  ;;  %5060 = vmatprep.mubr.msk.bf16.mxu0 %vm635_vm2, %v6133_v10 }
 0x169   : > { %v4954_v62 = vpop.f32.mrb[0].mxu0 }
 0x16a   : > { %v5084_v63 = vadd.f32 %v4954_v62, %v6101_v0  ;;  %v2653_v61 = vpop.f32.mrb[1].mxu0 }
 0x16b   : > { %v5087_v59 = vadd.f32 %v2653_v61, %v6103_v1  ;;  %v4955_v60 = vpop.f32.mrb[2].mxu0 }
 0x16c   : > { %3294 = vst [vmem:[#allocation2 + $0x10] sm:$0xff] %v5084_v63  ;;  %v5090_v57 = vadd.f32 %v4955_v60, %v6108_v3  ;;  %v2656_v2 = vpop.f32.mrb[3].mxu0  ;;  %v5671_v60 = vld [vmem:[%s5728_s23 + $0x200] sm:$0xff]  }
 0x16d   : > { %3292 = vst [vmem:[#allocation2] sm:$0xff] %v5087_v59  ;;  %v5093_v55 = vadd.f32 %v2656_v2, %v6113_v5 }
 0x16e   : > { %4931 = vmatmul.mubr.msk.bf16.gmra.mrb[108].mxu1 %vm635_vm2, %v6128_v8  ;;  %3295 = vst [vmem:[#allocation2 + $0x18] sm:$0xff] %v5090_v57  ;;  %5061 = vmatmul.mubr.msk.bf16.gmra.mrb[108].mxu0 %vm635_vm2, %v6150_v14 }
 0x16f   : > { %4934 = vmatprep.mubr.msk.bf16.mxu1 %vm635_vm2, %v6133_v10  ;;  %3293 = vst [vmem:[#allocation2 + $0x8] sm:$0xff] %v5093_v55  ;;  %5064 = vmatprep.mubr.msk.bf16.mxu0 %vm635_vm2, %v6155_v16 }
 0x171   : > { %v4958_v0 = vpop.f32.mrb[4].mxu0 }
 0x172   : > { %v5096_v1 = vadd.f32 %v4958_v0, %v6123_v6  ;;  %v2669_v3 = vpop.f32.mrb[5].mxu0 }
 0x173   : > { %v5099_v4 = vadd.f32 %v2669_v3, %v6125_v7  ;;  %v4959_v5 = vpop.f32.mrb[6].mxu0 }
 0x174   : > { %3298 = vst [vmem:[#allocation2 + $0x30] sm:$0xff] %v5096_v1  ;;  %v5102_v8 = vadd.f32 %v4959_v5, %v6130_v9  ;;  %v2672_v57 = vpop.f32.mrb[7].mxu0 }
 0x175   : > { %3296 = vst [vmem:[#allocation2 + $0x20] sm:$0xff] %v5099_v4  ;;  %v5105_v59 = vadd.f32 %v2672_v57, %v6135_v11  ;;  %v3422_v10 = vld [vmem:[#allocation2 + $0x10] ss:$2 sm:$0xff]  ;;  %v3550_v11 = vld [vmem:[#allocation2 + $0x11] ss:$2 sm:$0xff] }
 0x176   : > { %4935 = vmatmul.mubr.msk.bf16.gmra.mrb[112].mxu1 %vm635_vm2, %v6150_v14  ;;  %3299 = vst [vmem:[#allocation2 + $0x38] sm:$0xff] %v5102_v8  ;;  %5065 = vmatmul.mubr.msk.bf16.gmra.mrb[112].mxu0 %vm635_vm2, %v6172_v20  ;;  %v3420_v61 = vld [vmem:[#allocation2] ss:$2 sm:$0xff]  ;;  %v3548_v62 = vld [vmem:[#allocation2 + $0x1] ss:$2 sm:$0xff] }
 0x177   : > { %4938 = vmatprep.mubr.msk.bf16.mxu1 %vm635_vm2, %v6155_v16  ;;  %3297 = vst [vmem:[#allocation2 + $0x28] sm:$0xff] %v5105_v59  ;;  %5068 = vmatprep.mubr.msk.bf16.mxu0 %vm635_vm2, %v6177_v22 }
 0x179   : > { %v4962_v6 = vpop.f32.mrb[8].mxu0 }
 0x17a   : > { %v5108_v7 = vadd.f32 %v4962_v6, %v6145_v12  ;;  %v2685_v9 = vpop.f32.mrb[9].mxu0  ;;  %v3676_v12 = vmax.f32 %v3422_v10, %v3550_v11 }
 0x17b   : > { %v5111_v55 = vadd.f32 %v2685_v9, %v6147_v13  ;;  %v4963_v14 = vpop.f32.mrb[10].mxu0 }
 0x17c   : > { %3302 = vst [vmem:[#allocation2 + $0x50] sm:$0xff] %v5108_v7  ;;  %v5114_v63 = vadd.f32 %v4963_v14, %v6152_v15  ;;  %v2688_v16 = vpop.f32.mrb[11].mxu0  ;;  %v3675_v15 = vmax.f32 %v3420_v61, %v3548_v62 }
 0x17d   : > { %v3426_v2 = vld [vmem:[#allocation2 + $0x30] ss:$2 sm:$0xff]  ;;  %v3554_v0 = vld [vmem:[#allocation2 + $0x31] ss:$2 sm:$0xff]  ;;  %3300 = vst [vmem:[#allocation2 + $0x40] sm:$0xff] %v5111_v55  ;;  %v5117_v1 = vadd.f32 %v2688_v16, %v6157_v17 }
 0x17e   : > { %4939 = vmatmul.mubr.msk.bf16.gmra.mrb[116].mxu1 %vm635_vm2, %v6172_v20  ;;  %v3678_v3 = vmax.f32 %v3426_v2, %v3554_v0  ;;  %v3424_v4 = vld [vmem:[#allocation2 + $0x20] ss:$2 sm:$0xff]  ;;  %v3552_v13 = vld [vmem:[#allocation2 + $0x21] ss:$2 sm:$0xff]  ;;  %3303 = vst [vmem:[#allocation2 + $0x58] sm:$0xff] %v5114_v63  ;;  %5069 = vmatmul.mubr.msk.bf16.gmra.mrb[116].mxu0 %vm635_vm2, %v6194_v26  ;;  %v5673_v55 = vld [vmem:[%s5728_s23 + $0x210] sm:$0xff]  }
 0x17f   : > { %4942 = vmatprep.mubr.msk.bf16.mxu1 %vm635_vm2, %v6177_v22  ;;  %v6422_v17 = vld [vmem:[%s6551_s2] ss:$0 sm:$0xff]  ;;  %v3677_v20 = vmax.f32 %v3424_v4, %v3552_v13  ;;  %3301 = vst [vmem:[#allocation2 + $0x48] sm:$0xff] %v5117_v1  ;;  %5072 = vmatprep.mubr.msk.bf16.mxu0 %vm635_vm2, %v5671_v60  ;;  %v5672_v22 = vld [vmem:[%s5728_s23 + $0x208] sm:$0xff]  }
 0x180   : > { %v3740_v5 = vmax.f32 %v3676_v12, %v3678_v3 }
 0x181   : > { %v3739_v8 = vmax.f32 %v3675_v15, %v3677_v20  ;;  %v4966_v57 = vpop.f32.mrb[12].mxu0 }
 0x182   : > { %v3779_v59 = vadd.f32 %v6422_v17, %v3740_v5  ;;  %v5120_v6 = vadd.f32 %v4966_v57, %v6167_v18  ;;  %v2701_v7 = vpop.f32.mrb[13].mxu0 }
 0x183   : > { %v3778_v9 = vadd.f32 %v6422_v17, %v3739_v8  ;;  %v5123_v10 = vadd.f32 %v2701_v7, %v6169_v19  ;;  %v4967_v11 = vpop.f32.mrb[14].mxu0 }
 0x184   : > { %v3811_v14 = vmax.f32 %v3779_v59, 0.0  ;;  %3306 = vst [vmem:[#allocation2 + $0x70] sm:$0xff] %v5120_v6  ;;  %v5126_v61 = vadd.f32 %v4967_v11, %v6174_v21  ;;  %v2704_v62 = vpop.f32.mrb[15].mxu0 }
 0x185   : > { %v3810_v63 = vmax.f32 %v3778_v9, 0.0  ;;  %3304 = vst [vmem:[#allocation2 + $0x60] sm:$0xff] %v5123_v10  ;;  %v5129_v16 = vadd.f32 %v2704_v62, %v6179_v23  ;;  %v3430_v2 = vld [vmem:[#allocation2 + $0x50] ss:$2 sm:$0xff]  ;;  %v3558_v0 = vld [vmem:[#allocation2 + $0x51] ss:$2 sm:$0xff] }
 0x186   : > { %4943 = vmatmul.mubr.msk.bf16.gmra.mrb[120].mxu1 %vm635_vm2, %v6194_v26  ;;  %3307 = vst [vmem:[#allocation2 + $0x78] sm:$0xff] %v5126_v61  ;;  %5073 = vmatmul.mubr.msk.bf16.gmra.mrb[120].mxu0 %vm635_vm2, %v5672_v22  ;;  %v5674_v26 = vld [vmem:[%s5728_s23 + $0x218] sm:$0xff]   ;;  %v3428_v3 = vld [vmem:[#allocation2 + $0x40] ss:$2 sm:$0xff]  ;;  %v3556_v4 = vld [vmem:[#allocation2 + $0x41] ss:$2 sm:$0xff] }
 0x187   : > { %4946 = vmatprep.mubr.msk.bf16.mxu1 %vm635_vm2, %v5671_v60  ;;  %v4403_v18 = vpack.c.bf16 %v3811_v14, %v3810_v63  ;;  %3305 = vst [vmem:[#allocation2 + $0x68] sm:$0xff] %v5129_v16  ;;  %5076 = vmatprep.mubr.msk.bf16.mxu0 %vm635_vm2, %v5673_v55 }
 0x189   : > { %4404 = vst [vmem:[%s6439_s29] sm:$0xff] %v4403_v18   ;;  %v4970_v19 = vpop.f32.mrb[16].mxu0 }
 0x18a   : > { %v5132_v21 = vadd.f32 %v4970_v19, %v6189_v24  ;;  %v2717_v23 = vpop.f32.mrb[17].mxu0  ;;  %v3680_v24 = vmax.f32 %v3430_v2, %v3558_v0 }
 0x18b   : > { %v5135_v1 = vadd.f32 %v2717_v23, %v6191_v25  ;;  %v4971_v12 = vpop.f32.mrb[18].mxu0  ;;  %v3679_v25 = vmax.f32 %v3428_v3, %v3556_v4 }
 0x18c   : > { %3310 = vst [vmem:[#allocation2 + $0x90] sm:$0xff] %v5132_v21  ;;  %v5138_v60 = vadd.f32 %v4971_v12, %v6196_v27  ;;  %v2720_v13 = vpop.f32.mrb[19].mxu0 }
 0x18d   : > { %v3434_v15 = vld [vmem:[#allocation2 + $0x70] ss:$2 sm:$0xff]  ;;  %v3562_v20 = vld [vmem:[#allocation2 + $0x71] ss:$2 sm:$0xff]  ;;  %3308 = vst [vmem:[#allocation2 + $0x80] sm:$0xff] %v5135_v1  ;;  %v5141_v5 = vadd.f32 %v2720_v13, %v6198_v28 }
 0x18e   : > { %4947 = vmatmul.mubr.msk.bf16.gmra.mrb[124].mxu1 %vm635_vm2, %v5672_v22  ;;  %v3682_v8 = vmax.f32 %v3434_v15, %v3562_v20  ;;  %v3432_v57 = vld [vmem:[#allocation2 + $0x60] ss:$2 sm:$0xff]  ;;  %v3560_v59 = vld [vmem:[#allocation2 + $0x61] ss:$2 sm:$0xff]  ;;  %3311 = vst [vmem:[#allocation2 + $0x98] sm:$0xff] %v5138_v60  ;;  %5077 = vmatmul.mubr.msk.bf16.gmra.mrb[124].mxu0 %vm635_vm2, %v5674_v26 }
 0x18f   : > { %v3681_v6 = vmax.f32 %v3432_v57, %v3560_v59  ;;  %3309 = vst [vmem:[#allocation2 + $0x88] sm:$0xff] %v5141_v5 }
 0x190   : > { %v3742_v7 = vmax.f32 %v3680_v24, %v3682_v8 }
 0x191   : > { %v3741_v27 = vmax.f32 %v3679_v25, %v3681_v6  ;;  %v4974_v9 = vpop.f32.mrb[20].mxu0 }
 0x192   : > { %v3781_v10 = vadd.f32 %v6422_v17, %v3742_v7  ;;  %v5144_v28 = vadd.f32 %v4974_v9, %v6208_v29  ;;  %v2733_v11 = vpop.f32.mrb[21].mxu0 }
 0x193   : > { %v3780_v22 = vadd.f32 %v6422_v17, %v3741_v27  ;;  %v5147_v55 = vadd.f32 %v2733_v11, %v6210_v30  ;;  %v4975_v14 = vpop.f32.mrb[22].mxu0 }
 0x194   : > { %v3813_v61 = vmax.f32 %v3781_v10, 0.0  ;;  %3314 = vst [vmem:[#allocation2 + $0xb0] sm:$0xff] %v5144_v28  ;;  %v5150_v62 = vadd.f32 %v4975_v14, %v6212_v31  ;;  %v2736_v63 = vpop.f32.mrb[23].mxu0 }
 0x195   : > { %v3812_v16 = vmax.f32 %v3780_v22, 0.0  ;;  %3312 = vst [vmem:[#allocation2 + $0xa0] sm:$0xff] %v5147_v55  ;;  %v5153_v18 = vadd.f32 %v2736_v63, %v6214_v32  ;;  %v3438_v26 = vld [vmem:[#allocation2 + $0x90] ss:$2 sm:$0xff]  ;;  %v3566_v30 = vld [vmem:[#allocation2 + $0x91] ss:$2 sm:$0xff] }
 0x196   : > { %3315 = vst [vmem:[#allocation2 + $0xb8] sm:$0xff] %v5150_v62  ;;  %v3436_v1 = vld [vmem:[#allocation2 + $0x80] ss:$2 sm:$0xff]  ;;  %v3564_v31 = vld [vmem:[#allocation2 + $0x81] ss:$2 sm:$0xff]  ;;  %v3684_v13 = vmax.f32 %v3438_v26, %v3566_v30 }
 0x197   : > { %v4408_v19 = vpack.c.bf16 %v3813_v61, %v3812_v16  ;;  %3313 = vst [vmem:[#allocation2 + $0xa8] sm:$0xff] %v5153_v18  ;;  %v3683_v5 = vmax.f32 %v3436_v1, %v3564_v31 }
 0x199   : > { %4480 = vst [vmem:[%s6439_s29 + $0x8] sm:$0xff] %v4408_v19   ;;  %v4978_v29 = vpop.f32.mrb[24].mxu0 }
 0x19a   : > { %v5156_v21 = vadd.f32 %v4978_v29, %v6224_v33  ;;  %v2749_v23 = vpop.f32.mrb[25].mxu0 }
 0x19b   : > { %v5159_v2 = vadd.f32 %v2749_v23, %v6226_v34  ;;  %v4979_v0 = vpop.f32.mrb[26].mxu0 }
 0x19c   : > { %3318 = vst [vmem:[#allocation2 + $0xd0] sm:$0xff] %v5156_v21  ;;  %v5162_v12 = vadd.f32 %v4979_v0, %v6228_v35  ;;  %v2752_v3 = vpop.f32.mrb[27].mxu0 }
 0x19d   : > { %v3442_v32 = vld [vmem:[#allocation2 + $0xb0] ss:$2 sm:$0xff]  ;;  %v3570_v4 = vld [vmem:[#allocation2 + $0xb1] ss:$2 sm:$0xff]  ;;  %3316 = vst [vmem:[#allocation2 + $0xc0] sm:$0xff] %v5159_v2  ;;  %v5165_v60 = vadd.f32 %v2752_v3, %v6230_v36 }
 0x19e   : > { %v3686_v15 = vmax.f32 %v3442_v32, %v3570_v4  ;;  %v3440_v33 = vld [vmem:[#allocation2 + $0xa0] ss:$2 sm:$0xff]  ;;  %v3568_v20 = vld [vmem:[#allocation2 + $0xa1] ss:$2 sm:$0xff]  ;;  %3319 = vst [vmem:[#allocation2 + $0xd8] sm:$0xff] %v5162_v12 }
 0x19f   : > { %v3685_v24 = vmax.f32 %v3440_v33, %v3568_v20  ;;  %3317 = vst [vmem:[#allocation2 + $0xc8] sm:$0xff] %v5165_v60 }
 0x1a0   : > { %v3744_v34 = vmax.f32 %v3684_v13, %v3686_v15  ;;  %v6569_v13 = vld [vmem:[#allocation3_spill] sm:$0xff] }
 0x1a1   : > { %v3743_v8 = vmax.f32 %v3683_v5, %v3685_v24  ;;  %v4982_v57 = vpop.f32.mrb[28].mxu0 }
 0x1a2   : > { %v3783_v59 = vadd.f32 %v6422_v17, %v3744_v34  ;;  %v5168_v35 = vadd.f32 %v4982_v57, %v6240_v37  ;;  %v2765_v25 = vpop.f32.mrb[29].mxu0 }
 0x1a3   : > { %v3782_v6 = vadd.f32 %v6422_v17, %v3743_v8  ;;  %v5171_v36 = vadd.f32 %v2765_v25, %v6242_v38  ;;  %v4983_v7 = vpop.f32.mrb[30].mxu0 }
 0x1a4   : > { %v3815_v27 = vmax.f32 %v3783_v59, 0.0  ;;  %3322 = vst [vmem:[#allocation2 + $0xf0] sm:$0xff] %v5168_v35  ;;  %v5174_v9 = vadd.f32 %v4983_v7, %v6244_v39  ;;  %v2768_v10 = vpop.f32.mrb[31].mxu0  ;;  %v6570_v59 = vld [vmem:[#allocation4_spill] sm:$0xff]  ;;  %v6571_v7 = vld [vmem:[#allocation5_spill] sm:$0xff] }
 0x1a5   : > { %v3814_v28 = vmax.f32 %v3782_v6, 0.0  ;;  %3320 = vst [vmem:[#allocation2 + $0xe0] sm:$0xff] %v5171_v36  ;;  %v5177_v11 = vadd.f32 %v2768_v10, %v6246_v40  ;;  %v3446_v61 = vld [vmem:[#allocation2 + $0xd0] ss:$2 sm:$0xff]  ;;  %v3574_v38 = vld [vmem:[#allocation2 + $0xd1] ss:$2 sm:$0xff] }
 0x1a6   : > { %3323 = vst [vmem:[#allocation2 + $0xf8] sm:$0xff] %v5174_v9  ;;  %v3444_v16 = vld [vmem:[#allocation2 + $0xc0] ss:$2 sm:$0xff]  ;;  %v3572_v39 = vld [vmem:[#allocation2 + $0xc1] ss:$2 sm:$0xff]  ;;  %v3688_v23 = vmax.f32 %v3446_v61, %v3574_v38 }
 0x1a7   : > { %v4413_v22 = vpack.c.bf16 %v3815_v27, %v3814_v28  ;;  %3321 = vst [vmem:[#allocation2 + $0xe8] sm:$0xff] %v5177_v11  ;;  %v3687_v2 = vmax.f32 %v3444_v16, %v3572_v39 }
 0x1a9   : > { %4481 = vst [vmem:[%s6439_s29 + $0x10] sm:$0xff] %v4413_v22   ;;  %v4986_v37 = vpop.f32.mrb[32].mxu0 }
 0x1aa   : > { %v5180_v55 = vadd.f32 %v4986_v37, %v6256_v41  ;;  %v2781_v14 = vpop.f32.mrb[33].mxu0 }
 0x1ab   : > { %v5183_v62 = vadd.f32 %v2781_v14, %v6258_v42  ;;  %v4987_v63 = vpop.f32.mrb[34].mxu0 }
 0x1ac   : > { %3326 = vst [vmem:[#allocation2 + $0x110] sm:$0xff] %v5180_v55  ;;  %v5186_v18 = vadd.f32 %v4987_v63, %v6260_v43  ;;  %v2784_v19 = vpop.f32.mrb[35].mxu0 }
 0x1ad   : > { %v3450_v40 = vld [vmem:[#allocation2 + $0xf0] ss:$2 sm:$0xff]  ;;  %v3578_v29 = vld [vmem:[#allocation2 + $0xf1] ss:$2 sm:$0xff]  ;;  %3324 = vst [vmem:[#allocation2 + $0x100] sm:$0xff] %v5183_v62  ;;  %v5189_v21 = vadd.f32 %v2784_v19, %v6262_v44 }
 0x1ae   : > { %v3690_v26 = vmax.f32 %v3450_v40, %v3578_v29  ;;  %v3448_v41 = vld [vmem:[#allocation2 + $0xe0] ss:$2 sm:$0xff]  ;;  %v3576_v30 = vld [vmem:[#allocation2 + $0xe1] ss:$2 sm:$0xff]  ;;  %3327 = vst [vmem:[#allocation2 + $0x118] sm:$0xff] %v5186_v18 }
 0x1af   : > { %v3689_v0 = vmax.f32 %v3448_v41, %v3576_v30  ;;  %3325 = vst [vmem:[#allocation2 + $0x108] sm:$0xff] %v5189_v21  ;;  %v6573_v21 = vld [vmem:[#allocation7_spill] sm:$0xff] }
 0x1b0   : > { %v3746_v42 = vmax.f32 %v3688_v23, %v3690_v26 }
 0x1b1   : > { %v3745_v1 = vmax.f32 %v3687_v2, %v3689_v0  ;;  %v4990_v31 = vpop.f32.mrb[36].mxu0 }
 0x1b2   : > { %v3785_v12 = vadd.f32 %v6422_v17, %v3746_v42  ;;  %v5192_v43 = vadd.f32 %v4990_v31, %v6272_v45  ;;  %v2797_v3 = vpop.f32.mrb[37].mxu0 }
 0x1b3   : > { %v3784_v32 = vadd.f32 %v6422_v17, %v3745_v1  ;;  %v5195_v44 = vadd.f32 %v2797_v3, %v6274_v46  ;;  %v4991_v4 = vpop.f32.mrb[38].mxu0 }
 0x1b4   : > { %v3817_v60 = vmax.f32 %v3785_v12, 0.0  ;;  %3330 = vst [vmem:[#allocation2 + $0x130] sm:$0xff] %v5192_v43  ;;  %v5198_v15 = vadd.f32 %v4991_v4, %v6569_v13  ;;  %v2800_v33 = vpop.f32.mrb[39].mxu0  ;;  %v6574_v12 = vld [vmem:[#allocation8_spill] sm:$0xff]  ;;  %v6575_v4 = vld [vmem:[#allocation9_spill] sm:$0xff] }
 0x1b5   : > { %v3816_v20 = vmax.f32 %v3784_v32, 0.0  ;;  %3328 = vst [vmem:[#allocation2 + $0x120] sm:$0xff] %v5195_v44  ;;  %v5201_v5 = vadd.f32 %v2800_v33, %v6278_v48  ;;  %v3454_v57 = vld [vmem:[#allocation2 + $0x110] ss:$2 sm:$0xff]  ;;  %v3582_v46 = vld [vmem:[#allocation2 + $0x111] ss:$2 sm:$0xff] }
 0x1b6   : > { %3331 = vst [vmem:[#allocation2 + $0x138] sm:$0xff] %v5198_v15  ;;  %v3452_v6 = vld [vmem:[#allocation2 + $0x100] ss:$2 sm:$0xff]  ;;  %v3580_v36 = vld [vmem:[#allocation2 + $0x101] ss:$2 sm:$0xff]  ;;  %v3692_v11 = vmax.f32 %v3454_v57, %v3582_v46 }
 0x1b7   : > { %v4418_v24 = vpack.c.bf16 %v3817_v60, %v3816_v20  ;;  %3329 = vst [vmem:[#allocation2 + $0x128] sm:$0xff] %v5201_v5  ;;  %v3691_v55 = vmax.f32 %v3452_v6, %v3580_v36 }
 0x1b9   : > { %4482 = vst [vmem:[%s6439_s29 + $0x18] sm:$0xff] %v4418_v24   ;;  %v4994_v45 = vpop.f32.mrb[40].mxu0 }
 0x1ba   : > { %v5204_v34 = vadd.f32 %v4994_v45, %v6288_v49  ;;  %v2813_v8 = vpop.f32.mrb[41].mxu0 }
 0x1bb   : > { %v5207_v35 = vadd.f32 %v2813_v8, %v6570_v59  ;;  %v4995_v25 = vpop.f32.mrb[42].mxu0 }
 0x1bc   : > { %3334 = vst [vmem:[#allocation2 + $0x150] sm:$0xff] %v5204_v34  ;;  %v5210_v27 = vadd.f32 %v4995_v25, %v6571_v7  ;;  %v2816_v9 = vpop.f32.mrb[43].mxu0 }
 0x1bd   : > { %v3458_v48 = vld [vmem:[#allocation2 + $0x130] ss:$2 sm:$0xff]  ;;  %v3586_v10 = vld [vmem:[#allocation2 + $0x131] ss:$2 sm:$0xff]  ;;  %3332 = vst [vmem:[#allocation2 + $0x140] sm:$0xff] %v5207_v35  ;;  %v5213_v28 = vadd.f32 %v2816_v9, %v6294_v47  ;;  %v6577_v9 = vld [vmem:[#allocation11_spill] sm:$0xff] }
 0x1be   : > { %v3694_v22 = vmax.f32 %v3458_v48, %v3586_v10  ;;  %v3456_v49 = vld [vmem:[#allocation2 + $0x120] ss:$2 sm:$0xff]  ;;  %v3584_v37 = vld [vmem:[#allocation2 + $0x121] ss:$2 sm:$0xff]  ;;  %3335 = vst [vmem:[#allocation2 + $0x158] sm:$0xff] %v5210_v27  ;;  %v6572_v47 = vld [vmem:[#allocation6_spill] sm:$0xff] }
 0x1bf   : > { %v3693_v14 = vmax.f32 %v3456_v49, %v3584_v37  ;;  %3333 = vst [vmem:[#allocation2 + $0x148] sm:$0xff] %v5213_v28 }
 0x1c0   : > { %v3748_v61 = vmax.f32 %v3692_v11, %v3694_v22 }
 0x1c1   : > { %v3747_v38 = vmax.f32 %v3691_v55, %v3693_v14  ;;  %v4998_v62 = vpop.f32.mrb[44].mxu0 }
 0x1c2   : > { %v3787_v63 = vadd.f32 %v6422_v17, %v3748_v61  ;;  %v5216_v16 = vadd.f32 %v4998_v62, %v6304_v52  ;;  %v2829_v39 = vpop.f32.mrb[45].mxu0  ;;  %v6578_v61 = vld [vmem:[#allocation12_spill] sm:$0xff] }
 0x1c3   : > { %v3786_v18 = vadd.f32 %v6422_v17, %v3747_v38  ;;  %v5219_v19 = vadd.f32 %v2829_v39, %v6572_v47  ;;  %v4999_v40 = vpop.f32.mrb[46].mxu0  ;;  %v6579_v39 = vld [vmem:[#allocation13_spill] sm:$0xff] }
 0x1c4   : > { %v3819_v29 = vmax.f32 %v3787_v63, 0.0  ;;  %3338 = vst [vmem:[#allocation2 + $0x170] sm:$0xff] %v5216_v16  ;;  %v5222_v23 = vadd.f32 %v4999_v40, %v6573_v21  ;;  %v2832_v26 = vpop.f32.mrb[47].mxu0  ;;  %v6580_v40 = vld [vmem:[#allocation14_spill] sm:$0xff] }
 0x1c5   : > { %v3818_v41 = vmax.f32 %v3786_v18, 0.0  ;;  %3336 = vst [vmem:[#allocation2 + $0x160] sm:$0xff] %v5219_v19  ;;  %v5225_v30 = vadd.f32 %v2832_v26, %v6310_v51  ;;  %v3462_v1 = vld [vmem:[#allocation2 + $0x150] ss:$2 sm:$0xff]  ;;  %v3590_v31 = vld [vmem:[#allocation2 + $0x151] ss:$2 sm:$0xff] }
 0x1c6   : > { %3339 = vst [vmem:[#allocation2 + $0x178] sm:$0xff] %v5222_v23  ;;  %v3460_v32 = vld [vmem:[#allocation2 + $0x140] ss:$2 sm:$0xff]  ;;  %v3588_v44 = vld [vmem:[#allocation2 + $0x141] ss:$2 sm:$0xff]  ;;  %v3696_v20 = vmax.f32 %v3462_v1, %v3590_v31 }
 0x1c7   : > { %v4423_v2 = vpack.c.bf16 %v3819_v29, %v3818_v41  ;;  %3337 = vst [vmem:[#allocation2 + $0x168] sm:$0xff] %v5225_v30  ;;  %v3695_v45 = vmax.f32 %v3460_v32, %v3588_v44  ;;  %v6581_v1 = vld [vmem:[#allocation15_spill] sm:$0xff] }
 0x1c9   : > { %4483 = vst [vmem:[%s6439_s29 + $0x20] sm:$0xff] %v4423_v2   ;;  %v5002_v52 = vpop.f32.mrb[48].mxu0 }
 0x1ca   : > { %v5228_v0 = vadd.f32 %v5002_v52, %v6320_v54  ;;  %v2845_v42 = vpop.f32.mrb[49].mxu0 }
 0x1cb   : > { %v5231_v43 = vadd.f32 %v2845_v42, %v6574_v12  ;;  %v5003_v3 = vpop.f32.mrb[50].mxu0 }
 0x1cc   : > { %3342 = vst [vmem:[#allocation2 + $0x190] sm:$0xff] %v5228_v0  ;;  %v5234_v60 = vadd.f32 %v5003_v3, %v6575_v4  ;;  %v2848_v13 = vpop.f32.mrb[51].mxu0  ;;  %v6582_v3 = vld [vmem:[#allocation16_spill] sm:$0xff] }
 0x1cd   : > { %v3466_v51 = vld [vmem:[#allocation2 + $0x170] ss:$2 sm:$0xff]  ;;  %v3594_v15 = vld [vmem:[#allocation2 + $0x171] ss:$2 sm:$0xff]  ;;  %3340 = vst [vmem:[#allocation2 + $0x180] sm:$0xff] %v5231_v43  ;;  %v5237_v33 = vadd.f32 %v2848_v13, %v6326_v50 }
 0x1ce   : > { %v3698_v5 = vmax.f32 %v3466_v51, %v3594_v15  ;;  %v3464_v54 = vld [vmem:[#allocation2 + $0x160] ss:$2 sm:$0xff]  ;;  %v3592_v24 = vld [vmem:[#allocation2 + $0x161] ss:$2 sm:$0xff]  ;;  %3343 = vst [vmem:[#allocation2 + $0x198] sm:$0xff] %v5234_v60  ;;  %v6576_v50 = vld [vmem:[#allocation10_spill] sm:$0xff] }
 0x1cf   : > { %v3697_v34 = vmax.f32 %v3464_v54, %v3592_v24  ;;  %3341 = vst [vmem:[#allocation2 + $0x188] sm:$0xff] %v5237_v33  ;;  %v6583_v60 = vld [vmem:[#allocation17_spill] sm:$0xff]  ;;  %v6584_v33 = vld [vmem:[#allocation18_spill] sm:$0xff] }
 0x1d0   : > { %v3750_v8 = vmax.f32 %v3696_v20, %v3698_v5 }
 0x1d1   : > { %v3749_v57 = vmax.f32 %v3695_v45, %v3697_v34  ;;  %v5006_v46 = vpop.f32.mrb[52].mxu0 }
 0x1d2   : > { %v3789_v59 = vadd.f32 %v6422_v17, %v3750_v8  ;;  %v5240_v35 = vadd.f32 %v5006_v46, %v6336_v56  ;;  %v2861_v25 = vpop.f32.mrb[53].mxu0 }
 0x1d3   : > { %v3788_v6 = vadd.f32 %v6422_v17, %v3749_v57  ;;  %v5243_v36 = vadd.f32 %v2861_v25, %v6576_v50  ;;  %v5007_v7 = vpop.f32.mrb[54].mxu0 }
 0x1d4   : > { %v3821_v27 = vmax.f32 %v3789_v59, 0.0  ;;  %3346 = vst [vmem:[#allocation2 + $0x1b0] sm:$0xff] %v5240_v35  ;;  %v5246_v48 = vadd.f32 %v5007_v7, %v6577_v9  ;;  %v2864_v10 = vpop.f32.mrb[55].mxu0 }
 0x1d5   : > { %v3820_v28 = vmax.f32 %v3788_v6, 0.0  ;;  %3344 = vst [vmem:[#allocation2 + $0x1a0] sm:$0xff] %v5243_v36  ;;  %v5249_v11 = vadd.f32 %v2864_v10, %v6342_v53  ;;  %v3470_v55 = vld [vmem:[#allocation2 + $0x190] ss:$2 sm:$0xff]  ;;  %v3598_v14 = vld [vmem:[#allocation2 + $0x191] ss:$2 sm:$0xff] }
 0x1d6   : > { %3347 = vst [vmem:[#allocation2 + $0x1b8] sm:$0xff] %v5246_v48  ;;  %v3468_v63 = vld [vmem:[#allocation2 + $0x180] ss:$2 sm:$0xff]  ;;  %v3596_v16 = vld [vmem:[#allocation2 + $0x181] ss:$2 sm:$0xff]  ;;  %v3700_v21 = vmax.f32 %v3470_v55, %v3598_v14 }
 0x1d7   : > { %v4428_v22 = vpack.c.bf16 %v3821_v27, %v3820_v28  ;;  %3345 = vst [vmem:[#allocation2 + $0x1a8] sm:$0xff] %v5249_v11  ;;  %v3699_v41 = vmax.f32 %v3468_v63, %v3596_v16 }
 0x1d9   : > { %4484 = vst [vmem:[%s6439_s29 + $0x28] sm:$0xff] %v4428_v22   ;;  %v5010_v56 = vpop.f32.mrb[56].mxu0 }
 0x1da   : > { %v5252_v49 = vadd.f32 %v5010_v56, %v6352_v58  ;;  %v2877_v37 = vpop.f32.mrb[57].mxu0 }
 0x1db   : > { %v5255_v38 = vadd.f32 %v2877_v37, %v6578_v61  ;;  %v5011_v62 = vpop.f32.mrb[58].mxu0 }
 0x1dc   : > { %3350 = vst [vmem:[#allocation2 + $0x1d0] sm:$0xff] %v5252_v49  ;;  %v5258_v18 = vadd.f32 %v5011_v62, %v6579_v39  ;;  %v2880_v47 = vpop.f32.mrb[59].mxu0 }
 0x1dd   : > { %v3474_v53 = vld [vmem:[#allocation2 + $0x1b0] ss:$2 sm:$0xff]  ;;  %v3602_v19 = vld [vmem:[#allocation2 + $0x1b1] ss:$2 sm:$0xff]  ;;  %3348 = vst [vmem:[#allocation2 + $0x1c0] sm:$0xff] %v5255_v38  ;;  %v5261_v29 = vadd.f32 %v2880_v47, %v6580_v40 }
 0x1de   : > { %v3702_v23 = vmax.f32 %v3474_v53, %v3602_v19  ;;  %v3472_v58 = vld [vmem:[#allocation2 + $0x1a0] ss:$2 sm:$0xff]  ;;  %v3600_v26 = vld [vmem:[#allocation2 + $0x1a1] ss:$2 sm:$0xff]  ;;  %3351 = vst [vmem:[#allocation2 + $0x1d8] sm:$0xff] %v5258_v18 }
 0x1df   : > { %v3701_v30 = vmax.f32 %v3472_v58, %v3600_v26  ;;  %3349 = vst [vmem:[#allocation2 + $0x1c8] sm:$0xff] %v5261_v29 }
 0x1e0   : > { %v3752_v2 = vmax.f32 %v3700_v21, %v3702_v23 }
 0x1e1   : > { %v3751_v52 = vmax.f32 %v3699_v41, %v3701_v30  ;;  %v5014_v0 = vpop.f32.mrb[60].mxu0 }
 0x1e2   : > { %v3791_v42 = vadd.f32 %v6422_v17, %v3752_v2  ;;  %v5264_v31 = vadd.f32 %v5014_v0, %v6581_v1  ;;  %v2893_v12 = vpop.f32.mrb[61].mxu0 }
 0x1e3   : > { %v3790_v43 = vadd.f32 %v6422_v17, %v3751_v52  ;;  %v5267_v32 = vadd.f32 %v2893_v12, %v6582_v3  ;;  %v5015_v44 = vpop.f32.mrb[62].mxu0 }
 0x1e4   : > { %v3823_v4 = vmax.f32 %v3791_v42, 0.0  ;;  %3354 = vst [vmem:[#allocation2 + $0x1f0] sm:$0xff] %v5264_v31  ;;  %v5270_v13 = vadd.f32 %v5015_v44, %v6583_v60  ;;  %v2896_v51 = vpop.f32.mrb[63].mxu0 }
 0x1e5   : > { %v3822_v15 = vmax.f32 %v3790_v43, 0.0  ;;  %3352 = vst [vmem:[#allocation2 + $0x1e0] sm:$0xff] %v5267_v32  ;;  %v5273_v20 = vadd.f32 %v2896_v51, %v6584_v33  ;;  %v3478_v46 = vld [vmem:[#allocation2 + $0x1d0] ss:$2 sm:$0xff]  ;;  %v3606_v59 = vld [vmem:[#allocation2 + $0x1d1] ss:$2 sm:$0xff] }
 0x1e6   : > { %3355 = vst [vmem:[#allocation2 + $0x1f8] sm:$0xff] %v5270_v13  ;;  %v3476_v50 = vld [vmem:[#allocation2 + $0x1c0] ss:$2 sm:$0xff]  ;;  %v3604_v36 = vld [vmem:[#allocation2 + $0x1c1] ss:$2 sm:$0xff]  ;;  %v3704_v28 = vmax.f32 %v3478_v46, %v3606_v59 }
 0x1e7   : > { %v4433_v5 = vpack.c.bf16 %v3823_v4, %v3822_v15  ;;  %3353 = vst [vmem:[#allocation2 + $0x1e8] sm:$0xff] %v5273_v20  ;;  %v3703_v49 = vmax.f32 %v3476_v50, %v3604_v36 }
 0x1e9   : > { %v4888_v54 = vpop.f32.mrb[64].mxu1  ;;  %4485 = vst [vmem:[%s6439_s29 + $0x30] sm:$0xff] %v4433_v5   ;;  %v5018_v45 = vpop.f32.mrb[64].mxu0 }
 0x1ea   : > { %v1953_v24 = vpop.f32.mrb[65].mxu1  ;;  %v5276_v8 = vadd.f32 %v5018_v45, %v4888_v54  ;;  %v2909_v57 = vpop.f32.mrb[65].mxu0 }
 0x1eb   : > { %v4889_v34 = vpop.f32.mrb[66].mxu1  ;;  %v5279_v25 = vadd.f32 %v2909_v57, %v1953_v24  ;;  %v5019_v6 = vpop.f32.mrb[66].mxu0 }
 0x1ec   : > { %v1956_v35 = vpop.f32.mrb[67].mxu1  ;;  %3358 = vst [vmem:[#allocation2 + $0x210] sm:$0xff] %v5276_v8  ;;  %v5282_v7 = vadd.f32 %v5019_v6, %v4889_v34  ;;  %v2912_v27 = vpop.f32.mrb[67].mxu0 }
 0x1ed   : > { %v3482_v9 = vld [vmem:[#allocation2 + $0x1f0] ss:$2 sm:$0xff]  ;;  %v3610_v48 = vld [vmem:[#allocation2 + $0x1f1] ss:$2 sm:$0xff]  ;;  %3356 = vst [vmem:[#allocation2 + $0x200] sm:$0xff] %v5279_v25  ;;  %v5285_v10 = vadd.f32 %v2912_v27, %v1956_v35 }
 0x1ee   : > { %v3706_v11 = vmax.f32 %v3482_v9, %v3610_v48  ;;  %v3480_v22 = vld [vmem:[#allocation2 + $0x1e0] ss:$2 sm:$0xff]  ;;  %v3608_v56 = vld [vmem:[#allocation2 + $0x1e1] ss:$2 sm:$0xff]  ;;  %3359 = vst [vmem:[#allocation2 + $0x218] sm:$0xff] %v5282_v7 }
 0x1ef   : > { %v3705_v37 = vmax.f32 %v3480_v22, %v3608_v56  ;;  %3357 = vst [vmem:[#allocation2 + $0x208] sm:$0xff] %v5285_v10 }
 0x1f0   : > { %v3754_v55 = vmax.f32 %v3704_v28, %v3706_v11 }
 0x1f1   : > { %v4892_v14 = vpop.f32.mrb[68].mxu1  ;;  %v3753_v61 = vmax.f32 %v3703_v49, %v3705_v37  ;;  %v5022_v62 = vpop.f32.mrb[68].mxu0 }
 0x1f2   : > { %v1969_v38 = vpop.f32.mrb[69].mxu1  ;;  %v3793_v63 = vadd.f32 %v6422_v17, %v3754_v55  ;;  %v5288_v39 = vadd.f32 %v5022_v62, %v4892_v14  ;;  %v2925_v18 = vpop.f32.mrb[69].mxu0 }
 0x1f3   : > { %v4893_v16 = vpop.f32.mrb[70].mxu1  ;;  %v3792_v47 = vadd.f32 %v6422_v17, %v3753_v61  ;;  %v5291_v19 = vadd.f32 %v2925_v18, %v1969_v38  ;;  %v5023_v40 = vpop.f32.mrb[70].mxu0 }
 0x1f4   : > { %v1972_v53 = vpop.f32.mrb[71].mxu1  ;;  %v3825_v29 = vmax.f32 %v3793_v63, 0.0  ;;  %3362 = vst [vmem:[#allocation2 + $0x230] sm:$0xff] %v5288_v39  ;;  %v5294_v21 = vadd.f32 %v5023_v40, %v4893_v16  ;;  %v2928_v23 = vpop.f32.mrb[71].mxu0 }
 0x1f5   : > { %v3824_v58 = vmax.f32 %v3792_v47, 0.0  ;;  %3360 = vst [vmem:[#allocation2 + $0x220] sm:$0xff] %v5291_v19  ;;  %v5297_v26 = vadd.f32 %v2928_v23, %v1972_v53  ;;  %v3486_v31 = vld [vmem:[#allocation2 + $0x210] ss:$2 sm:$0xff]  ;;  %v3614_v12 = vld [vmem:[#allocation2 + $0x211] ss:$2 sm:$0xff] }
 0x1f6   : > { %3363 = vst [vmem:[#allocation2 + $0x238] sm:$0xff] %v5294_v21  ;;  %v3484_v44 = vld [vmem:[#allocation2 + $0x200] ss:$2 sm:$0xff]  ;;  %v3612_v4 = vld [vmem:[#allocation2 + $0x201] ss:$2 sm:$0xff]  ;;  %v3708_v20 = vmax.f32 %v3486_v31, %v3614_v12 }
 0x1f7   : > { %v4438_v41 = vpack.c.bf16 %v3825_v29, %v3824_v58  ;;  %3361 = vst [vmem:[#allocation2 + $0x228] sm:$0xff] %v5297_v26  ;;  %v3707_v45 = vmax.f32 %v3484_v44, %v3612_v4 }
 0x1f9   : > { %v4896_v30 = vpop.f32.mrb[72].mxu1  ;;  %4486 = vst [vmem:[%s6439_s29 + $0x38] sm:$0xff] %v4438_v41   ;;  %v5026_v52 = vpop.f32.mrb[72].mxu0 }
 0x1fa   : > { %v1985_v2 = vpop.f32.mrb[73].mxu1  ;;  %v5300_v42 = vadd.f32 %v5026_v52, %v4896_v30  ;;  %v2941_v1 = vpop.f32.mrb[73].mxu0 }
 0x1fb   : > { %v4897_v0 = vpop.f32.mrb[74].mxu1  ;;  %v5303_v3 = vadd.f32 %v2941_v1, %v1985_v2  ;;  %v5027_v32 = vpop.f32.mrb[74].mxu0 }
 0x1fc   : > { %v1988_v43 = vpop.f32.mrb[75].mxu1  ;;  %3366 = vst [vmem:[#allocation2 + $0x250] sm:$0xff] %v5300_v42  ;;  %v5306_v60 = vadd.f32 %v5027_v32, %v4897_v0  ;;  %v2944_v13 = vpop.f32.mrb[75].mxu0 }
 0x1fd   : > { %v3490_v51 = vld [vmem:[#allocation2 + $0x230] ss:$2 sm:$0xff]  ;;  %v3618_v15 = vld [vmem:[#allocation2 + $0x231] ss:$2 sm:$0xff]  ;;  %3364 = vst [vmem:[#allocation2 + $0x240] sm:$0xff] %v5303_v3  ;;  %v5309_v33 = vadd.f32 %v2944_v13, %v1988_v43 }
 0x1fe   : > { %v3710_v5 = vmax.f32 %v3490_v51, %v3618_v15  ;;  %v3488_v54 = vld [vmem:[#allocation2 + $0x220] ss:$2 sm:$0xff]  ;;  %v3616_v24 = vld [vmem:[#allocation2 + $0x221] ss:$2 sm:$0xff]  ;;  %3367 = vst [vmem:[#allocation2 + $0x258] sm:$0xff] %v5306_v60 }
 0x1ff   : > { %v3709_v34 = vmax.f32 %v3488_v54, %v3616_v24  ;;  %3365 = vst [vmem:[#allocation2 + $0x248] sm:$0xff] %v5309_v33 }
 0x200   : > { %v3756_v8 = vmax.f32 %v3708_v20, %v3710_v5 }
 0x201   : > { %v4900_v57 = vpop.f32.mrb[76].mxu1  ;;  %v3755_v46 = vmax.f32 %v3707_v45, %v3709_v34  ;;  %v5030_v35 = vpop.f32.mrb[76].mxu0 }
 0x202   : > { %v2001_v59 = vpop.f32.mrb[77].mxu1  ;;  %v3795_v25 = vadd.f32 %v6422_v17, %v3756_v8  ;;  %v5312_v50 = vadd.f32 %v5030_v35, %v4900_v57  ;;  %v2957_v36 = vpop.f32.mrb[77].mxu0 }
 0x203   : > { %v4901_v6 = vpop.f32.mrb[78].mxu1  ;;  %v3794_v7 = vadd.f32 %v6422_v17, %v3755_v46  ;;  %v5315_v9 = vadd.f32 %v2957_v36, %v2001_v59  ;;  %v5031_v48 = vpop.f32.mrb[78].mxu0 }
 0x204   : > { %v2004_v27 = vpop.f32.mrb[79].mxu1  ;;  %v3827_v10 = vmax.f32 %v3795_v25, 0.0  ;;  %3370 = vst [vmem:[#allocation2 + $0x270] sm:$0xff] %v5312_v50  ;;  %v5318_v28 = vadd.f32 %v5031_v48, %v4901_v6  ;;  %v2960_v11 = vpop.f32.mrb[79].mxu0 }
 0x205   : > { %v3826_v22 = vmax.f32 %v3794_v7, 0.0  ;;  %3368 = vst [vmem:[#allocation2 + $0x260] sm:$0xff] %v5315_v9  ;;  %v5321_v56 = vadd.f32 %v2960_v11, %v2004_v27  ;;  %v3494_v63 = vld [vmem:[#allocation2 + $0x250] ss:$2 sm:$0xff]  ;;  %v3622_v16 = vld [vmem:[#allocation2 + $0x251] ss:$2 sm:$0xff] }
 0x206   : > { %3371 = vst [vmem:[#allocation2 + $0x278] sm:$0xff] %v5318_v28  ;;  %v3492_v53 = vld [vmem:[#allocation2 + $0x240] ss:$2 sm:$0xff]  ;;  %v3620_v19 = vld [vmem:[#allocation2 + $0x241] ss:$2 sm:$0xff]  ;;  %v3712_v26 = vmax.f32 %v3494_v63, %v3622_v16 }
 0x207   : > { %v4443_v49 = vpack.c.bf16 %v3827_v10, %v3826_v22  ;;  %3369 = vst [vmem:[#allocation2 + $0x268] sm:$0xff] %v5321_v56  ;;  %v3711_v52 = vmax.f32 %v3492_v53, %v3620_v19 }
 0x209   : > { %v4904_v37 = vpop.f32.mrb[80].mxu1  ;;  %4487 = vst [vmem:[%s6439_s29 + $0x40] sm:$0xff] %v4443_v49   ;;  %v5034_v14 = vpop.f32.mrb[80].mxu0 }
 0x20a   : > { %v2017_v55 = vpop.f32.mrb[81].mxu1  ;;  %v5324_v38 = vadd.f32 %v5034_v14, %v4904_v37  ;;  %v2973_v62 = vpop.f32.mrb[81].mxu0 }
 0x20b   : > { %v4905_v61 = vpop.f32.mrb[82].mxu1  ;;  %v5327_v18 = vadd.f32 %v2973_v62, %v2017_v55  ;;  %v5035_v47 = vpop.f32.mrb[82].mxu0 }
 0x20c   : > { %v2020_v39 = vpop.f32.mrb[83].mxu1  ;;  %3374 = vst [vmem:[#allocation2 + $0x290] sm:$0xff] %v5324_v38  ;;  %v5330_v40 = vadd.f32 %v5035_v47, %v4905_v61  ;;  %v2976_v29 = vpop.f32.mrb[83].mxu0 }
 0x20d   : > { %v3498_v21 = vld [vmem:[#allocation2 + $0x270] ss:$2 sm:$0xff]  ;;  %v3626_v23 = vld [vmem:[#allocation2 + $0x271] ss:$2 sm:$0xff]  ;;  %3372 = vst [vmem:[#allocation2 + $0x280] sm:$0xff] %v5327_v18  ;;  %v5333_v58 = vadd.f32 %v2976_v29, %v2020_v39 }
 0x20e   : > { %v3714_v41 = vmax.f32 %v3498_v21, %v3626_v23  ;;  %v3496_v30 = vld [vmem:[#allocation2 + $0x260] ss:$2 sm:$0xff]  ;;  %v3624_v2 = vld [vmem:[#allocation2 + $0x261] ss:$2 sm:$0xff]  ;;  %3375 = vst [vmem:[#allocation2 + $0x298] sm:$0xff] %v5330_v40 }
 0x20f   : > { %v3713_v0 = vmax.f32 %v3496_v30, %v3624_v2  ;;  %3373 = vst [vmem:[#allocation2 + $0x288] sm:$0xff] %v5333_v58 }
 0x210   : > { %v3758_v42 = vmax.f32 %v3712_v26, %v3714_v41 }
 0x211   : > { %v4908_v1 = vpop.f32.mrb[84].mxu1  ;;  %v3757_v31 = vmax.f32 %v3711_v52, %v3713_v0  ;;  %v5038_v43 = vpop.f32.mrb[84].mxu0 }
 0x212   : > { %v2033_v12 = vpop.f32.mrb[85].mxu1  ;;  %v3797_v3 = vadd.f32 %v6422_v17, %v3758_v42  ;;  %v5336_v44 = vadd.f32 %v5038_v43, %v4908_v1  ;;  %v2989_v4 = vpop.f32.mrb[85].mxu0 }
 0x213   : > { %v4909_v32 = vpop.f32.mrb[86].mxu1  ;;  %v3796_v60 = vadd.f32 %v6422_v17, %v3757_v31  ;;  %v5339_v51 = vadd.f32 %v2989_v4, %v2033_v12  ;;  %v5039_v15 = vpop.f32.mrb[86].mxu0 }
 0x214   : > { %v2036_v13 = vpop.f32.mrb[87].mxu1  ;;  %v3829_v33 = vmax.f32 %v3797_v3, 0.0  ;;  %3378 = vst [vmem:[#allocation2 + $0x2b0] sm:$0xff] %v5336_v44  ;;  %v5342_v20 = vadd.f32 %v5039_v15, %v4909_v32  ;;  %v2992_v5 = vpop.f32.mrb[87].mxu0 }
 0x215   : > { %v3828_v54 = vmax.f32 %v3796_v60, 0.0  ;;  %3376 = vst [vmem:[#allocation2 + $0x2a0] sm:$0xff] %v5339_v51  ;;  %v5345_v24 = vadd.f32 %v2992_v5, %v2036_v13  ;;  %v3502_v25 = vld [vmem:[#allocation2 + $0x290] ss:$2 sm:$0xff]  ;;  %v3630_v6 = vld [vmem:[#allocation2 + $0x291] ss:$2 sm:$0xff] }
 0x216   : > { %3379 = vst [vmem:[#allocation2 + $0x2b8] sm:$0xff] %v5342_v20  ;;  %v3500_v27 = vld [vmem:[#allocation2 + $0x280] ss:$2 sm:$0xff]  ;;  %v3628_v9 = vld [vmem:[#allocation2 + $0x281] ss:$2 sm:$0xff]  ;;  %v3716_v56 = vmax.f32 %v3502_v25, %v3630_v6 }
 0x217   : > { %v4448_v45 = vpack.c.bf16 %v3829_v33, %v3828_v54  ;;  %3377 = vst [vmem:[#allocation2 + $0x2a8] sm:$0xff] %v5345_v24  ;;  %v3715_v14 = vmax.f32 %v3500_v27, %v3628_v9 }
 0x219   : > { %v4912_v34 = vpop.f32.mrb[88].mxu1  ;;  %4488 = vst [vmem:[%s6439_s29 + $0x48] sm:$0xff] %v4448_v45   ;;  %v5042_v57 = vpop.f32.mrb[88].mxu0 }
 0x21a   : > { %v2049_v8 = vpop.f32.mrb[89].mxu1  ;;  %v5348_v59 = vadd.f32 %v5042_v57, %v4912_v34  ;;  %v3005_v35 = vpop.f32.mrb[89].mxu0 }
 0x21b   : > { %v4913_v46 = vpop.f32.mrb[90].mxu1  ;;  %v5351_v36 = vadd.f32 %v3005_v35, %v2049_v8  ;;  %v5043_v7 = vpop.f32.mrb[90].mxu0 }
 0x21c   : > { %v2052_v50 = vpop.f32.mrb[91].mxu1  ;;  %3382 = vst [vmem:[#allocation2 + $0x2d0] sm:$0xff] %v5348_v59  ;;  %v5354_v48 = vadd.f32 %v5043_v7, %v4913_v46  ;;  %v3008_v10 = vpop.f32.mrb[91].mxu0 }
 0x21d   : > { %v3506_v28 = vld [vmem:[#allocation2 + $0x2b0] ss:$2 sm:$0xff]  ;;  %v3634_v11 = vld [vmem:[#allocation2 + $0x2b1] ss:$2 sm:$0xff]  ;;  %3380 = vst [vmem:[#allocation2 + $0x2c0] sm:$0xff] %v5351_v36  ;;  %v5357_v22 = vadd.f32 %v3008_v10, %v2052_v50 }
 0x21e   : > { %v3718_v49 = vmax.f32 %v3506_v28, %v3634_v11  ;;  %v3504_v37 = vld [vmem:[#allocation2 + $0x2a0] ss:$2 sm:$0xff]  ;;  %v3632_v55 = vld [vmem:[#allocation2 + $0x2a1] ss:$2 sm:$0xff]  ;;  %3383 = vst [vmem:[#allocation2 + $0x2d8] sm:$0xff] %v5354_v48 }
 0x21f   : > { %v3717_v61 = vmax.f32 %v3504_v37, %v3632_v55  ;;  %3381 = vst [vmem:[#allocation2 + $0x2c8] sm:$0xff] %v5357_v22  ;;  %v6529_v50 = vld [vmem:[%s6551_s2] ss:$0 sm:$0xff] }
 0x220   : > { %v3760_v38 = vmax.f32 %v3716_v56, %v3718_v49 }
 0x221   : > { %v4916_v62 = vpop.f32.mrb[92].mxu1  ;;  %v3759_v63 = vmax.f32 %v3715_v14, %v3717_v61  ;;  %v5046_v39 = vpop.f32.mrb[92].mxu0 }
 0x222   : > { %v2065_v16 = vpop.f32.mrb[93].mxu1  ;;  %v3799_v18 = vadd.f32 %v6422_v17, %v3760_v38  ;;  %v5360_v53 = vadd.f32 %v5046_v39, %v4916_v62  ;;  %v3021_v19 = vpop.f32.mrb[93].mxu0 }
 0x223   : > { %v4917_v47 = vpop.f32.mrb[94].mxu1  ;;  %v3798_v40 = vadd.f32 %v6422_v17, %v3759_v63  ;;  %v5363_v21 = vadd.f32 %v3021_v19, %v2065_v16  ;;  %v5047_v23 = vpop.f32.mrb[94].mxu0 }
 0x224   : > { %v2068_v29 = vpop.f32.mrb[95].mxu1  ;;  %v3831_v58 = vmax.f32 %v3799_v18, 0.0  ;;  %3386 = vst [vmem:[#allocation2 + $0x2f0] sm:$0xff] %v5360_v53  ;;  %v5366_v26 = vadd.f32 %v5047_v23, %v4917_v47  ;;  %v3024_v41 = vpop.f32.mrb[95].mxu0 }
 0x225   : > { %v3830_v30 = vmax.f32 %v3798_v40, 0.0  ;;  %3384 = vst [vmem:[#allocation2 + $0x2e0] sm:$0xff] %v5363_v21  ;;  %v5369_v2 = vadd.f32 %v3024_v41, %v2068_v29  ;;  %v3510_v43 = vld [vmem:[#allocation2 + $0x2d0] ss:$2 sm:$0xff]  ;;  %v3638_v3 = vld [vmem:[#allocation2 + $0x2d1] ss:$2 sm:$0xff] }
 0x226   : > { %3387 = vst [vmem:[#allocation2 + $0x2f8] sm:$0xff] %v5366_v26  ;;  %v3508_v60 = vld [vmem:[#allocation2 + $0x2c0] ss:$2 sm:$0xff]  ;;  %v3636_v13 = vld [vmem:[#allocation2 + $0x2c1] ss:$2 sm:$0xff]  ;;  %v3720_v54 = vmax.f32 %v3510_v43, %v3638_v3 }
 0x227   : > { %v4453_v52 = vpack.c.bf16 %v3831_v58, %v3830_v30  ;;  %3385 = vst [vmem:[#allocation2 + $0x2e8] sm:$0xff] %v5369_v2  ;;  %v3719_v8 = vmax.f32 %v3508_v60, %v3636_v13 }
 0x229   : > { %v4920_v0 = vpop.f32.mrb[96].mxu1  ;;  %4489 = vst [vmem:[%s6439_s29 + $0x50] sm:$0xff] %v4453_v52   ;;  %v5050_v1 = vpop.f32.mrb[96].mxu0 }
 0x22a   : > { %v2081_v42 = vpop.f32.mrb[97].mxu1  ;;  %v5372_v12 = vadd.f32 %v5050_v1, %v4920_v0  ;;  %v3037_v17 = vpop.f32.mrb[97].mxu0 }
 0x22b   : > { %v4921_v31 = vpop.f32.mrb[98].mxu1  ;;  %v5375_v44 = vadd.f32 %v3037_v17, %v2081_v42  ;;  %v5051_v4 = vpop.f32.mrb[98].mxu0 }
 0x22c   : > { %v2084_v32 = vpop.f32.mrb[99].mxu1  ;;  %3390 = vst [vmem:[#allocation2 + $0x310] sm:$0xff] %v5372_v12  ;;  %v5378_v51 = vadd.f32 %v5051_v4, %v4921_v31  ;;  %v3040_v15 = vpop.f32.mrb[99].mxu0 }
 0x22d   : > { %v3514_v33 = vld [vmem:[#allocation2 + $0x2f0] ss:$2 sm:$0xff]  ;;  %v3642_v20 = vld [vmem:[#allocation2 + $0x2f1] ss:$2 sm:$0xff]  ;;  %3388 = vst [vmem:[#allocation2 + $0x300] sm:$0xff] %v5375_v44  ;;  %v5381_v5 = vadd.f32 %v3040_v15, %v2084_v32 }
 0x22e   : > { %v3722_v24 = vmax.f32 %v3514_v33, %v3642_v20  ;;  %v3512_v45 = vld [vmem:[#allocation2 + $0x2e0] ss:$2 sm:$0xff]  ;;  %v3640_v34 = vld [vmem:[#allocation2 + $0x2e1] ss:$2 sm:$0xff]  ;;  %3391 = vst [vmem:[#allocation2 + $0x318] sm:$0xff] %v5378_v51 }
 0x22f   : > { %v3721_v57 = vmax.f32 %v3512_v45, %v3640_v34  ;;  %3389 = vst [vmem:[#allocation2 + $0x308] sm:$0xff] %v5381_v5 }
 0x230   : > { %v3762_v46 = vmax.f32 %v3720_v54, %v3722_v24 }
 0x231   : > { %v4924_v59 = vpop.f32.mrb[100].mxu1  ;;  %v3761_v35 = vmax.f32 %v3719_v8, %v3721_v57  ;;  %v5054_v6 = vpop.f32.mrb[100].mxu0 }
 0x232   : > { %v2097_v25 = vpop.f32.mrb[101].mxu1  ;;  %v3801_v36 = vadd.f32 %v6529_v50, %v3762_v46  ;;  %v5384_v27 = vadd.f32 %v5054_v6, %v4924_v59  ;;  %v3053_v9 = vpop.f32.mrb[101].mxu0 }
 0x233   : > { %v4925_v7 = vpop.f32.mrb[102].mxu1  ;;  %v3800_v48 = vadd.f32 %v6529_v50, %v3761_v35  ;;  %v5387_v28 = vadd.f32 %v3053_v9, %v2097_v25  ;;  %v5055_v11 = vpop.f32.mrb[102].mxu0 }
 0x234   : > { %v2100_v10 = vpop.f32.mrb[103].mxu1  ;;  %v3833_v22 = vmax.f32 %v3801_v36, 0.0  ;;  %3394 = vst [vmem:[#allocation2 + $0x330] sm:$0xff] %v5384_v27  ;;  %v5390_v56 = vadd.f32 %v5055_v11, %v4925_v7  ;;  %v3056_v49 = vpop.f32.mrb[103].mxu0 }
 0x235   : > { %v3832_v37 = vmax.f32 %v3800_v48, 0.0  ;;  %3392 = vst [vmem:[#allocation2 + $0x320] sm:$0xff] %v5387_v28  ;;  %v5393_v55 = vadd.f32 %v3056_v49, %v2100_v10  ;;  %v3518_v18 = vld [vmem:[#allocation2 + $0x310] ss:$2 sm:$0xff]  ;;  %v3646_v47 = vld [vmem:[#allocation2 + $0x311] ss:$2 sm:$0xff] }
 0x236   : > { %3395 = vst [vmem:[#allocation2 + $0x338] sm:$0xff] %v5390_v56  ;;  %v3516_v29 = vld [vmem:[#allocation2 + $0x300] ss:$2 sm:$0xff]  ;;  %v3644_v21 = vld [vmem:[#allocation2 + $0x301] ss:$2 sm:$0xff]  ;;  %v3724_v2 = vmax.f32 %v3518_v18, %v3646_v47 }
 0x237   : > { %v4458_v14 = vpack.c.bf16 %v3833_v22, %v3832_v37  ;;  %3393 = vst [vmem:[#allocation2 + $0x328] sm:$0xff] %v5393_v55  ;;  %v3723_v1 = vmax.f32 %v3516_v29, %v3644_v21 }
 0x239   : > { %v4928_v61 = vpop.f32.mrb[104].mxu1  ;;  %4490 = vst [vmem:[%s6439_s29 + $0x58] sm:$0xff] %v4458_v14   ;;  %v5058_v62 = vpop.f32.mrb[104].mxu0 }
 0x23a   : > { %v2113_v38 = vpop.f32.mrb[105].mxu1  ;;  %v5396_v16 = vadd.f32 %v5058_v62, %v4928_v61  ;;  %v3069_v39 = vpop.f32.mrb[105].mxu0 }
 0x23b   : > { %v4929_v63 = vpop.f32.mrb[106].mxu1  ;;  %v5399_v19 = vadd.f32 %v3069_v39, %v2113_v38  ;;  %v5059_v40 = vpop.f32.mrb[106].mxu0 }
 0x23c   : > { %v2116_v53 = vpop.f32.mrb[107].mxu1  ;;  %3398 = vst [vmem:[#allocation2 + $0x350] sm:$0xff] %v5396_v16  ;;  %v5402_v23 = vadd.f32 %v5059_v40, %v4929_v63  ;;  %v3072_v58 = vpop.f32.mrb[107].mxu0 }
 0x23d   : > { %v3522_v26 = vld [vmem:[#allocation2 + $0x330] ss:$2 sm:$0xff]  ;;  %v3650_v41 = vld [vmem:[#allocation2 + $0x331] ss:$2 sm:$0xff]  ;;  %3396 = vst [vmem:[#allocation2 + $0x340] sm:$0xff] %v5399_v19  ;;  %v5405_v30 = vadd.f32 %v3072_v58, %v2116_v53 }
 0x23e   : > { %v3726_v52 = vmax.f32 %v3522_v26, %v3650_v41  ;;  %v3520_v0 = vld [vmem:[#allocation2 + $0x320] ss:$2 sm:$0xff]  ;;  %v3648_v42 = vld [vmem:[#allocation2 + $0x321] ss:$2 sm:$0xff]  ;;  %3399 = vst [vmem:[#allocation2 + $0x358] sm:$0xff] %v5402_v23 }
 0x23f   : > { %v3725_v31 = vmax.f32 %v3520_v0, %v3648_v42  ;;  %3397 = vst [vmem:[#allocation2 + $0x348] sm:$0xff] %v5405_v30 }
 0x240   : > { %v3764_v12 = vmax.f32 %v3724_v2, %v3726_v52 }
 0x241   : > { %v4932_v17 = vpop.f32.mrb[108].mxu1  ;;  %v3763_v43 = vmax.f32 %v3723_v1, %v3725_v31  ;;  %v5062_v32 = vpop.f32.mrb[108].mxu0 }
 0x242   : > { %v2129_v3 = vpop.f32.mrb[109].mxu1  ;;  %v3803_v44 = vadd.f32 %v6529_v50, %v3764_v12  ;;  %v5408_v60 = vadd.f32 %v5062_v32, %v4932_v17  ;;  %v3085_v13 = vpop.f32.mrb[109].mxu0 }
 0x243   : > { %v4933_v4 = vpop.f32.mrb[110].mxu1  ;;  %v3802_v51 = vadd.f32 %v6529_v50, %v3763_v43  ;;  %v5411_v33 = vadd.f32 %v3085_v13, %v2129_v3  ;;  %v5063_v20 = vpop.f32.mrb[110].mxu0 }
 0x244   : > { %v2132_v15 = vpop.f32.mrb[111].mxu1  ;;  %v3835_v5 = vmax.f32 %v3803_v44, 0.0  ;;  %3402 = vst [vmem:[#allocation2 + $0x370] sm:$0xff] %v5408_v60  ;;  %v5414_v54 = vadd.f32 %v5063_v20, %v4933_v4  ;;  %v3088_v24 = vpop.f32.mrb[111].mxu0 }
 0x245   : > { %v3834_v45 = vmax.f32 %v3802_v51, 0.0  ;;  %3400 = vst [vmem:[#allocation2 + $0x360] sm:$0xff] %v5411_v33  ;;  %v5417_v34 = vadd.f32 %v3088_v24, %v2132_v15  ;;  %v3526_v36 = vld [vmem:[#allocation2 + $0x350] ss:$2 sm:$0xff]  ;;  %v3654_v7 = vld [vmem:[#allocation2 + $0x351] ss:$2 sm:$0xff] }
 0x246   : > { %3403 = vst [vmem:[#allocation2 + $0x378] sm:$0xff] %v5414_v54  ;;  %v3524_v10 = vld [vmem:[#allocation2 + $0x340] ss:$2 sm:$0xff]  ;;  %v3652_v28 = vld [vmem:[#allocation2 + $0x341] ss:$2 sm:$0xff]  ;;  %v3728_v55 = vmax.f32 %v3526_v36, %v3654_v7 }
 0x247   : > { %v4463_v8 = vpack.c.bf16 %v3835_v5, %v3834_v45  ;;  %3401 = vst [vmem:[#allocation2 + $0x368] sm:$0xff] %v5417_v34  ;;  %v3727_v62 = vmax.f32 %v3524_v10, %v3652_v28 }
 0x249   : > { %v4936_v57 = vpop.f32.mrb[112].mxu1  ;;  %4491 = vst [vmem:[%s6439_s29 + $0x60] sm:$0xff] %v4463_v8   ;;  %v5066_v59 = vpop.f32.mrb[112].mxu0 }
 0x24a   : > { %v2145_v46 = vpop.f32.mrb[113].mxu1  ;;  %v5420_v25 = vadd.f32 %v5066_v59, %v4936_v57  ;;  %v3101_v6 = vpop.f32.mrb[113].mxu0 }
 0x24b   : > { %v4937_v35 = vpop.f32.mrb[114].mxu1  ;;  %v5423_v9 = vadd.f32 %v3101_v6, %v2145_v46  ;;  %v5067_v48 = vpop.f32.mrb[114].mxu0 }
 0x24c   : > { %v2148_v27 = vpop.f32.mrb[115].mxu1  ;;  %3406 = vst [vmem:[#allocation2 + $0x390] sm:$0xff] %v5420_v25  ;;  %v5426_v11 = vadd.f32 %v5067_v48, %v4937_v35  ;;  %v3104_v22 = vpop.f32.mrb[115].mxu0 }
 0x24d   : > { %v3530_v56 = vld [vmem:[#allocation2 + $0x370] ss:$2 sm:$0xff]  ;;  %v3658_v49 = vld [vmem:[#allocation2 + $0x371] ss:$2 sm:$0xff]  ;;  %3404 = vst [vmem:[#allocation2 + $0x380] sm:$0xff] %v5423_v9  ;;  %v5429_v37 = vadd.f32 %v3104_v22, %v2148_v27 }
 0x24e   : > { %v3730_v14 = vmax.f32 %v3530_v56, %v3658_v49  ;;  %v3528_v61 = vld [vmem:[#allocation2 + $0x360] ss:$2 sm:$0xff]  ;;  %v3656_v38 = vld [vmem:[#allocation2 + $0x361] ss:$2 sm:$0xff]  ;;  %3407 = vst [vmem:[#allocation2 + $0x398] sm:$0xff] %v5426_v11 }
 0x24f   : > { %v3729_v63 = vmax.f32 %v3528_v61, %v3656_v38  ;;  %3405 = vst [vmem:[#allocation2 + $0x388] sm:$0xff] %v5429_v37 }
 0x250   : > { %v3766_v16 = vmax.f32 %v3728_v55, %v3730_v14 }
 0x251   : > { %v4940_v39 = vpop.f32.mrb[116].mxu1  ;;  %v3765_v18 = vmax.f32 %v3727_v62, %v3729_v63  ;;  %v5070_v53 = vpop.f32.mrb[116].mxu0 }
 0x252   : > { %v2161_v47 = vpop.f32.mrb[117].mxu1  ;;  %v3805_v19 = vadd.f32 %v6529_v50, %v3766_v16  ;;  %v5432_v29 = vadd.f32 %v5070_v53, %v4940_v39  ;;  %v3117_v21 = vpop.f32.mrb[117].mxu0 }
 0x253   : > { %v4941_v40 = vpop.f32.mrb[118].mxu1  ;;  %v3804_v23 = vadd.f32 %v6529_v50, %v3765_v18  ;;  %v5435_v26 = vadd.f32 %v3117_v21, %v2161_v47  ;;  %v5071_v41 = vpop.f32.mrb[118].mxu0 }
 0x254   : > { %v2164_v58 = vpop.f32.mrb[119].mxu1  ;;  %v3837_v30 = vmax.f32 %v3805_v19, 0.0  ;;  %3410 = vst [vmem:[#allocation2 + $0x3b0] sm:$0xff] %v5432_v29  ;;  %v5438_v2 = vadd.f32 %v5071_v41, %v4941_v40  ;;  %v3120_v52 = vpop.f32.mrb[119].mxu0 }
 0x255   : > { %v3836_v0 = vmax.f32 %v3804_v23, 0.0  ;;  %3408 = vst [vmem:[#allocation2 + $0x3a0] sm:$0xff] %v5435_v26  ;;  %v5441_v42 = vadd.f32 %v3120_v52, %v2164_v58  ;;  %v3534_v44 = vld [vmem:[#allocation2 + $0x390] ss:$2 sm:$0xff]  ;;  %v3662_v4 = vld [vmem:[#allocation2 + $0x391] ss:$2 sm:$0xff] }
 0x256   : > { %3411 = vst [vmem:[#allocation2 + $0x3b8] sm:$0xff] %v5438_v2  ;;  %v3532_v15 = vld [vmem:[#allocation2 + $0x380] ss:$2 sm:$0xff]  ;;  %v3660_v33 = vld [vmem:[#allocation2 + $0x381] ss:$2 sm:$0xff]  ;;  %v3732_v34 = vmax.f32 %v3534_v44, %v3662_v4 }
 0x257   : > { %v4468_v1 = vpack.c.bf16 %v3837_v30, %v3836_v0  ;;  %3409 = vst [vmem:[#allocation2 + $0x3a8] sm:$0xff] %v5441_v42  ;;  %v3731_v59 = vmax.f32 %v3532_v15, %v3660_v33 }
 0x259   : > { %v4944_v31 = vpop.f32.mrb[120].mxu1  ;;  %4492 = vst [vmem:[%s6439_s29 + $0x68] sm:$0xff] %v4468_v1   ;;  %v5074_v17 = vpop.f32.mrb[120].mxu0 }
 0x25a   : > { %v2177_v12 = vpop.f32.mrb[121].mxu1  ;;  %v5444_v3 = vadd.f32 %v5074_v17, %v4944_v31  ;;  %v3133_v32 = vpop.f32.mrb[121].mxu0 }
 0x25b   : > { %v4945_v43 = vpop.f32.mrb[122].mxu1  ;;  %v5447_v13 = vadd.f32 %v3133_v32, %v2177_v12  ;;  %v5075_v51 = vpop.f32.mrb[122].mxu0 }
 0x25c   : > { %v2180_v60 = vpop.f32.mrb[123].mxu1  ;;  %3414 = vst [vmem:[#allocation2 + $0x3d0] sm:$0xff] %v5444_v3  ;;  %v5450_v20 = vadd.f32 %v5075_v51, %v4945_v43  ;;  %v3136_v5 = vpop.f32.mrb[123].mxu0 }
 0x25d   : > { %v3538_v54 = vld [vmem:[#allocation2 + $0x3b0] ss:$2 sm:$0xff]  ;;  %v3666_v24 = vld [vmem:[#allocation2 + $0x3b1] ss:$2 sm:$0xff]  ;;  %3412 = vst [vmem:[#allocation2 + $0x3c0] sm:$0xff] %v5447_v13  ;;  %v5453_v45 = vadd.f32 %v3136_v5, %v2180_v60 }
 0x25e   : > { %v3734_v8 = vmax.f32 %v3538_v54, %v3666_v24  ;;  %v3536_v57 = vld [vmem:[#allocation2 + $0x3a0] ss:$2 sm:$0xff]  ;;  %v3664_v46 = vld [vmem:[#allocation2 + $0x3a1] ss:$2 sm:$0xff]  ;;  %3415 = vst [vmem:[#allocation2 + $0x3d8] sm:$0xff] %v5450_v20 }
 0x25f   : > { %v3733_v35 = vmax.f32 %v3536_v57, %v3664_v46  ;;  %3413 = vst [vmem:[#allocation2 + $0x3c8] sm:$0xff] %v5453_v45 }
 0x260   : > { %v3768_v25 = vmax.f32 %v3732_v34, %v3734_v8 }
 0x261   : > { %v4948_v6 = vpop.f32.mrb[124].mxu1  ;;  %v3767_v36 = vmax.f32 %v3731_v59, %v3733_v35  ;;  %v5078_v27 = vpop.f32.mrb[124].mxu0 }
 0x262   : > { %v2193_v7 = vpop.f32.mrb[125].mxu1  ;;  %v3807_v9 = vadd.f32 %v6529_v50, %v3768_v25  ;;  %v5456_v10 = vadd.f32 %v5078_v27, %v4948_v6  ;;  %v3149_v28 = vpop.f32.mrb[125].mxu0 }
 0x263   : > { %v4949_v48 = vpop.f32.mrb[126].mxu1  ;;  %v3806_v11 = vadd.f32 %v6529_v50, %v3767_v36  ;;  %v5459_v56 = vadd.f32 %v3149_v28, %v2193_v7  ;;  %v5079_v49 = vpop.f32.mrb[126].mxu0 }
 0x264   : > { %v2196_v22 = vpop.f32.mrb[127].mxu1  ;;  %v3839_v37 = vmax.f32 %v3807_v9, 0.0  ;;  %3418 = vst [vmem:[#allocation2 + $0x3f0] sm:$0xff] %v5456_v10  ;;  %v5462_v55 = vadd.f32 %v5079_v49, %v4949_v48  ;;  %v3152_v14 = vpop.f32.mrb[127].mxu0 }
 0x265   : > { %v3838_v61 = vmax.f32 %v3806_v11, 0.0  ;;  %3416 = vst [vmem:[#allocation2 + $0x3e0] sm:$0xff] %v5459_v56  ;;  %v5465_v38 = vadd.f32 %v3152_v14, %v2196_v22  ;;  %v3542_v63 = vld [vmem:[#allocation2 + $0x3d0] ss:$2 sm:$0xff]  ;;  %v3670_v16 = vld [vmem:[#allocation2 + $0x3d1] ss:$2 sm:$0xff] }
 0x266   : > { %3419 = vst [vmem:[#allocation2 + $0x3f8] sm:$0xff] %v5462_v55  ;;  %v3540_v39 = vld [vmem:[#allocation2 + $0x3c0] ss:$2 sm:$0xff]  ;;  %v3668_v18 = vld [vmem:[#allocation2 + $0x3c1] ss:$2 sm:$0xff]  ;;  %v3736_v19 = vmax.f32 %v3542_v63, %v3670_v16 }
 0x267   : > { %v4473_v62 = vpack.c.bf16 %v3839_v37, %v3838_v61  ;;  %3417 = vst [vmem:[#allocation2 + $0x3e8] sm:$0xff] %v5465_v38  ;;  %v3735_v23 = vmax.f32 %v3540_v39, %v3668_v18 }
 0x269   : > { %4493 = vst [vmem:[%s6439_s29 + $0x70] sm:$0xff] %v4473_v62  }
 0x26d   : > { %v3546_v47 = vld [vmem:[#allocation2 + $0x3f0] ss:$2 sm:$0xff]  ;;  %v3674_v53 = vld [vmem:[#allocation2 + $0x3f1] ss:$2 sm:$0xff] }
 0x26e   : > { %v3738_v40 = vmax.f32 %v3546_v47, %v3674_v53  ;;  %v3544_v29 = vld [vmem:[#allocation2 + $0x3e0] ss:$2 sm:$0xff]  ;;  %v3672_v21 = vld [vmem:[#allocation2 + $0x3e1] ss:$2 sm:$0xff] }
 0x26f   : > { %v3737_v58 = vmax.f32 %v3544_v29, %v3672_v21 }
 0x270   : > { %v3770_v26 = vmax.f32 %v3736_v19, %v3738_v40 }
 0x271   : > { %v3769_v41 = vmax.f32 %v3735_v23, %v3737_v58 }
 0x272   : > { %v3809_v30 = vadd.f32 %v6529_v50, %v3770_v26 }
 0x273   : > { %v3808_v2 = vadd.f32 %v6529_v50, %v3769_v41 }
 0x274   : > { %v3841_v52 = vmax.f32 %v3809_v30, 0.0 }
 0x275   : > { %v3840_v0 = vmax.f32 %v3808_v2, 0.0 }
 0x277   : > { %v4478_v42 = vpack.c.bf16 %v3841_v52, %v3840_v0 }
 0x279   : > { %4494 = vst [vmem:[%s6439_s29 + $0x78] sm:$0xff] %v4478_v42  }
 0x27a PF: > { %s13_s12 = sadd.s32 1, %s5682_s12  }
 0x27b   : > { %p10_p4 = scmp.ge.s32.totalorder %s13_s12, 4  }
 0x27d   :  { %12 = sbr.rel (!%p10_p4) target bundleno = 1 (0x1), region = 191 }

// kernel: variable_input_cnn_forward.7
= control target key start
LH: loop header
LB: loop body
LE: loop exit
PB: predicated region body
PF: predicated region fallthrough
CT: control target
= control target key end

     0   :  { %v28_v28 = vlaneseq  ;;  %v1953_v36 = vmov 1983009808   ;;  %s2396_s0 = inlined_call_operand.vmem [shape: f32[2,2048], index: 0, kind: input, shape index: {}]   ;;  %s2397_s1 = inlined_call_operand.vmem [shape: bf16[2048,128], index: 1, kind: input, shape index: {}]   ;;  %s2398_s2 = inlined_call_operand.vmem [shape: f32[1,128], index: 2, kind: input, shape index: {}]   ;;  %s2399_s3 = inlined_call_operand.hbm [shape: f32[2,128], index: 3, kind: output, shape index: {}]  }
   0x1   :  { %v1797_v0 = vld [vmem:[%s2397_s1 + $0x40] sm:$0xff]   ;;  %v1801_v4 = vld [vmem:[%s2397_s1 + $0x48] sm:$0xff]   ;;  %v1805_v8 = vld [vmem:[%s2397_s1 + $0x50] sm:$0xff]   ;;  %v26_v37 = vunpack.c.l.s4 %v1953_v36 }
   0x2   :  { %v1798_v1 = vld [vmem:[%s2397_s1 + $0xc0] sm:$0xff]   ;;  %1619 = vmatprep.subr.bf16.mxu0 %v1797_v0  ;;  %v1802_v5 = vld [vmem:[%s2397_s1 + $0xc8] sm:$0xff]   ;;  %v1806_v9 = vld [vmem:[%s2397_s1 + $0xd0] sm:$0xff]   ;;  %v29_v33 = vshrl.u32 %v28_v28, 7 }
   0x3   :  { %v1799_v2 = vld [vmem:[%s2397_s1] sm:$0xff]   ;;  %1641 = vmatprep.subr.bf16.mxu1 %v1798_v1  ;;  %v1803_v6 = vld [vmem:[%s2397_s1 + $0x8] sm:$0xff]   ;;  %v1807_v10 = vld [vmem:[%s2397_s1 + $0x10] sm:$0xff]   ;;  %v27_v39 = vunpack.c.0.s8 %v26_v37 }
   0x4   :  { %v1800_v3 = vld [vmem:[%s2397_s1 + $0x80] sm:$0xff]   ;;  %1620 = vmatpush3.bf16.msra.mxu0 %v1799_v2  ;;  %v1804_v7 = vld [vmem:[%s2397_s1 + $0x88] sm:$0xff]   ;;  %v1808_v11 = vld [vmem:[%s2397_s1 + $0x90] sm:$0xff]  }
   0x5   :  { %1642 = vmatpush3.bf16.msra.mxu1 %v1800_v3  ;;  %1621 = vmatprep.subr.bf16.mxu0 %v1801_v4  ;;  %v1809_v12 = vld [vmem:[%s2397_s1 + $0x58] sm:$0xff]   ;;  %v1813_v16 = vld [vmem:[%s2397_s1 + $0x60] sm:$0xff]   ;;  %v1817_v20 = vld [vmem:[%s2397_s1 + $0x68] sm:$0xff]   ;;  %v2080_v41 = vsub.s32 %v27_v39, %v29_v33 }
   0x6   :  { %1643 = vmatprep.subr.bf16.mxu1 %v1802_v5  ;;  %v1810_v13 = vld [vmem:[%s2397_s1 + $0xd8] sm:$0xff]   ;;  %v1814_v17 = vld [vmem:[%s2397_s1 + $0xe0] sm:$0xff]   ;;  %v1818_v21 = vld [vmem:[%s2397_s1 + $0xe8] sm:$0xff]  }
   0x7   :  { %v1811_v14 = vld [vmem:[%s2397_s1 + $0x18] sm:$0xff]   ;;  %v1815_v18 = vld [vmem:[%s2397_s1 + $0x20] sm:$0xff]   ;;  %v1819_v22 = vld [vmem:[%s2397_s1 + $0x28] sm:$0xff]  }
   0x8   :  { %1622 = vmatpush3.bf16.msra.mxu0 %v1803_v6  ;;  %v1812_v15 = vld [vmem:[%s2397_s1 + $0x98] sm:$0xff]   ;;  %v1816_v19 = vld [vmem:[%s2397_s1 + $0xa0] sm:$0xff]   ;;  %v1820_v23 = vld [vmem:[%s2397_s1 + $0xa8] sm:$0xff]  }
   0x9   :  { %1644 = vmatpush3.bf16.msra.mxu1 %v1804_v7  ;;  %1623 = vmatprep.subr.bf16.mxu0 %v1805_v8  ;;  %v1821_v24 = vld [vmem:[%s2397_s1 + $0x70] sm:$0xff]   ;;  %v1825_v29 = vld [vmem:[%s2397_s1 + $0x78] sm:$0xff]   ;;  %v16_v34 = vld [vmem:[%s2396_s0] sm:$0xff] }
   0xa   :  { %1645 = vmatprep.subr.bf16.mxu1 %v1806_v9  ;;  %v1822_v25 = vld [vmem:[%s2397_s1 + $0xf0] sm:$0xff]   ;;  %v1826_v30 = vld [vmem:[%s2397_s1 + $0xf8] sm:$0xff]   ;;  %v1830_v35 = vld [vmem:[%s2397_s1 + $0x140] sm:$0xff]   ;;  %v24_v40 = vcombine.high %v16_v34, %v16_v34  ;;  %v31_v42 = vrot.slane %v16_v34, %v2080_v41 }
   0xb   :  { %v1823_v26 = vld [vmem:[%s2397_s1 + $0x30] sm:$0xff]   ;;  %v1827_v31 = vld [vmem:[%s2397_s1 + $0x38] sm:$0xff]   ;;  %v1831_v38 = vld [vmem:[%s2397_s1 + $0x1c0] sm:$0xff]  }
   0xc   :  { %1624 = vmatpush3.bf16.msra.mxu0 %v1807_v10  ;;  %v1824_v27 = vld [vmem:[%s2397_s1 + $0xb0] sm:$0xff]   ;;  %v1828_v32 = vld [vmem:[%s2397_s1 + $0xb8] sm:$0xff]   ;;  %v38_v43 = vrot.slane %v24_v40, %v2080_v41  ;;  %v39_v44 = vcombine.high %v31_v42, %v31_v42  ;;  %v1832_v46 = vld [vmem:[%s2397_s1 + $0x100] sm:$0xff]   ;;  %v108_v47 = vpack.c.bf16 %v31_v42, %v31_v42 }
   0xd   :  { %1646 = vmatpush3.bf16.msra.mxu1 %v1808_v11  ;;  %1625 = vmatprep.subr.bf16.mxu0 %v1809_v12  ;;  %v1833_v49 = vld [vmem:[%s2397_s1 + $0x180] sm:$0xff]   ;;  %v1834_v52 = vld [vmem:[%s2397_s1 + $0x148] sm:$0xff]   ;;  %v1838_v56 = vld [vmem:[%s2397_s1 + $0x150] sm:$0xff]  }
   0xe   :  { %1647 = vmatprep.subr.bf16.mxu1 %v1810_v13  ;;  %v40_v45 = vcombine.high %v38_v43, %v38_v43  ;;  %v110_v48 = vpack.c.bf16 %v38_v43, %v38_v43  ;;  %v109_v50 = vpack.c.bf16 %v39_v44, %v39_v44  ;;  %v1835_v53 = vld [vmem:[%s2397_s1 + $0x1c8] sm:$0xff]   ;;  %v1839_v57 = vld [vmem:[%s2397_s1 + $0x1d0] sm:$0xff]   ;;  %v1842_v60 = vld [vmem:[%s2397_s1 + $0x158] sm:$0xff]  }
   0xf   :  { %v1836_v54 = vld [vmem:[%s2397_s1 + $0x108] sm:$0xff]   ;;  %v1840_v58 = vld [vmem:[%s2397_s1 + $0x110] sm:$0xff]   ;;  %v1843_v61 = vld [vmem:[%s2397_s1 + $0x1d8] sm:$0xff]  }
  0x10   :  { %1626 = vmatpush3.bf16.msra.mxu0 %v1811_v14  ;;  %v111_v51 = vpack.c.bf16 %v40_v45, %v40_v45  ;;  %1187 = vmatprep.mubr.bf16.mxu0 %v109_v50  ;;  %v1837_v55 = vld [vmem:[%s2397_s1 + $0x188] sm:$0xff]   ;;  %v1841_v59 = vld [vmem:[%s2397_s1 + $0x190] sm:$0xff]   ;;  %v1844_v62 = vld [vmem:[%s2397_s1 + $0x118] sm:$0xff]  }
  0x11   :  { %1648 = vmatpush3.bf16.msra.mxu1 %v1812_v15  ;;  %1627 = vmatprep.subr.bf16.mxu0 %v1813_v16  ;;  %v1845_v63 = vld [vmem:[%s2397_s1 + $0x198] sm:$0xff]   ;;  %v1846_v0 = vld [vmem:[%s2397_s1 + $0x160] sm:$0xff]   ;;  %v1850_v4 = vld [vmem:[%s2397_s1 + $0x168] sm:$0xff]  }
  0x12   :  { %1649 = vmatprep.subr.bf16.mxu1 %v1814_v17  ;;  %1227 = vmatprep.mubr.bf16.mxu1 %v111_v51  ;;  %v1847_v1 = vld [vmem:[%s2397_s1 + $0x1e0] sm:$0xff]   ;;  %v1851_v5 = vld [vmem:[%s2397_s1 + $0x1e8] sm:$0xff]   ;;  %v1854_v8 = vld [vmem:[%s2397_s1 + $0x170] sm:$0xff]  }
  0x13   :  { %v1848_v2 = vld [vmem:[%s2397_s1 + $0x120] sm:$0xff]   ;;  %v1852_v6 = vld [vmem:[%s2397_s1 + $0x128] sm:$0xff]   ;;  %v1855_v9 = vld [vmem:[%s2397_s1 + $0x1f0] sm:$0xff]  }
  0x14   :  { %1628 = vmatpush3.bf16.msra.mxu0 %v1815_v18  ;;  %v1849_v3 = vld [vmem:[%s2397_s1 + $0x1a0] sm:$0xff]   ;;  %v1853_v7 = vld [vmem:[%s2397_s1 + $0x1a8] sm:$0xff]   ;;  %v1856_v11 = vld [vmem:[%s2397_s1 + $0x130] sm:$0xff]  }
  0x15   :  { %1650 = vmatpush3.bf16.msra.mxu1 %v1816_v19  ;;  %1629 = vmatprep.subr.bf16.mxu0 %v1817_v20  ;;  %v17_v10 = vld [vmem:[%s2396_s0 + $0x8] sm:$0xff]  ;;  %v1857_v14 = vld [vmem:[%s2397_s1 + $0x1b0] sm:$0xff]   ;;  %v1858_v15 = vld [vmem:[%s2397_s1 + $0x178] sm:$0xff]  }
  0x16   :  { %1651 = vmatprep.subr.bf16.mxu1 %v1818_v21  ;;  %v48_v12 = vrot.slane %v17_v10, %v2080_v41  ;;  %v41_v13 = vcombine.high %v17_v10, %v17_v10  ;;  %v1859_v18 = vld [vmem:[%s2397_s1 + $0x1f8] sm:$0xff]   ;;  %v1870_v33 = vld [vmem:[%s2397_s1 + $0x288] sm:$0xff]   ;;  %v1871_v34 = vld [vmem:[%s2397_s1 + $0x250] sm:$0xff]  }
  0x17   :  { %v1860_v19 = vld [vmem:[%s2397_s1 + $0x138] sm:$0xff]   ;;  %v1873_v36 = vld [vmem:[%s2397_s1 + $0x210] sm:$0xff]   ;;  %v1879_v43 = vld [vmem:[%s2397_s1 + $0x260] sm:$0xff]  }
  0x18   :  { %1630 = vmatpush3.bf16.msra.mxu0 %v1819_v22  ;;  %v56_v16 = vcombine.high %v48_v12, %v48_v12  ;;  %v55_v17 = vrot.slane %v41_v13, %v2080_v41  ;;  %v1861_v22 = vld [vmem:[%s2397_s1 + $0x1b8] sm:$0xff]   ;;  %v1874_v37 = vld [vmem:[%s2397_s1 + $0x290] sm:$0xff]   ;;  %v1880_v44 = vld [vmem:[%s2397_s1 + $0x2e0] sm:$0xff]  }
  0x19   :  { %1652 = vmatpush3.bf16.msra.mxu1 %v1820_v23  ;;  %1631 = vmatprep.subr.bf16.mxu0 %v1821_v24  ;;  %v1863_v24 = vld [vmem:[%s2397_s1 + $0x240] sm:$0xff]   ;;  %v1876_v39 = vld [vmem:[%s2397_s1 + $0x2d8] sm:$0xff]   ;;  %v1886_v50 = vld [vmem:[%s2397_s1 + $0x2a8] sm:$0xff]  }
  0x1a   :  { %1653 = vmatprep.subr.bf16.mxu1 %v1822_v25  ;;  %v113_v20 = vpack.c.bf16 %v56_v16, %v56_v16  ;;  %v57_v21 = vcombine.high %v55_v17, %v55_v17  ;;  %v1864_v25 = vld [vmem:[%s2397_s1 + $0x2c0] sm:$0xff]   ;;  %v114_v28 = vpack.c.bf16 %v55_v17, %v55_v17  ;;  %v1877_v40 = vld [vmem:[%s2397_s1 + $0x218] sm:$0xff]   ;;  %v1887_v51 = vld [vmem:[%s2397_s1 + $0x270] sm:$0xff]  }
  0x1b   :  { %v1878_v42 = vld [vmem:[%s2397_s1 + $0x298] sm:$0xff]   ;;  %v1881_v45 = vld [vmem:[%s2397_s1 + $0x220] sm:$0xff]   ;;  %v1901_v10 = vld [vmem:[%s2397_s1 + $0x3c8] sm:$0xff]  }
  0x1c   :  { %1632 = vmatpush3.bf16.msra.mxu0 %v1823_v26  ;;  %v115_v23 = vpack.c.bf16 %v57_v21, %v57_v21  ;;  %v1865_v26 = vld [vmem:[%s2397_s1 + $0x200] sm:$0xff]   ;;  %v1904_v13 = vld [vmem:[%s2397_s1 + $0x350] sm:$0xff]   ;;  %v1908_v17 = vld [vmem:[%s2397_s1 + $0x358] sm:$0xff]  }
  0x1d   :  { %1654 = vmatpush3.bf16.msra.mxu1 %v1824_v27  ;;  %1633 = vmatprep.subr.bf16.mxu0 %v1825_v29  ;;  %v112_v27 = vpack.c.bf16 %v48_v12, %v48_v12  ;;  %v1866_v29 = vld [vmem:[%s2397_s1 + $0x280] sm:$0xff]   ;;  %v1903_v12 = vld [vmem:[%s2397_s1 + $0x388] sm:$0xff]   ;;  %v1907_v16 = vld [vmem:[%s2397_s1 + $0x390] sm:$0xff]  }
  0x1e   :  { %1655 = vmatprep.subr.bf16.mxu1 %v1826_v30  ;;  %v1867_v30 = vld [vmem:[%s2397_s1 + $0x248] sm:$0xff]   ;;  %v1912_v21 = vld [vmem:[%s2397_s1 + $0x360] sm:$0xff]  }
  0x20   :  { %1634 = vmatpush3.bf16.msra.mxu0 %v1827_v31  ;;  %v1868_v31 = vld [vmem:[%s2397_s1 + $0x2c8] sm:$0xff]  }
  0x21   :  { %1656 = vmatpush3.bf16.msra.mxu1 %v1828_v32  ;;  %1663 = vmatprep.subr.bf16.mxu0 %v1830_v35  ;;  %v1869_v32 = vld [vmem:[%s2397_s1 + $0x208] sm:$0xff]   ;;  %v1872_v35 = vld [vmem:[%s2397_s1 + $0x2d0] sm:$0xff]  }
  0x22   :  { %1685 = vmatprep.subr.bf16.mxu1 %v1831_v38  ;;  %v1875_v38 = vld [vmem:[%s2397_s1 + $0x258] sm:$0xff]  }
  0x23   :  { %1188 = vmatmul.mubr.bf16.vlgmr.msra.gmra.mrb[0].mxu0 %v108_v47  ;;  %v1883_v47 = vld [vmem:[%s2397_s1 + $0x268] sm:$0xff]  }
  0x24   :  { %1228 = vmatmul.mubr.bf16.vlgmr.msra.gmra.mrb[0].mxu1 %v110_v48  ;;  %1664 = vmatpush3.bf16.msra.mxu0 %v1832_v46  ;;  %v1882_v46 = vld [vmem:[%s2397_s1 + $0x2a0] sm:$0xff]   ;;  %v1884_v48 = vld [vmem:[%s2397_s1 + $0x2e8] sm:$0xff]  }
  0x25   :  { %1686 = vmatpush3.bf16.msra.mxu1 %v1833_v49  ;;  %1665 = vmatprep.subr.bf16.mxu0 %v1834_v52  ;;  %v1885_v49 = vld [vmem:[%s2397_s1 + $0x228] sm:$0xff]   ;;  %v1888_v52 = vld [vmem:[%s2397_s1 + $0x2f0] sm:$0xff]  }
  0x26   :  { %1687 = vmatprep.subr.bf16.mxu1 %v1835_v53  ;;  %1267 = vmatprep.mubr.bf16.mxu0 %v113_v20  ;;  %v18_v53 = vld [vmem:[%s2396_s0 + $0x10] sm:$0xff]  ;;  %v1911_v20 = vld [vmem:[%s2397_s1 + $0x398] sm:$0xff]  }
  0x27   :  { %1307 = vmatprep.mubr.bf16.mxu1 %v115_v23  ;;  %v1914_v23 = vld [vmem:[%s2397_s1 + $0x320] sm:$0xff]  }
  0x28   :  { %1666 = vmatpush3.bf16.msra.mxu0 %v1836_v54  ;;  %v1889_v54 = vld [vmem:[%s2397_s1 + $0x230] sm:$0xff]  }
  0x29   :  { %1688 = vmatpush3.bf16.msra.mxu1 %v1837_v55  ;;  %1667 = vmatprep.subr.bf16.mxu0 %v1838_v56  ;;  %v65_v55 = vrot.slane %v18_v53, %v2080_v41  ;;  %v58_v56 = vcombine.high %v18_v53, %v18_v53 }
  0x2a   :  { %1689 = vmatprep.subr.bf16.mxu1 %v1839_v57  ;;  %v1890_v57 = vld [vmem:[%s2397_s1 + $0x2b0] sm:$0xff]  }
  0x2c   :  { %1668 = vmatpush3.bf16.msra.mxu0 %v1840_v58  ;;  %v1891_v58 = vld [vmem:[%s2397_s1 + $0x278] sm:$0xff]  }
  0x2d   :  { %1690 = vmatpush3.bf16.msra.mxu1 %v1841_v59  ;;  %1669 = vmatprep.subr.bf16.mxu0 %v1842_v60  ;;  %v73_v59 = vcombine.high %v65_v55, %v65_v55  ;;  %v72_v60 = vrot.slane %v58_v56, %v2080_v41 }
  0x2e   :  { %1691 = vmatprep.subr.bf16.mxu1 %v1843_v61  ;;  %v1892_v61 = vld [vmem:[%s2397_s1 + $0x2f8] sm:$0xff]  }
  0x30   :  { %1670 = vmatpush3.bf16.msra.mxu0 %v1844_v62  ;;  %v1893_v62 = vld [vmem:[%s2397_s1 + $0x238] sm:$0xff]  }
  0x31   :  { %1692 = vmatpush3.bf16.msra.mxu1 %v1845_v63  ;;  %1671 = vmatprep.subr.bf16.mxu0 %v1846_v0  ;;  %v117_v63 = vpack.c.bf16 %v73_v59, %v73_v59  ;;  %v74_v0 = vcombine.high %v72_v60, %v72_v60 }
  0x32   :  { %1693 = vmatprep.subr.bf16.mxu1 %v1847_v1  ;;  %v1894_v1 = vld [vmem:[%s2397_s1 + $0x2b8] sm:$0xff]  }
  0x34   :  { %1672 = vmatpush3.bf16.msra.mxu0 %v1848_v2  ;;  %v119_v2 = vpack.c.bf16 %v74_v0, %v74_v0 }
  0x35   :  { %1694 = vmatpush3.bf16.msra.mxu1 %v1849_v3  ;;  %1673 = vmatprep.subr.bf16.mxu0 %v1850_v4  ;;  %v1896_v3 = vld [vmem:[%s2397_s1 + $0x340] sm:$0xff]  }
  0x36   :  { %1695 = vmatprep.subr.bf16.mxu1 %v1851_v5  ;;  %v1897_v4 = vld [vmem:[%s2397_s1 + $0x3c0] sm:$0xff]  }
  0x37   :  { %v1898_v5 = vld [vmem:[%s2397_s1 + $0x300] sm:$0xff]  }
  0x38   :  { %1674 = vmatpush3.bf16.msra.mxu0 %v1852_v6  ;;  %v116_v6 = vpack.c.bf16 %v65_v55, %v65_v55 }
  0x39   :  { %1696 = vmatpush3.bf16.msra.mxu1 %v1853_v7  ;;  %1675 = vmatprep.subr.bf16.mxu0 %v1854_v8  ;;  %v118_v7 = vpack.c.bf16 %v72_v60, %v72_v60  ;;  %v1899_v8 = vld [vmem:[%s2397_s1 + $0x380] sm:$0xff]  }
  0x3a   :  { %1697 = vmatprep.subr.bf16.mxu1 %v1855_v9  ;;  %v1900_v9 = vld [vmem:[%s2397_s1 + $0x348] sm:$0xff]  }
  0x3c   :  { %1676 = vmatpush3.bf16.msra.mxu0 %v1856_v11  ;;  %v1902_v11 = vld [vmem:[%s2397_s1 + $0x308] sm:$0xff]  }
  0x3d   :  { %1698 = vmatpush3.bf16.msra.mxu1 %v1857_v14  ;;  %1677 = vmatprep.subr.bf16.mxu0 %v1858_v15  ;;  %v1905_v14 = vld [vmem:[%s2397_s1 + $0x3d0] sm:$0xff]  }
  0x3e   :  { %1699 = vmatprep.subr.bf16.mxu1 %v1859_v18  ;;  %v1906_v15 = vld [vmem:[%s2397_s1 + $0x310] sm:$0xff]   ;;  %v1909_v18 = vld [vmem:[%s2397_s1 + $0x3d8] sm:$0xff]  }
  0x40   :  { %1678 = vmatpush3.bf16.msra.mxu0 %v1860_v19  ;;  %v1910_v19 = vld [vmem:[%s2397_s1 + $0x318] sm:$0xff]  }
  0x41   :  { %1700 = vmatpush3.bf16.msra.mxu1 %v1861_v22  ;;  %1707 = vmatprep.subr.bf16.mxu0 %v1863_v24  ;;  %v1913_v22 = vld [vmem:[%s2397_s1 + $0x3e0] sm:$0xff]  }
  0x42   :  { %1729 = vmatprep.subr.bf16.mxu1 %v1864_v25  ;;  %v1915_v24 = vld [vmem:[%s2397_s1 + $0x3a0] sm:$0xff]   ;;  %v1916_v25 = vld [vmem:[%s2397_s1 + $0x368] sm:$0xff]  }
  0x43   :  { %1268 = vmatmul.mubr.bf16.vlgmr.msra.gmra.mrb[4].mxu0 %v112_v27  ;;  %v1918_v27 = vld [vmem:[%s2397_s1 + $0x328] sm:$0xff]  }
  0x44   :  { %1308 = vmatmul.mubr.bf16.vlgmr.msra.gmra.mrb[4].mxu1 %v114_v28  ;;  %1708 = vmatpush3.bf16.msra.mxu0 %v1865_v26  ;;  %v1917_v26 = vld [vmem:[%s2397_s1 + $0x3e8] sm:$0xff]  }
  0x45   :  { %1730 = vmatpush3.bf16.msra.mxu1 %v1866_v29  ;;  %1709 = vmatprep.subr.bf16.mxu0 %v1867_v30  ;;  %v1919_v28 = vld [vmem:[%s2397_s1 + $0x3a8] sm:$0xff]   ;;  %v1920_v29 = vld [vmem:[%s2397_s1 + $0x370] sm:$0xff]  }
  0x46   :  { %1731 = vmatprep.subr.bf16.mxu1 %v1868_v31  ;;  %1347 = vmatprep.mubr.bf16.mxu0 %v117_v63  ;;  %v1921_v30 = vld [vmem:[%s2397_s1 + $0x3f0] sm:$0xff]   ;;  %v19_v31 = vld [vmem:[%s2396_s0 + $0x18] sm:$0xff] }
  0x47   :  { %1387 = vmatprep.mubr.bf16.mxu1 %v119_v2 }
  0x48   :  { %1710 = vmatpush3.bf16.msra.mxu0 %v1869_v32 }
  0x49   :  { %1732 = vmatpush3.bf16.msra.mxu1 %v1870_v33  ;;  %1711 = vmatprep.subr.bf16.mxu0 %v1871_v34 }
  0x4a   :  { %1733 = vmatprep.subr.bf16.mxu1 %v1872_v35 }
  0x4c   :  { %1712 = vmatpush3.bf16.msra.mxu0 %v1873_v36 }
  0x4d   :  { %1734 = vmatpush3.bf16.msra.mxu1 %v1874_v37  ;;  %1713 = vmatprep.subr.bf16.mxu0 %v1875_v38 }
  0x4e   :  { %1735 = vmatprep.subr.bf16.mxu1 %v1876_v39 }
  0x50   :  { %1714 = vmatpush3.bf16.msra.mxu0 %v1877_v40 }
  0x51   :  { %1736 = vmatpush3.bf16.msra.mxu1 %v1878_v42  ;;  %1715 = vmatprep.subr.bf16.mxu0 %v1879_v43 }
  0x52   :  { %1737 = vmatprep.subr.bf16.mxu1 %v1880_v44 }
  0x54   :  { %1716 = vmatpush3.bf16.msra.mxu0 %v1881_v45 }
  0x55   :  { %1738 = vmatpush3.bf16.msra.mxu1 %v1882_v46  ;;  %1717 = vmatprep.subr.bf16.mxu0 %v1883_v47 }
  0x56   :  { %1739 = vmatprep.subr.bf16.mxu1 %v1884_v48 }
  0x58   :  { %1718 = vmatpush3.bf16.msra.mxu0 %v1885_v49 }
  0x59   :  { %1740 = vmatpush3.bf16.msra.mxu1 %v1886_v50  ;;  %1719 = vmatprep.subr.bf16.mxu0 %v1887_v51 }
  0x5a   :  { %1741 = vmatprep.subr.bf16.mxu1 %v1888_v52 }
  0x5c   :  { %1720 = vmatpush3.bf16.msra.mxu0 %v1889_v54 }
  0x5d   :  { %1742 = vmatpush3.bf16.msra.mxu1 %v1890_v57  ;;  %1721 = vmatprep.subr.bf16.mxu0 %v1891_v58 }
  0x5e   :  { %1743 = vmatprep.subr.bf16.mxu1 %v1892_v61 }
  0x60   :  { %1722 = vmatpush3.bf16.msra.mxu0 %v1893_v62 }
  0x61   :  { %1744 = vmatpush3.bf16.msra.mxu1 %v1894_v1  ;;  %1751 = vmatprep.subr.bf16.mxu0 %v1896_v3 }
  0x62   :  { %1773 = vmatprep.subr.bf16.mxu1 %v1897_v4 }
  0x63   :  { %1348 = vmatmul.mubr.bf16.vlgmr.msra.gmra.mrb[8].mxu0 %v116_v6 }
  0x64   :  { %1388 = vmatmul.mubr.bf16.vlgmr.msra.gmra.mrb[8].mxu1 %v118_v7  ;;  %1752 = vmatpush3.bf16.msra.mxu0 %v1898_v5 }
  0x65   :  { %1774 = vmatpush3.bf16.msra.mxu1 %v1899_v8  ;;  %1753 = vmatprep.subr.bf16.mxu0 %v1900_v9 }
  0x66   :  { %1775 = vmatprep.subr.bf16.mxu1 %v1901_v10 }
  0x68   :  { %1754 = vmatpush3.bf16.msra.mxu0 %v1902_v11 }
  0x69   :  { %1776 = vmatpush3.bf16.msra.mxu1 %v1903_v12  ;;  %1755 = vmatprep.subr.bf16.mxu0 %v1904_v13 }
  0x6a   :  { %1777 = vmatprep.subr.bf16.mxu1 %v1905_v14 }
  0x6c   :  { %1756 = vmatpush3.bf16.msra.mxu0 %v1906_v15 }
  0x6d   :  { %1778 = vmatpush3.bf16.msra.mxu1 %v1907_v16  ;;  %1757 = vmatprep.subr.bf16.mxu0 %v1908_v17 }
  0x6e   :  { %1779 = vmatprep.subr.bf16.mxu1 %v1909_v18 }
  0x70   :  { %1758 = vmatpush3.bf16.msra.mxu0 %v1910_v19 }
  0x71   :  { %1780 = vmatpush3.bf16.msra.mxu1 %v1911_v20  ;;  %1759 = vmatprep.subr.bf16.mxu0 %v1912_v21 }
  0x72   :  { %1781 = vmatprep.subr.bf16.mxu1 %v1913_v22 }
  0x74   :  { %1760 = vmatpush3.bf16.msra.mxu0 %v1914_v23 }
  0x75   :  { %1782 = vmatpush3.bf16.msra.mxu1 %v1915_v24  ;;  %1761 = vmatprep.subr.bf16.mxu0 %v1916_v25 }
  0x76   :  { %1783 = vmatprep.subr.bf16.mxu1 %v1917_v26 }
  0x77   :  { %8 = vsyncpa [#allocation3], 0  ;;  %v82_v32 = vrot.slane %v19_v31, %v2080_v41  ;;  %v75_v33 = vcombine.high %v19_v31, %v19_v31  ;;  %v1922_v34 = vld [vmem:[%s2397_s1 + $0x330] sm:$0xff]   ;;  %v1924_v36 = vld [vmem:[%s2397_s1 + $0x378] sm:$0xff]  }
  0x78   :  { %1762 = vmatpush3.bf16.msra.mxu0 %v1918_v27  ;;  %v1923_v35 = vld [vmem:[%s2397_s1 + $0x3b0] sm:$0xff]   ;;  %v1925_v37 = vld [vmem:[%s2397_s1 + $0x3f8] sm:$0xff]   ;;  %v1490_v49 = vld [vmem:[%s2398_s2] ss:$0 sm:$0xff] }
  0x79   :  { %1784 = vmatpush3.bf16.msra.mxu1 %v1919_v28  ;;  %1763 = vmatprep.subr.bf16.mxu0 %v1920_v29  ;;  %v90_v38 = vcombine.high %v82_v32, %v82_v32  ;;  %v89_v39 = vrot.slane %v75_v33, %v2080_v41  ;;  %v1926_v43 = vld [vmem:[%s2397_s1 + $0x338] sm:$0xff]   ;;  %v120_v46 = vpack.c.bf16 %v82_v32, %v82_v32 }
  0x7a   :  { %1785 = vmatprep.subr.bf16.mxu1 %v1921_v30  ;;  %v1927_v44 = vld [vmem:[%s2397_s1 + $0x3b8] sm:$0xff]   ;;  %s1954_s1 = smov [#allocation2]  }
  0x7b   :  { %v121_v40 = vpack.c.bf16 %v90_v38, %v90_v38  ;;  %v91_v42 = vcombine.high %v89_v39, %v89_v39  ;;  %v122_v47 = vpack.c.bf16 %v89_v39, %v89_v39  ;;  %s1482_s2 = sshll.u32 %s1954_s1, 4  ;;  %s1483_s2 = int_to_ptr.vmem [resolvable:$true] %s1482_s2 }
  0x7c   :  { %1764 = vmatpush3.bf16.msra.mxu0 %v1922_v34  ;;  %s1929_s7 = scalar_lea.vmem %s1483_s2, 32  ;;  %p1934_p1 = scmp.lt.s32.totalorder %s1483_s2, %s1483_s2 }
  0x7d   :  { %1786 = vmatpush3.bf16.msra.mxu1 %v1923_v35  ;;  %1765 = vmatprep.subr.bf16.mxu0 %v1924_v36  ;;  %v123_v45 = vpack.c.bf16 %v91_v42, %v91_v42  ;;  %p1930_p0 = scmp.ne.s32.totalorder %s1483_s2, %s1929_s7  ;;  %p1935_p2 = scmp.lt.s32.totalorder %s1929_s7, %s1929_s7 }
  0x7e   :  { %1787 = vmatprep.subr.bf16.mxu1 %v1925_v37  ;;  %1427 = vmatprep.mubr.bf16.mxu0 %v121_v40 }
  0x7f   :  { %1467 = vmatprep.mubr.bf16.mxu1 %v123_v45  ;;  %p1936_p3 = por %p1935_p2, %p1934_p1 }
  0x80   :  { %1766 = vmatpush3.bf16.msra.mxu0 %v1926_v43 }
  0x81   :  { %1788 = vmatpush3.bf16.msra.mxu1 %v1927_v44  ;;  %p1937_p4 = pnand %p1936_p3, %p1930_p0 }
  0x83   :  { %1428 = vmatmul.mubr.bf16.vlgmr.msra.gmra.mrb[12].mxu0 %v120_v46 }
  0x84   :  { %1468 = vmatmul.mubr.bf16.vlgmr.msra.gmra.mrb[12].mxu1 %v122_v47 }
  0xf6   :  { %v1635_v41 = vpop.f32.mrb[0].mxu0 }
  0xf7   :  { %v1657_v48 = vpop.f32.mrb[0].mxu1  ;;  %v1636_v50 = vpop.f32.mrb[1].mxu0 }
  0xf8   :  { %v1658_v51 = vpop.f32.mrb[1].mxu1  ;;  %v1637_v52 = vadd.f32 %v1636_v50, %v1635_v41  ;;  %v1638_v54 = vpop.f32.mrb[2].mxu0 }
  0xf9   :  { %v1659_v53 = vadd.f32 %v1658_v51, %v1657_v48  ;;  %v1660_v55 = vpop.f32.mrb[2].mxu1  ;;  %v1639_v56 = vpop.f32.mrb[3].mxu0 }
  0xfa   :  { %v1661_v57 = vpop.f32.mrb[3].mxu1  ;;  %v1190_v58 = vadd.f32 %v1637_v52, %v1490_v49 }
  0xfc   :  { %v1230_v59 = vadd.f32 %v1659_v53, %v1190_v58 }
 0x116   :  { %v1679_v60 = vpop.f32.mrb[4].mxu0 }
 0x117   :  { %v1701_v61 = vpop.f32.mrb[4].mxu1  ;;  %v1680_v62 = vpop.f32.mrb[5].mxu0 }
 0x118   :  { %v1702_v63 = vpop.f32.mrb[5].mxu1  ;;  %v1681_v0 = vadd.f32 %v1680_v62, %v1679_v60  ;;  %v1682_v2 = vpop.f32.mrb[6].mxu0 }
 0x119   :  { %v1703_v1 = vadd.f32 %v1702_v63, %v1701_v61  ;;  %v1704_v3 = vpop.f32.mrb[6].mxu1  ;;  %v1683_v4 = vpop.f32.mrb[7].mxu0 }
 0x11a   :  { %v1705_v5 = vpop.f32.mrb[7].mxu1  ;;  %v1270_v6 = vadd.f32 %v1681_v0, %v1230_v59 }
 0x11c   :  { %v1310_v7 = vadd.f32 %v1703_v1, %v1270_v6 }
 0x136   :  { %v1723_v8 = vpop.f32.mrb[8].mxu0 }
 0x137   :  { %v1745_v9 = vpop.f32.mrb[8].mxu1  ;;  %v1724_v10 = vpop.f32.mrb[9].mxu0 }
 0x138   :  { %v1746_v11 = vpop.f32.mrb[9].mxu1  ;;  %v1725_v12 = vadd.f32 %v1724_v10, %v1723_v8  ;;  %v1726_v14 = vpop.f32.mrb[10].mxu0 }
 0x139   :  { %v1747_v13 = vadd.f32 %v1746_v11, %v1745_v9  ;;  %v1748_v15 = vpop.f32.mrb[10].mxu1  ;;  %v1727_v16 = vpop.f32.mrb[11].mxu0 }
 0x13a   :  { %v1749_v17 = vpop.f32.mrb[11].mxu1  ;;  %v1350_v18 = vadd.f32 %v1725_v12, %v1310_v7 }
 0x13c   :  { %v1390_v19 = vadd.f32 %v1747_v13, %v1350_v18 }
 0x156   :  { %v1767_v20 = vpop.f32.mrb[12].mxu0 }
 0x157   :  { %v1789_v21 = vpop.f32.mrb[12].mxu1  ;;  %v1768_v22 = vpop.f32.mrb[13].mxu0 }
 0x158   :  { %v1790_v23 = vpop.f32.mrb[13].mxu1  ;;  %v1769_v24 = vadd.f32 %v1768_v22, %v1767_v20  ;;  %v1770_v26 = vpop.f32.mrb[14].mxu0 }
 0x159   :  { %v1791_v25 = vadd.f32 %v1790_v23, %v1789_v21  ;;  %v1792_v27 = vpop.f32.mrb[14].mxu1  ;;  %v1771_v28 = vpop.f32.mrb[15].mxu0 }
 0x15a   :  { %v1793_v29 = vpop.f32.mrb[15].mxu1  ;;  %v1430_v30 = vadd.f32 %v1769_v24, %v1390_v19 }
 0x15c   :  { %v1470_v31 = vadd.f32 %v1791_v25, %v1430_v30 }
 0x15e   :  { %1475 = vst [vmem:[#allocation2] sm:$0x3] %v1470_v31 }
 0x15f   :  { %1940 = shalt.err (!%p1937_p4)
}
 0x160   :  { %s1941_s10 = scalar_lea.hbm %s2399_s3, 32 }
 0x161   :  { %p1942_p5 = scmp.ne.s32.totalorder %s2399_s3, %s1941_s10  ;;  %p1945_p6 = scmp.lt.u32.totalorder %s1941_s10, %s2399_s3 }
 0x163   :  { %p1947_p7 = pnand %p1945_p6, %p1942_p5 }
 0x165   :  { %1950 = shalt.err (!%p1947_p7)
}
 0x166   :  { %1485 = dma.vmem_to_hbm [thread:$0]  %s1483_s2, 32, %s2399_s3, [#allocation3]  }
 0x167   :  { %1951 = dma.done.wait [#allocation3], 32  }
 0x168   :  { %1952 = vsyncadd [#allocation3], 4294967264 }
 0x169   :  { %1489 = vsyncpa [#allocation3], 1 }

</bundles_post_ra>
